<compile_context>
chip_gen: v5e
topology: v5e:2x2
jax: 0.10.0
libtpu: 0.0.40
codegen_flags: <defaults>
</compile_context>

<pallas_src>
import math
from functools import partial

import numpy as np
import jax
import jax.numpy as jnp
from jax.experimental import pallas as pl
from jax.experimental.pallas import tpu as pltpu


_LN_EPS = 1e-6


def _default_vmem_limit():
    """Generation-aware VMEM budget: ~3/4 of physical, capped at 96 MiB."""
    try:
        info = pltpu.get_tpu_info()
        cap = getattr(info, "vmem_capacity_bytes", None) or (64 << 20)
    except Exception:  # pragma: no cover - conservative fallback
        cap = 64 << 20
    return int(max(48 << 20, min(3 * cap // 4, 96 << 20)))


_VMEM_LIMIT = _default_vmem_limit()


def _cparams(*sem):
    return pltpu.CompilerParams(dimension_semantics=sem,
                                vmem_limit_bytes=_VMEM_LIMIT)


def _pick_tile(dim, pref, align):
    """Largest `align`-aligned tile <= pref that divides dim, else the full dim."""
    if dim <= pref:
        return dim
    for cand in range(pref, 0, -align):
        if dim % cand == 0:
            return cand
    return dim


# ---------------------------------------------------------------------------
# Kernel bodies
# ---------------------------------------------------------------------------

def _ln_rows(x, g, b):
    mean = jnp.mean(x, axis=-1, keepdims=True)
    xc = x - mean
    var = jnp.mean(xc * xc, axis=-1, keepdims=True)
    return xc * jax.lax.rsqrt(var + _LN_EPS) * g + b


def _mm_bias_kernel(x_ref, w_ref, b_ref, o_ref, acc_ref):
    # Tiled x @ w + b with f32 accumulator over the K grid axis.
    k = pl.program_id(2)

    @pl.when(k == 0)
    def _():
        acc_ref[...] = jnp.zeros_like(acc_ref)

    xv = x_ref[...]
    if xv.dtype != jnp.bfloat16:         # static: only casts f32 producers
        xv = xv.astype(jnp.bfloat16)
    acc_ref[...] += jnp.dot(xv, w_ref[...], preferred_element_type=jnp.float32)

    @pl.when(k == pl.num_programs(2) - 1)
    def _():
        o_ref[...] = (acc_ref[...] + b_ref[...]).astype(o_ref.dtype)


def _ln_mm_bias_kernel(x_ref, g_ref, bln_ref, w_ref, b_ref, o_ref, xn_ref):
    # LayerNorm(x) @ w + b.  LN computed once per row tile (j == 0), cached in
    # VMEM scratch (bf16, MXU-ready) and reused across all N tiles.
    j = pl.program_id(1)

    @pl.when(j == 0)
    def _():
        xn_ref[...] = _ln_rows(x_ref[...], g_ref[...],
                               bln_ref[...]).astype(xn_ref.dtype)

    o_ref[...] = (jnp.dot(xn_ref[...], w_ref[...],
                          preferred_element_type=jnp.float32)
                  + b_ref[...]).astype(o_ref.dtype)


def _ln_ffn_kernel(x_ref, g_ref, bln_ref, w1_ref, b1_ref, w2_ref, b2_ref,
                   *rest, apply_out_ln):
    # x + relu(LN(x) @ w1 + b1) @ w2 + b2, tiled over F with a f32 accumulator.
    # Optionally applies a second (output) LayerNorm in the epilogue (used to
    # fuse the encoder's final LayerNorm into the last encoder layer).
    if apply_out_ln:
        go_ref, bo_ref, o_ref, xn_ref, acc_ref = rest
    else:
        o_ref, xn_ref, acc_ref = rest
    f = pl.program_id(1)

    @pl.when(f == 0)
    def _():
        xn_ref[...] = _ln_rows(x_ref[...], g_ref[...],
                               bln_ref[...]).astype(xn_ref.dtype)
        acc_ref[...] = jnp.zeros_like(acc_ref)

    h = jnp.dot(xn_ref[...], w1_ref[...],
                preferred_element_type=jnp.float32) + b1_ref[...]
    h = jnp.maximum(h, 0.0)
    acc_ref[...] += jnp.dot(h.astype(jnp.bfloat16), w2_ref[...],
                            preferred_element_type=jnp.float32)

    @pl.when(f == pl.num_programs(1) - 1)
    def _():
        y = x_ref[...] + acc_ref[...] + b2_ref[...]
        if apply_out_ln:
            y = _ln_rows(y, go_ref[...], bo_ref[...])
        o_ref[...] = y.astype(o_ref.dtype)


def _attn_kernel(q_ref, kv_ref, pad_ref, res_ref, wo_ref, bo_ref, *out_refs,
                 n_head, causal, write_probs):
    """Fused multi-head attention + output projection + residual.

    q:  (1, tq, H)  bf16   (Sq tile of queries)
    kv: (1, Sk, 2H) bf16   (full keys|values for this batch element)
    pad:(1, 1, Sk)  int32  (per-key pad flags; mask is built in-kernel)
    res:(1, tq, H)  f32    (residual input, added in the epilogue)
    wo: (H, H)      bf16 ; bo: (1, H) f32
    out:(1, tq, H)  f32  [+ probs (1, n_head, tq, Sk) f32]
    """
    if write_probs:
        o_ref, a_ref = out_refs
    else:
        (o_ref,) = out_refs

    q = q_ref[0]                       # (tq, H)  bf16
    kvx = kv_ref[0]                    # (Sk, 2H) bf16
    res = res_ref[0]                   # (tq, H)  f32
    tq, H = q.shape
    Sk = kvx.shape[0]
    Dh = H // n_head
    scale = 1.0 / math.sqrt(Dh)

    # In-kernel mask construction: pad-over-keys (+ causal for decoder self-attn).
    keymask = jnp.broadcast_to(pad_ref[0] > 0, (tq, Sk))
    if causal:
        qpos = (pl.program_id(1) * tq
                + jax.lax.broadcasted_iota(jnp.int32, (tq, Sk), 0))
        kpos = jax.lax.broadcasted_iota(jnp.int32, (tq, Sk), 1)
        keymask = keymask | (kpos > qpos)

    out = jnp.zeros((tq, H), jnp.float32)
    for h in range(n_head):
        sl = slice(h * Dh, (h + 1) * Dh)
        # q_h @ k_h.T  (contract the Dh dim directly; no explicit transpose).
        s = jax.lax.dot_general(q[:, sl], kvx[:, sl],
                                (((1,), (1,)), ((), ())),
                                preferred_element_type=jnp.float32) * scale
        s = jnp.where(keymask, -1e9, s)
        s = s - jnp.max(s, axis=-1, keepdims=True)
        e = jnp.exp(s)
        p = e * pl.reciprocal(jnp.sum(e, axis=-1, keepdims=True), approx=True)
        if write_probs:
            a_ref[0, h] = p            # direct per-head write, bounded live range
        ctx_h = jnp.dot(p.astype(jnp.bfloat16),
                        kvx[:, H + h * Dh:H + (h + 1) * Dh],
                        preferred_element_type=jnp.float32)
        # Fused output projection: accumulate ctx_h @ w_o[h*Dh:(h+1)*Dh, :]
        # (no (tq, H) context concat, no HBM round trip).
        out = out + jnp.dot(ctx_h.astype(jnp.bfloat16), wo_ref[sl, :],
                            preferred_element_type=jnp.float32)

    o_ref[0] = (out + bo_ref[...] + res).astype(o_ref.dtype)


# ---------------------------------------------------------------------------
# pallas_call wrappers
# ---------------------------------------------------------------------------

def tiled_linear(x, w, bias, out_dtype=jnp.float32,
                 tm_pref=512, tn_pref=512, tk_pref=1024):
    """x @ w + bias, tiled over (M, N, K) with a K-axis f32 accumulator."""
    M, K = x.shape
    N = w.shape[1]
    tm = _pick_tile(M, tm_pref, 16)
    tn = _pick_tile(N, tn_pref, 128)
    tk = _pick_tile(K, tk_pref, 128)
    b2 = bias.reshape(1, N).astype(jnp.float32)
    return pl.pallas_call(
        _mm_bias_kernel,
        grid=(M // tm, N // tn, K // tk),
        in_specs=[pl.BlockSpec((tm, tk), lambda i, j, k: (i, k)),
                  pl.BlockSpec((tk, tn), lambda i, j, k: (k, j)),
                  pl.BlockSpec((1, tn), lambda i, j, k: (0, j))],
        out_specs=pl.BlockSpec((tm, tn), lambda i, j, k: (i, j)),
        out_shape=jax.ShapeDtypeStruct((M, N), out_dtype),
        scratch_shapes=[pltpu.VMEM((tm, tn), jnp.float32)],
        compiler_params=_cparams("parallel", "parallel", "arbitrary"),
    )(x, w, b2)


def ln_linear(x2d, g, b_ln, w, bias, out_dtype=jnp.bfloat16,
              tm_pref=512, tn_pref=512):
    """LayerNorm(x) @ w + bias; LN cached in VMEM scratch across N tiles."""
    M, K = x2d.shape
    N = w.shape[1]
    tm = _pick_tile(M, tm_pref, 16)
    tn = _pick_tile(N, tn_pref, 128)
    g2 = g.reshape(1, K)
    bl2 = b_ln.reshape(1, K)
    b2 = bias.reshape(1, N).astype(jnp.float32)
    return pl.pallas_call(
        _ln_mm_bias_kernel,
        grid=(M // tm, N // tn),
        in_specs=[pl.BlockSpec((tm, K), lambda i, j: (i, 0)),
                  pl.BlockSpec((1, K), lambda i, j: (0, 0)),
                  pl.BlockSpec((1, K), lambda i, j: (0, 0)),
                  pl.BlockSpec((K, tn), lambda i, j: (0, j)),
                  pl.BlockSpec((1, tn), lambda i, j: (0, j))],
        out_specs=pl.BlockSpec((tm, tn), lambda i, j: (i, j)),
        out_shape=jax.ShapeDtypeStruct((M, N), out_dtype),
        scratch_shapes=[pltpu.VMEM((tm, K), jnp.bfloat16)],
        compiler_params=_cparams("parallel", "arbitrary"),
    )(x2d, g2, bl2, w, b2)


def ln_ffn(x2d, g, b_ln, ffn_p, out_ln=None, out_dtype=jnp.float32,
           tm_pref=512, tf_pref=512):
    """x + FFN(LayerNorm(x)) [+ optional output LayerNorm], tiled over (M, F)."""
    M, H = x2d.shape
    F = ffn_p["w1"].shape[1]
    tm = _pick_tile(M, tm_pref, 16)
    tf = _pick_tile(F, tf_pref, 128)
    g2 = g.reshape(1, H)
    bl2 = b_ln.reshape(1, H)
    b1 = ffn_p["b1"].reshape(1, F)
    b2 = ffn_p["b2"].reshape(1, H)

    operands = [x2d, g2, bl2, ffn_p["w1"], b1, ffn_p["w2"], b2]
    in_specs = [pl.BlockSpec((tm, H), lambda i, f: (i, 0)),
                pl.BlockSpec((1, H), lambda i, f: (0, 0)),
                pl.BlockSpec((1, H), lambda i, f: (0, 0)),
                pl.BlockSpec((H, tf), lambda i, f: (0, f)),
                pl.BlockSpec((1, tf), lambda i, f: (0, f)),
                pl.BlockSpec((tf, H), lambda i, f: (f, 0)),
                pl.BlockSpec((1, H), lambda i, f: (0, 0))]
    if out_ln is not None:
        go, bo = out_ln
        operands += [go.reshape(1, H), bo.reshape(1, H)]
        in_specs += [pl.BlockSpec((1, H), lambda i, f: (0, 0)),
                     pl.BlockSpec((1, H), lambda i, f: (0, 0))]

    return pl.pallas_call(
        partial(_ln_ffn_kernel, apply_out_ln=out_ln is not None),
        grid=(M // tm, F // tf),
        in_specs=in_specs,
        out_specs=pl.BlockSpec((tm, H), lambda i, f: (i, 0)),
        out_shape=jax.ShapeDtypeStruct((M, H), out_dtype),
        scratch_shapes=[pltpu.VMEM((tm, H), jnp.bfloat16),   # cached LN(x)
                        pltpu.VMEM((tm, H), jnp.float32)],   # F-axis accumulator
        compiler_params=_cparams("parallel", "arbitrary"),
    )(*operands)


def fused_attention(q, kv, key_pad, residual, w_o, b_o, n_head, *, causal,
                    return_probs=False, tq_pref=256):
    """Multi-head attention with fused output projection + residual.

    q: (B, Sq, H) bf16; kv: (B, Sk, 2H) bf16; key_pad: (B, 1, Sk) int32;
    residual: (B, Sq, H) f32; returns ((B, Sq, H) f32, probs or None).
    """
    B, Sq, H = q.shape
    Sk = kv.shape[1]
    tq = _pick_tile(Sq, tq_pref, 16)
    grid = (B, Sq // tq)
    b_o2 = b_o.reshape(1, H).astype(jnp.float32)
    in_specs = [pl.BlockSpec((1, tq, H), lambda b, i: (b, i, 0)),
                pl.BlockSpec((1, Sk, 2 * H), lambda b, i: (b, 0, 0)),
                pl.BlockSpec((1, 1, Sk), lambda b, i: (b, 0, 0)),
                pl.BlockSpec((1, tq, H), lambda b, i: (b, i, 0)),
                pl.BlockSpec((H, H), lambda b, i: (0, 0)),
                pl.BlockSpec((1, H), lambda b, i: (0, 0))]
    kernel = partial(_attn_kernel, n_head=n_head, causal=causal,
                     write_probs=return_probs)
    if return_probs:
        out, probs = pl.pallas_call(
            kernel, grid=grid, in_specs=in_specs,
            out_specs=(pl.BlockSpec((1, tq, H), lambda b, i: (b, i, 0)),
                       pl.BlockSpec((1, n_head, tq, Sk),
                                    lambda b, i: (b, 0, i, 0))),
            out_shape=(jax.ShapeDtypeStruct((B, Sq, H), jnp.float32),
                       jax.ShapeDtypeStruct((B, n_head, Sq, Sk), jnp.float32)),
            compiler_params=_cparams("parallel", "parallel"),
        )(q, kv, key_pad, residual, w_o, b_o2)
        return out, probs
    out = pl.pallas_call(
        kernel, grid=grid, in_specs=in_specs,
        out_specs=pl.BlockSpec((1, tq, H), lambda b, i: (b, i, 0)),
        out_shape=jax.ShapeDtypeStruct((B, Sq, H), jnp.float32),
        compiler_params=_cparams("parallel", "parallel"),
    )(q, kv, key_pad, residual, w_o, b_o2)
    return out, None


# ---------------------------------------------------------------------------
# Positional helpers (plain-JAX glue, matches the PyTorch helpers)
# ---------------------------------------------------------------------------

def pad_flags(tokens, pad_idx):
    # (B, 1, S) int32 pad flags over the KEY dimension; replaces the (B,S,S) mask.
    return (tokens == pad_idx).astype(jnp.int32)[:, None, :]


def create_position_vector(tokens, pad_idx):
    B, S = tokens.shape
    pos = jnp.arange(1, S + 1, dtype=jnp.int32)[None, :]
    return jnp.where(tokens == pad_idx, 0, pos)


def create_position_encoding(n_pos, hidden_dim):
    pos = np.arange(n_pos)[:, None].astype(np.float64)
    i = np.arange(hidden_dim)[None, :]
    angle = pos / np.power(10000.0, 2 * (i // 2) / hidden_dim)
    table = np.zeros((n_pos, hidden_dim), dtype=np.float64)
    table[:, 0::2] = np.sin(angle[:, 0::2])
    table[:, 1::2] = np.cos(angle[:, 1::2])
    table[0, :] = 0.0   # pad position row
    return jnp.asarray(table, dtype=jnp.float32)


# ---------------------------------------------------------------------------
# Parameter init (deterministic, synthetic; weights pre-cast bf16)
# ---------------------------------------------------------------------------

def _init_mha(key, H):
    ks = jax.random.split(key, 4)
    w = {n: jax.random.normal(k, (H, H), jnp.float32) * 0.02
         for n, k in zip("qkvo", ks)}
    b = {n: jnp.zeros((H,), jnp.float32) for n in "qkvo"}
    return {
        "w_q": w["q"].astype(jnp.bfloat16), "b_q": b["q"],
        "w_kv": jnp.concatenate([w["k"], w["v"]], axis=1).astype(jnp.bfloat16),
        "b_kv": jnp.concatenate([b["k"], b["v"]]),
        "w_o": w["o"].astype(jnp.bfloat16), "b_o": b["o"],
    }


def _init_ffn(key, H, F):
    k1, k2 = jax.random.split(key)
    return {
        "w1": (jax.random.normal(k1, (H, F), jnp.float32) * 0.02).astype(jnp.bfloat16),
        "b1": jnp.zeros((F,), jnp.float32),
        "w2": (jax.random.normal(k2, (F, H), jnp.float32) * 0.02).astype(jnp.bfloat16),
        "b2": jnp.zeros((H,), jnp.float32),
    }


def init_params(key, args):
    H, F = args["hidden_dim"], args["ffn_dim"]
    keys = jax.random.split(key, 4 + 2 * args["n_layer"])

    enc_tok = jax.random.normal(keys[0], (args["input_dim"], H), jnp.float32) * (H ** -0.5)
    enc_tok = enc_tok.at[args["pad_idx"]].set(0.0)
    dec_tok = jax.random.normal(keys[1], (args["output_dim"], H), jnp.float32) * (H ** -0.5)
    dec_tok = dec_tok.at[args["pad_idx"]].set(0.0)

    enc_layers = []
    for l in range(args["n_layer"]):
        k1, k2 = jax.random.split(keys[2 + l])
        enc_layers.append({
            "ln_g": jnp.ones((H,), jnp.float32),   # shared LN within the layer
            "ln_b": jnp.zeros((H,), jnp.float32),
            "attn": _init_mha(k1, H),
            "ffn": _init_ffn(k2, H, F),
        })

    dec_layers = []
    for l in range(args["n_layer"]):
        k1, k2, k3 = jax.random.split(keys[2 + args["n_layer"] + l], 3)
        dec_layers.append({
            "ln_g": jnp.ones((H,), jnp.float32),   # shared LN within the layer
            "ln_b": jnp.zeros((H,), jnp.float32),
            "self_attn": _init_mha(k1, H),
            "enc_attn": _init_mha(k2, H),
            "ffn": _init_ffn(k3, H, F),
        })

    return {
        "pos_enc": create_position_encoding(args["max_len"] + 1, H),
        "enc": {"tok_emb": enc_tok, "layers": enc_layers,
                "ln_g": jnp.ones((H,), jnp.float32),
                "ln_b": jnp.zeros((H,), jnp.float32)},
        "dec": {"tok_emb": dec_tok,
                # tied-embedding transpose precomputed once (no .T per forward)
                "tok_emb_T": dec_tok.T.astype(jnp.bfloat16),
                "layers": dec_layers,
                "ln_g": jnp.ones((H,), jnp.float32),
                "ln_b": jnp.zeros((H,), jnp.float32)},
    }


# ---------------------------------------------------------------------------
# Model forward (glue around the Pallas kernels)
# ---------------------------------------------------------------------------

def encoder_layer_forward(x, src_pad, p, n_head, out_ln=None,
                          out_dtype=jnp.float32):
    B, S, H = x.shape
    x2d = x.reshape(-1, H)
    # LN + Q / KV projections (LN cached across N tiles inside each call).
    q = ln_linear(x2d, p["ln_g"], p["ln_b"],
                  p["attn"]["w_q"], p["attn"]["b_q"]).reshape(B, S, H)
    kv = ln_linear(x2d, p["ln_g"], p["ln_b"],
                   p["attn"]["w_kv"], p["attn"]["b_kv"]).reshape(B, S, 2 * H)
    # Fused attention + output projection + residual.
    x1, _ = fused_attention(q, kv, src_pad, x, p["attn"]["w_o"],
                            p["attn"]["b_o"], n_head, causal=False)
    # LN + FFN + residual (F-tiled); optionally fuses the encoder's final LN.
    out = ln_ffn(x1.reshape(-1, H), p["ln_g"], p["ln_b"], p["ffn"],
                 out_ln=out_ln, out_dtype=out_dtype)
    return out.reshape(B, S, H)


def decoder_layer_forward(embedding, enc_out, src_pad, tgt_pad, p, n_head,
                          want_probs):
    B, St, H = embedding.shape
    Ss = enc_out.shape[1]
    e2d = embedding.reshape(-1, H)

    # Self-attention block (causal mask built in-kernel).
    q = ln_linear(e2d, p["ln_g"], p["ln_b"],
                  p["self_attn"]["w_q"], p["self_attn"]["b_q"]).reshape(B, St, H)
    kv = ln_linear(e2d, p["ln_g"], p["ln_b"],
                   p["self_attn"]["w_kv"], p["self_attn"]["b_kv"]).reshape(B, St, 2 * H)
    x1, _ = fused_attention(q, kv, tgt_pad, embedding, p["self_attn"]["w_o"],
                            p["self_attn"]["b_o"], n_head, causal=True)

    # Cross-attention: LN only on the query side (matches reference).
    x1_2d = x1.reshape(-1, H)
    q2 = ln_linear(x1_2d, p["ln_g"], p["ln_b"],
                   p["enc_attn"]["w_q"], p["enc_attn"]["b_q"]).reshape(B, St, H)
    kv2 = tiled_linear(enc_out.reshape(-1, H), p["enc_attn"]["w_kv"],
                       p["enc_attn"]["b_kv"],
                       out_dtype=jnp.bfloat16).reshape(B, Ss, 2 * H)
    x2, attn_map = fused_attention(q2, kv2, src_pad, x1, p["enc_attn"]["w_o"],
                                   p["enc_attn"]["b_o"], n_head, causal=False,
                                   return_probs=want_probs)

    out = ln_ffn(x2.reshape(-1, H), p["ln_g"], p["ln_b"], p["ffn"])
    return out.reshape(B, St, H), attn_map


def encoder_forward(params, source, args):
    B, Ss = source.shape
    H = args["hidden_dim"]
    src_pad = pad_flags(source, args["pad_idx"])
    src_pos = create_position_vector(source, args["pad_idx"])
    emb = jnp.take(params["enc"]["tok_emb"], source, axis=0) * (H ** 0.5)
    x = emb + jnp.take(params["pos_enc"], src_pos, axis=0)  # dropout p=0 -> id
    n_layer = len(params["enc"]["layers"])
    for li, lp in enumerate(params["enc"]["layers"]):
        is_last = (li == n_layer - 1)
        x = encoder_layer_forward(
            x, src_pad, lp, args["n_head"],
            out_ln=((params["enc"]["ln_g"], params["enc"]["ln_b"])
                    if is_last else None),
            # final encoder output is consumed only by matmuls -> emit bf16.
            out_dtype=jnp.bfloat16 if is_last else jnp.float32)
    return x   # (B, Ss, H) bf16, already final-LayerNorm'ed


def decoder_forward(params, target, source, encoder_output, args):
    B, St = target.shape
    H = args["hidden_dim"]
    pad = args["pad_idx"]
    src_pad = pad_flags(source, pad)
    tgt_pad = pad_flags(target, pad)
    tgt_pos = create_position_vector(target, pad)
    emb = jnp.take(params["dec"]["tok_emb"], target, axis=0) * (H ** 0.5)
    embedding = emb + jnp.take(params["pos_enc"], tgt_pos, axis=0)  # dropout p=0

    n_layer = len(params["dec"]["layers"])
    tgt = embedding
    attn_map = None
    for li, lp in enumerate(params["dec"]["layers"]):
        # NOTE: reference passes `embedding` into every layer (reproduced);
        # attention probabilities are materialized only for the last layer.
        want_probs = (li == n_layer - 1)
        tgt, am = decoder_layer_forward(embedding, encoder_output, src_pad,
                                        tgt_pad, lp, args["n_head"], want_probs)
        if am is not None:
            attn_map = am

    # Final LN fused into the tied-embedding logits projection.
    vocab = params["dec"]["tok_emb"].shape[0]
    logits = ln_linear(tgt.reshape(-1, H), params["dec"]["ln_g"],
                       params["dec"]["ln_b"], params["dec"]["tok_emb_T"],
                       jnp.zeros((vocab,), jnp.float32), out_dtype=jnp.float32)
    return logits.reshape(B, St, vocab), attn_map


def transformer_forward(params, source, target, args):
    enc_out = encoder_forward(params, source, args)
    return decoder_forward(params, target, source, enc_out, args)


# ---------------------------------------------------------------------------
# Main
# ---------------------------------------------------------------------------

if __name__ == "__main__":
    args = dict(
        hidden_dim=32, n_head=4, ffn_dim=64, n_layer=2,
        input_dim=50, output_dim=60, pad_idx=0, max_len=16, dropout=0.0,
    )

    key = jax.random.PRNGKey(0)
    k_src, k_tgt, k_par = jax.random.split(key, 3)

    B, Ss, St = 2, 8, 8
    source = jax.random.randint(k_src, (B, Ss), 1, args["input_dim"], dtype=jnp.int32)
    target = jax.random.randint(k_tgt, (B, St), 1, args["output_dim"], dtype=jnp.int32)
    # put some pad tokens at the tail of the second example
    source = source.at[1, 6:].set(args["pad_idx"])
    target = target.at[1, 7:].set(args["pad_idx"])

    params = init_params(k_par, args)

    fwd = jax.jit(partial(transformer_forward, args=args))
    output, attn_map = fwd(params, source, target)
    jax.block_until_ready((output, attn_map))

    assert output.shape == (B, St, args["output_dim"])
    assert attn_map.shape == (B, args["n_head"], St, Ss)
    assert bool(jnp.all(jnp.isfinite(output)))
    assert bool(jnp.all(jnp.isfinite(attn_map)))
    print("KERNEL_OK")
</pallas_src>

<mosaic_0001>
module attributes {stable_mosaic.version = 11 : i64} {
  func.func @_ln_mm_bias_kernel(%arg0: i32, %arg1: i32, %arg2: memref<16x32xf32, #tpu.memory_space<vmem>>, %arg3: memref<1x32xf32, #tpu.memory_space<vmem>>, %arg4: memref<1x32xf32, #tpu.memory_space<vmem>>, %arg5: memref<32x64xbf16, #tpu.memory_space<vmem>>, %arg6: memref<1x64xf32, #tpu.memory_space<vmem>>, %arg7: memref<16x64xbf16, #tpu.memory_space<vmem>>, %arg8: memref<16x32xbf16, #tpu.memory_space<vmem>>) attributes {dimension_semantics = [#tpu.dimension_semantics<parallel>, #tpu.dimension_semantics<arbitrary>], iteration_bounds = array<i64: 1, 1>, scalar_prefetch = 0 : i64, scratch_operands = 1 : i64, tpu.core_type = #tpu.core_type<tc>, window_params = [{transform_indices = @transform_0, window_bounds = array<i64: 16, 32>}, {pipeline_mode = #tpu.pipeline_mode<synchronous>, transform_indices = @transform_1, window_bounds = array<i64: 1, 32>}, {pipeline_mode = #tpu.pipeline_mode<synchronous>, transform_indices = @transform_2, window_bounds = array<i64: 1, 32>}, {transform_indices = @transform_3, window_bounds = array<i64: 32, 64>}, {transform_indices = @transform_4, window_bounds = array<i64: 1, 64>}, {transform_indices = @transform_5, window_bounds = array<i64: 16, 64>}]} {
    %c0_i32 = arith.constant 0 : i32
    %0 = arith.cmpi eq, %arg1, %c0_i32 : i32
    %1 = arith.extui %0 : i1 to i32
    %c0_i32_0 = arith.constant 0 : i32
    %2 = arith.cmpi ne, %1, %c0_i32_0 : i32
    scf.if %2 {
      %c0_8 = arith.constant 0 : index
      %c0_9 = arith.constant 0 : index
      %11 = vector.load %arg2[%c0_8, %c0_9] : memref<16x32xf32, #tpu.memory_space<vmem>>, vector<16x32xf32>
      %c0_10 = arith.constant 0 : index
      %c0_11 = arith.constant 0 : index
      %12 = vector.load %arg3[%c0_10, %c0_11] : memref<1x32xf32, #tpu.memory_space<vmem>>, vector<1x32xf32>
      %c0_12 = arith.constant 0 : index
      %c0_13 = arith.constant 0 : index
      %13 = vector.load %arg4[%c0_12, %c0_13] : memref<1x32xf32, #tpu.memory_space<vmem>>, vector<1x32xf32>
      %cst_14 = arith.constant dense<0.000000e+00> : vector<16xf32>
      %14 = vector.multi_reduction <add>, %11, %cst_14 [1] : vector<16x32xf32> to vector<16xf32>
      %15 = vector.shape_cast %14 : vector<16xf32> to vector<16x1xf32>
      %cst_15 = arith.constant 3.200000e+01 : f32
      %16 = vector.broadcast %cst_15 : f32 to vector<16x1xf32>
      %17 = arith.divf %15, %16 : vector<16x1xf32>
      %18 = vector.broadcast %17 : vector<16x1xf32> to vector<16x32xf32>
      %19 = arith.subf %11, %18 : vector<16x32xf32>
      %20 = arith.mulf %19, %19 : vector<16x32xf32>
      %cst_16 = arith.constant dense<0.000000e+00> : vector<16xf32>
      %21 = vector.multi_reduction <add>, %20, %cst_16 [1] : vector<16x32xf32> to vector<16xf32>
      %22 = vector.shape_cast %21 : vector<16xf32> to vector<16x1xf32>
      %cst_17 = arith.constant 3.200000e+01 : f32
      %23 = vector.broadcast %cst_17 : f32 to vector<16x1xf32>
      %24 = arith.divf %22, %23 : vector<16x1xf32>
      %cst_18 = arith.constant 9.99999997E-7 : f32
      %25 = vector.broadcast %cst_18 : f32 to vector<16x1xf32>
      %26 = arith.addf %24, %25 : vector<16x1xf32>
      %27 = math.rsqrt %26 : vector<16x1xf32>
      %28 = vector.broadcast %27 : vector<16x1xf32> to vector<16x32xf32>
      %29 = arith.mulf %19, %28 : vector<16x32xf32>
      %30 = vector.broadcast %12 : vector<1x32xf32> to vector<16x32xf32>
      %31 = arith.mulf %29, %30 : vector<16x32xf32>
      %32 = vector.broadcast %13 : vector<1x32xf32> to vector<16x32xf32>
      %33 = arith.addf %31, %32 : vector<16x32xf32>
      %34 = arith.truncf %33 : vector<16x32xf32> to vector<16x32xbf16>
      %c0_19 = arith.constant 0 : index
      %c0_20 = arith.constant 0 : index
      %35 = vector.load %arg8[%c0_19, %c0_20] : memref<16x32xbf16, #tpu.memory_space<vmem>>, vector<16x32xbf16>
      tpu.vector_store %arg8[%c0_19, %c0_20], %34 {strides = array<i32>} : memref<16x32xbf16, #tpu.memory_space<vmem>>, vector<16x32xbf16>,
    } else {
    }
    %c0 = arith.constant 0 : index
    %c0_1 = arith.constant 0 : index
    %3 = vector.load %arg8[%c0, %c0_1] : memref<16x32xbf16, #tpu.memory_space<vmem>>, vector<16x32xbf16>
    %c0_2 = arith.constant 0 : index
    %c0_3 = arith.constant 0 : index
    %4 = vector.load %arg5[%c0_2, %c0_3] : memref<32x64xbf16, #tpu.memory_space<vmem>>, vector<32x64xbf16>
    %cst = arith.constant dense<0.000000e+00> : vector<16x64xf32>
    %5 = tpu.matmul %3, %4, %cst {dimension_numbers = #tpu.dot_dimension_numbers<[1], [0], [0], [1], [0, 0, 1, 1], [], []>} : vector<16x32xbf16>, vector<32x64xbf16>, vector<16x64xf32> -> vector<16x64xf32>
    %c0_4 = arith.constant 0 : index
    %c0_5 = arith.constant 0 : index
    %6 = vector.load %arg6[%c0_4, %c0_5] : memref<1x64xf32, #tpu.memory_space<vmem>>, vector<1x64xf32>
    %7 = vector.broadcast %6 : vector<1x64xf32> to vector<16x64xf32>
    %8 = arith.addf %5, %7 : vector<16x64xf32>
    %9 = arith.truncf %8 : vector<16x64xf32> to vector<16x64xbf16>
    %c0_6 = arith.constant 0 : index
    %c0_7 = arith.constant 0 : index
    %10 = vector.load %arg7[%c0_6, %c0_7] : memref<16x64xbf16, #tpu.memory_space<vmem>>, vector<16x64xbf16>
    tpu.vector_store %arg7[%c0_6, %c0_7], %9 {strides = array<i32>} : memref<16x64xbf16, #tpu.memory_space<vmem>>, vector<16x64xbf16>,
    return
  }
  func.func @transform_0(%arg0: i32, %arg1: i32) -> (i32, i32) {
    %c0_i32 = arith.constant 0 : i32
    %c0_i32_0 = arith.constant 0 : i32
    return %arg0, %c0_i32 : i32, i32
  }
  func.func @transform_1(%arg0: i32, %arg1: i32) -> (i32, i32) {
    %c0_i32 = arith.constant 0 : i32
    %c0_i32_0 = arith.constant 0 : i32
    %c0_i32_1 = arith.constant 0 : i32
    return %c0_i32, %c0_i32_0 : i32, i32
  }
  func.func @transform_2(%arg0: i32, %arg1: i32) -> (i32, i32) {
    %c0_i32 = arith.constant 0 : i32
    %c0_i32_0 = arith.constant 0 : i32
    %c0_i32_1 = arith.constant 0 : i32
    return %c0_i32, %c0_i32_0 : i32, i32
  }
  func.func @transform_3(%arg0: i32, %arg1: i32) -> (i32, i32) {
    %c0_i32 = arith.constant 0 : i32
    %c0_i32_0 = arith.constant 0 : i32
    return %c0_i32, %arg1 : i32, i32
  }
  func.func @transform_4(%arg0: i32, %arg1: i32) -> (i32, i32) {
    %c0_i32 = arith.constant 0 : i32
    %c0_i32_0 = arith.constant 0 : i32
    return %c0_i32, %arg1 : i32, i32
  }
  func.func @transform_5(%arg0: i32, %arg1: i32) -> (i32, i32) {
    %c0_i32 = arith.constant 0 : i32
    return %arg0, %arg1 : i32, i32
  }
}

module attributes {stable_mosaic.version = 11 : i64} {
  func.func @_ln_mm_bias_kernel(%arg0: i32, %arg1: i32, %arg2: memref<16x32xf32, #tpu.memory_space<vmem>>, %arg3: memref<1x32xf32, #tpu.memory_space<vmem>>, %arg4: memref<1x32xf32, #tpu.memory_space<vmem>>, %arg5: memref<32x32xbf16, #tpu.memory_space<vmem>>, %arg6: memref<1x32xf32, #tpu.memory_space<vmem>>, %arg7: memref<16x32xbf16, #tpu.memory_space<vmem>>, %arg8: memref<16x32xbf16, #tpu.memory_space<vmem>>) attributes {dimension_semantics = [#tpu.dimension_semantics<parallel>, #tpu.dimension_semantics<arbitrary>], iteration_bounds = array<i64: 1, 1>, scalar_prefetch = 0 : i64, scratch_operands = 1 : i64, tpu.core_type = #tpu.core_type<tc>, window_params = [{transform_indices = @transform_0, window_bounds = array<i64: 16, 32>}, {pipeline_mode = #tpu.pipeline_mode<synchronous>, transform_indices = @transform_1, window_bounds = array<i64: 1, 32>}, {pipeline_mode = #tpu.pipeline_mode<synchronous>, transform_indices = @transform_2, window_bounds = array<i64: 1, 32>}, {transform_indices = @transform_3, window_bounds = array<i64: 32, 32>}, {transform_indices = @transform_4, window_bounds = array<i64: 1, 32>}, {transform_indices = @transform_5, window_bounds = array<i64: 16, 32>}]} {
    %c0_i32 = arith.constant 0 : i32
    %0 = arith.cmpi eq, %arg1, %c0_i32 : i32
    %1 = arith.extui %0 : i1 to i32
    %c0_i32_0 = arith.constant 0 : i32
    %2 = arith.cmpi ne, %1, %c0_i32_0 : i32
    scf.if %2 {
      %c0_8 = arith.constant 0 : index
      %c0_9 = arith.constant 0 : index
      %11 = vector.load %arg2[%c0_8, %c0_9] : memref<16x32xf32, #tpu.memory_space<vmem>>, vector<16x32xf32>
      %c0_10 = arith.constant 0 : index
      %c0_11 = arith.constant 0 : index
      %12 = vector.load %arg3[%c0_10, %c0_11] : memref<1x32xf32, #tpu.memory_space<vmem>>, vector<1x32xf32>
      %c0_12 = arith.constant 0 : index
      %c0_13 = arith.constant 0 : index
      %13 = vector.load %arg4[%c0_12, %c0_13] : memref<1x32xf32, #tpu.memory_space<vmem>>, vector<1x32xf32>
      %cst_14 = arith.constant dense<0.000000e+00> : vector<16xf32>
      %14 = vector.multi_reduction <add>, %11, %cst_14 [1] : vector<16x32xf32> to vector<16xf32>
      %15 = vector.shape_cast %14 : vector<16xf32> to vector<16x1xf32>
      %cst_15 = arith.constant 3.200000e+01 : f32
      %16 = vector.broadcast %cst_15 : f32 to vector<16x1xf32>
      %17 = arith.divf %15, %16 : vector<16x1xf32>
      %18 = vector.broadcast %17 : vector<16x1xf32> to vector<16x32xf32>
      %19 = arith.subf %11, %18 : vector<16x32xf32>
      %20 = arith.mulf %19, %19 : vector<16x32xf32>
      %cst_16 = arith.constant dense<0.000000e+00> : vector<16xf32>
      %21 = vector.multi_reduction <add>, %20, %cst_16 [1] : vector<16x32xf32> to vector<16xf32>
      %22 = vector.shape_cast %21 : vector<16xf32> to vector<16x1xf32>
      %cst_17 = arith.constant 3.200000e+01 : f32
      %23 = vector.broadcast %cst_17 : f32 to vector<16x1xf32>
      %24 = arith.divf %22, %23 : vector<16x1xf32>
      %cst_18 = arith.constant 9.99999997E-7 : f32
      %25 = vector.broadcast %cst_18 : f32 to vector<16x1xf32>
      %26 = arith.addf %24, %25 : vector<16x1xf32>
      %27 = math.rsqrt %26 : vector<16x1xf32>
      %28 = vector.broadcast %27 : vector<16x1xf32> to vector<16x32xf32>
      %29 = arith.mulf %19, %28 : vector<16x32xf32>
      %30 = vector.broadcast %12 : vector<1x32xf32> to vector<16x32xf32>
      %31 = arith.mulf %29, %30 : vector<16x32xf32>
      %32 = vector.broadcast %13 : vector<1x32xf32> to vector<16x32xf32>
      %33 = arith.addf %31, %32 : vector<16x32xf32>
      %34 = arith.truncf %33 : vector<16x32xf32> to vector<16x32xbf16>
      %c0_19 = arith.constant 0 : index
      %c0_20 = arith.constant 0 : index
      %35 = vector.load %arg8[%c0_19, %c0_20] : memref<16x32xbf16, #tpu.memory_space<vmem>>, vector<16x32xbf16>
      tpu.vector_store %arg8[%c0_19, %c0_20], %34 {strides = array<i32>} : memref<16x32xbf16, #tpu.memory_space<vmem>>, vector<16x32xbf16>,
    } else {
    }
    %c0 = arith.constant 0 : index
    %c0_1 = arith.constant 0 : index
    %3 = vector.load %arg8[%c0, %c0_1] : memref<16x32xbf16, #tpu.memory_space<vmem>>, vector<16x32xbf16>
    %c0_2 = arith.constant 0 : index
    %c0_3 = arith.constant 0 : index
    %4 = vector.load %arg5[%c0_2, %c0_3] : memref<32x32xbf16, #tpu.memory_space<vmem>>, vector<32x32xbf16>
    %cst = arith.constant dense<0.000000e+00> : vector<16x32xf32>
    %5 = tpu.matmul %3, %4, %cst {dimension_numbers = #tpu.dot_dimension_numbers<[1], [0], [0], [1], [0, 0, 1, 1], [], []>} : vector<16x32xbf16>, vector<32x32xbf16>, vector<16x32xf32> -> vector<16x32xf32>
    %c0_4 = arith.constant 0 : index
    %c0_5 = arith.constant 0 : index
    %6 = vector.load %arg6[%c0_4, %c0_5] : memref<1x32xf32, #tpu.memory_space<vmem>>, vector<1x32xf32>
    %7 = vector.broadcast %6 : vector<1x32xf32> to vector<16x32xf32>
    %8 = arith.addf %5, %7 : vector<16x32xf32>
    %9 = arith.truncf %8 : vector<16x32xf32> to vector<16x32xbf16>
    %c0_6 = arith.constant 0 : index
    %c0_7 = arith.constant 0 : index
    %10 = vector.load %arg7[%c0_6, %c0_7] : memref<16x32xbf16, #tpu.memory_space<vmem>>, vector<16x32xbf16>
    tpu.vector_store %arg7[%c0_6, %c0_7], %9 {strides = array<i32>} : memref<16x32xbf16, #tpu.memory_space<vmem>>, vector<16x32xbf16>,
    return
  }
  func.func @transform_0(%arg0: i32, %arg1: i32) -> (i32, i32) {
    %c0_i32 = arith.constant 0 : i32
    %c0_i32_0 = arith.constant 0 : i32
    return %arg0, %c0_i32 : i32, i32
  }
  func.func @transform_1(%arg0: i32, %arg1: i32) -> (i32, i32) {
    %c0_i32 = arith.constant 0 : i32
    %c0_i32_0 = arith.constant 0 : i32
    %c0_i32_1 = arith.constant 0 : i32
    return %c0_i32, %c0_i32_0 : i32, i32
  }
  func.func @transform_2(%arg0: i32, %arg1: i32) -> (i32, i32) {
    %c0_i32 = arith.constant 0 : i32
    %c0_i32_0 = arith.constant 0 : i32
    %c0_i32_1 = arith.constant 0 : i32
    return %c0_i32, %c0_i32_0 : i32, i32
  }
  func.func @transform_3(%arg0: i32, %arg1: i32) -> (i32, i32) {
    %c0_i32 = arith.constant 0 : i32
    %c0_i32_0 = arith.constant 0 : i32
    return %c0_i32, %arg1 : i32, i32
  }
  func.func @transform_4(%arg0: i32, %arg1: i32) -> (i32, i32) {
    %c0_i32 = arith.constant 0 : i32
    %c0_i32_0 = arith.constant 0 : i32
    return %c0_i32, %arg1 : i32, i32
  }
  func.func @transform_5(%arg0: i32, %arg1: i32) -> (i32, i32) {
    %c0_i32 = arith.constant 0 : i32
    return %arg0, %arg1 : i32, i32
  }
}

module attributes {stable_mosaic.version = 11 : i64} {
  func.func @_attn_kernel(%arg0: i32, %arg1: i32, %arg2: memref<1x8x32xbf16, #tpu.memory_space<vmem>>, %arg3: memref<1x8x64xbf16, #tpu.memory_space<vmem>>, %arg4: memref<1x1x8xi32, #tpu.memory_space<vmem>>, %arg5: memref<1x8x32xf32, #tpu.memory_space<vmem>>, %arg6: memref<32x32xbf16, #tpu.memory_space<vmem>>, %arg7: memref<1x32xf32, #tpu.memory_space<vmem>>, %arg8: memref<1x8x32xf32, #tpu.memory_space<vmem>>) attributes {dimension_semantics = [#tpu.dimension_semantics<parallel>, #tpu.dimension_semantics<parallel>], iteration_bounds = array<i64: 2, 1>, scalar_prefetch = 0 : i64, scratch_operands = 0 : i64, tpu.core_type = #tpu.core_type<tc>, window_params = [{transform_indices = @transform_0, window_bounds = array<i64: 1, 8, 32>}, {transform_indices = @transform_1, window_bounds = array<i64: 1, 8, 64>}, {transform_indices = @transform_2, window_bounds = array<i64: 1, 1, 8>}, {transform_indices = @transform_3, window_bounds = array<i64: 1, 8, 32>}, {pipeline_mode = #tpu.pipeline_mode<synchronous>, transform_indices = @transform_4, window_bounds = array<i64: 32, 32>}, {pipeline_mode = #tpu.pipeline_mode<synchronous>, transform_indices = @transform_5, window_bounds = array<i64: 1, 32>}, {transform_indices = @transform_6, window_bounds = array<i64: 1, 8, 32>}]} {
    %c0 = arith.constant 0 : index
    %c0_0 = arith.constant 0 : index
    %c0_1 = arith.constant 0 : index
    %0 = vector.load %arg2[%c0, %c0_0, %c0_1] : memref<1x8x32xbf16, #tpu.memory_space<vmem>>, vector<1x8x32xbf16>
    %1 = vector.shape_cast %0 : vector<1x8x32xbf16> to vector<8x32xbf16>
    %c0_2 = arith.constant 0 : index
    %c0_3 = arith.constant 0 : index
    %c0_4 = arith.constant 0 : index
    %2 = vector.load %arg3[%c0_2, %c0_3, %c0_4] : memref<1x8x64xbf16, #tpu.memory_space<vmem>>, vector<1x8x64xbf16>
    %3 = vector.shape_cast %2 : vector<1x8x64xbf16> to vector<8x64xbf16>
    %c0_5 = arith.constant 0 : index
    %c0_6 = arith.constant 0 : index
    %c0_7 = arith.constant 0 : index
    %4 = vector.load %arg5[%c0_5, %c0_6, %c0_7] : memref<1x8x32xf32, #tpu.memory_space<vmem>>, vector<1x8x32xf32>
    %5 = vector.shape_cast %4 : vector<1x8x32xf32> to vector<8x32xf32>
    %c0_8 = arith.constant 0 : index
    %c0_9 = arith.constant 0 : index
    %c0_10 = arith.constant 0 : index
    %6 = vector.load %arg4[%c0_8, %c0_9, %c0_10] : memref<1x1x8xi32, #tpu.memory_space<vmem>>, vector<1x1x8xi32>
    %7 = vector.shape_cast %6 : vector<1x1x8xi32> to vector<1x8xi32>
    %c0_i32 = arith.constant 0 : i32
    %8 = vector.broadcast %c0_i32 : i32 to vector<1x8xi32>
    %9 = arith.cmpi sgt, %7, %8 : vector<1x8xi32>
    %10 = vector.shape_cast %9 : vector<1x8xi1> to vector<1x8xi1>
    %11 = vector.broadcast %10 : vector<1x8xi1> to vector<8x8xi1>
    %cst = arith.constant 0.000000e+00 : f32
    %12 = vector.broadcast %cst : f32 to vector<8x32xf32>
    %13 = vector.extract_strided_slice %1 {offsets = [0, 0], sizes = [8, 8], strides = [1, 1]} : vector<8x32xbf16> to vector<8x8xbf16>
    %14 = vector.extract_strided_slice %3 {offsets = [0, 0], sizes = [8, 8], strides = [1, 1]} : vector<8x64xbf16> to vector<8x8xbf16>
    %cst_11 = arith.constant dense<0.000000e+00> : vector<8x8xf32>
    %15 = tpu.matmul %13, %14, %cst_11 {dimension_numbers = #tpu.dot_dimension_numbers<[1], [1], [0], [0], [0, 0, 1, 0], [], []>} : vector<8x8xbf16>, vector<8x8xbf16>, vector<8x8xf32> -> vector<8x8xf32>
    %cst_12 = arith.constant 0.353553385 : f32
    %16 = vector.broadcast %cst_12 : f32 to vector<8x8xf32>
    %17 = arith.mulf %15, %16 : vector<8x8xf32>
    %cst_13 = arith.constant -1.000000e+09 : f32
    %18 = vector.broadcast %cst_13 : f32 to vector<8x8xf32>
    %19 = arith.select %11, %18, %17 : vector<8x8xi1>, vector<8x8xf32>
    %cst_14 = arith.constant dense<0xFF800000> : vector<8xf32>
    %20 = vector.multi_reduction <maximumf>, %19, %cst_14 [1] : vector<8x8xf32> to vector<8xf32>
    %21 = vector.shape_cast %20 : vector<8xf32> to vector<8x1xf32>
    %22 = vector.broadcast %21 : vector<8x1xf32> to vector<8x8xf32>
    %23 = arith.subf %19, %22 : vector<8x8xf32>
    %24 = math.exp %23 : vector<8x8xf32>
    %cst_15 = arith.constant dense<0.000000e+00> : vector<8xf32>
    %25 = vector.multi_reduction <add>, %24, %cst_15 [1] : vector<8x8xf32> to vector<8xf32>
    %26 = vector.shape_cast %25 : vector<8xf32> to vector<8x1xf32>
    %27 = tpu.reciprocal %26 {approx = true} : vector<8x1xf32> -> vector<8x1xf32>
    %28 = vector.broadcast %27 : vector<8x1xf32> to vector<8x8xf32>
    %29 = arith.mulf %24, %28 : vector<8x8xf32>
    %30 = arith.truncf %29 : vector<8x8xf32> to vector<8x8xbf16>
    %31 = vector.extract_strided_slice %3 {offsets = [0, 32], sizes = [8, 8], strides = [1, 1]} : vector<8x64xbf16> to vector<8x8xbf16>
    %cst_16 = arith.constant dense<0.000000e+00> : vector<8x8xf32>
    %32 = tpu.matmul %30, %31, %cst_16 {dimension_numbers = #tpu.dot_dimension_numbers<[1], [0], [0], [1], [0, 0, 1, 1], [], []>} : vector<8x8xbf16>, vector<8x8xbf16>, vector<8x8xf32> -> vector<8x8xf32>
    %33 = arith.truncf %32 : vector<8x8xf32> to vector<8x8xbf16>
    %c0_17 = arith.constant 0 : index
    %c0_18 = arith.constant 0 : index
    %34 = vector.load %arg6[%c0_17, %c0_18] : memref<32x32xbf16, #tpu.memory_space<vmem>>, vector<8x32xbf16>
    %cst_19 = arith.constant dense<0.000000e+00> : vector<8x32xf32>
    %35 = tpu.matmul %33, %34, %cst_19 {dimension_numbers = #tpu.dot_dimension_numbers<[1], [0], [0], [1], [0, 0, 1, 1], [], []>} : vector<8x8xbf16>, vector<8x32xbf16>, vector<8x32xf32> -> vector<8x32xf32>
    %36 = arith.addf %12, %35 : vector<8x32xf32>
    %37 = vector.extract_strided_slice %1 {offsets = [0, 8], sizes = [8, 8], strides = [1, 1]} : vector<8x32xbf16> to vector<8x8xbf16>
    %38 = vector.extract_strided_slice %3 {offsets = [0, 8], sizes = [8, 8], strides = [1, 1]} : vector<8x64xbf16> to vector<8x8xbf16>
    %cst_20 = arith.constant dense<0.000000e+00> : vector<8x8xf32>
    %39 = tpu.matmul %37, %38, %cst_20 {dimension_numbers = #tpu.dot_dimension_numbers<[1], [1], [0], [0], [0, 0, 1, 0], [], []>} : vector<8x8xbf16>, vector<8x8xbf16>, vector<8x8xf32> -> vector<8x8xf32>
    %cst_21 = arith.constant 0.353553385 : f32
    %40 = vector.broadcast %cst_21 : f32 to vector<8x8xf32>
    %41 = arith.mulf %39, %40 : vector<8x8xf32>
    %cst_22 = arith.constant -1.000000e+09 : f32
    %42 = vector.broadcast %cst_22 : f32 to vector<8x8xf32>
    %43 = arith.select %11, %42, %41 : vector<8x8xi1>, vector<8x8xf32>
    %cst_23 = arith.constant dense<0xFF800000> : vector<8xf32>
    %44 = vector.multi_reduction <maximumf>, %43, %cst_23 [1] : vector<8x8xf32> to vector<8xf32>
    %45 = vector.shape_cast %44 : vector<8xf32> to vector<8x1xf32>
    %46 = vector.broadcast %45 : vector<8x1xf32> to vector<8x8xf32>
    %47 = arith.subf %43, %46 : vector<8x8xf32>
    %48 = math.exp %47 : vector<8x8xf32>
    %cst_24 = arith.constant dense<0.000000e+00> : vector<8xf32>
    %49 = vector.multi_reduction <add>, %48, %cst_24 [1] : vector<8x8xf32> to vector<8xf32>
    %50 = vector.shape_cast %49 : vector<8xf32> to vector<8x1xf32>
    %51 = tpu.reciprocal %50 {approx = true} : vector<8x1xf32> -> vector<8x1xf32>
    %52 = vector.broadcast %51 : vector<8x1xf32> to vector<8x8xf32>
    %53 = arith.mulf %48, %52 : vector<8x8xf32>
    %54 = arith.truncf %53 : vector<8x8xf32> to vector<8x8xbf16>
    %55 = vector.extract_strided_slice %3 {offsets = [0, 40], sizes = [8, 8], strides = [1, 1]} : vector<8x64xbf16> to vector<8x8xbf16>
    %cst_25 = arith.constant dense<0.000000e+00> : vector<8x8xf32>
    %56 = tpu.matmul %54, %55, %cst_25 {dimension_numbers = #tpu.dot_dimension_numbers<[1], [0], [0], [1], [0, 0, 1, 1], [], []>} : vector<8x8xbf16>, vector<8x8xbf16>, vector<8x8xf32> -> vector<8x8xf32>
    %57 = arith.truncf %56 : vector<8x8xf32> to vector<8x8xbf16>
    %c8 = arith.constant 8 : index
    %c0_26 = arith.constant 0 : index
    %58 = vector.load %arg6[%c8, %c0_26] : memref<32x32xbf16, #tpu.memory_space<vmem>>, vector<8x32xbf16>
    %cst_27 = arith.constant dense<0.000000e+00> : vector<8x32xf32>
    %59 = tpu.matmul %57, %58, %cst_27 {dimension_numbers = #tpu.dot_dimension_numbers<[1], [0], [0], [1], [0, 0, 1, 1], [], []>} : vector<8x8xbf16>, vector<8x32xbf16>, vector<8x32xf32> -> vector<8x32xf32>
    %60 = arith.addf %36, %59 : vector<8x32xf32>
    %61 = vector.extract_strided_slice %1 {offsets = [0, 16], sizes = [8, 8], strides = [1, 1]} : vector<8x32xbf16> to vector<8x8xbf16>
    %62 = vector.extract_strided_slice %3 {offsets = [0, 16], sizes = [8, 8], strides = [1, 1]} : vector<8x64xbf16> to vector<8x8xbf16>
    %cst_28 = arith.constant dense<0.000000e+00> : vector<8x8xf32>
    %63 = tpu.matmul %61, %62, %cst_28 {dimension_numbers = #tpu.dot_dimension_numbers<[1], [1], [0], [0], [0, 0, 1, 0], [], []>} : vector<8x8xbf16>, vector<8x8xbf16>, vector<8x8xf32> -> vector<8x8xf32>
    %cst_29 = arith.constant 0.353553385 : f32
    %64 = vector.broadcast %cst_29 : f32 to vector<8x8xf32>
    %65 = arith.mulf %63, %64 : vector<8x8xf32>
    %cst_30 = arith.constant -1.000000e+09 : f32
    %66 = vector.broadcast %cst_30 : f32 to vector<8x8xf32>
    %67 = arith.select %11, %66, %65 : vector<8x8xi1>, vector<8x8xf32>
    %cst_31 = arith.constant dense<0xFF800000> : vector<8xf32>
    %68 = vector.multi_reduction <maximumf>, %67, %cst_31 [1] : vector<8x8xf32> to vector<8xf32>
    %69 = vector.shape_cast %68 : vector<8xf32> to vector<8x1xf32>
    %70 = vector.broadcast %69 : vector<8x1xf32> to vector<8x8xf32>
    %71 = arith.subf %67, %70 : vector<8x8xf32>
    %72 = math.exp %71 : vector<8x8xf32>
    %cst_32 = arith.constant dense<0.000000e+00> : vector<8xf32>
    %73 = vector.multi_reduction <add>, %72, %cst_32 [1] : vector<8x8xf32> to vector<8xf32>
    %74 = vector.shape_cast %73 : vector<8xf32> to vector<8x1xf32>
    %75 = tpu.reciprocal %74 {approx = true} : vector<8x1xf32> -> vector<8x1xf32>
    %76 = vector.broadcast %75 : vector<8x1xf32> to vector<8x8xf32>
    %77 = arith.mulf %72, %76 : vector<8x8xf32>
    %78 = arith.truncf %77 : vector<8x8xf32> to vector<8x8xbf16>
    %79 = vector.extract_strided_slice %3 {offsets = [0, 48], sizes = [8, 8], strides = [1, 1]} : vector<8x64xbf16> to vector<8x8xbf16>
    %cst_33 = arith.constant dense<0.000000e+00> : vector<8x8xf32>
    %80 = tpu.matmul %78, %79, %cst_33 {dimension_numbers = #tpu.dot_dimension_numbers<[1], [0], [0], [1], [0, 0, 1, 1], [], []>} : vector<8x8xbf16>, vector<8x8xbf16>, vector<8x8xf32> -> vector<8x8xf32>
    %81 = arith.truncf %80 : vector<8x8xf32> to vector<8x8xbf16>
    %c16 = arith.constant 16 : index
    %c0_34 = arith.constant 0 : index
    %82 = vector.load %arg6[%c16, %c0_34] : memref<32x32xbf16, #tpu.memory_space<vmem>>, vector<8x32xbf16>
    %cst_35 = arith.constant dense<0.000000e+00> : vector<8x32xf32>
    %83 = tpu.matmul %81, %82, %cst_35 {dimension_numbers = #tpu.dot_dimension_numbers<[1], [0], [0], [1], [0, 0, 1, 1], [], []>} : vector<8x8xbf16>, vector<8x32xbf16>, vector<8x32xf32> -> vector<8x32xf32>
    %84 = arith.addf %60, %83 : vector<8x32xf32>
    %85 = vector.extract_strided_slice %1 {offsets = [0, 24], sizes = [8, 8], strides = [1, 1]} : vector<8x32xbf16> to vector<8x8xbf16>
    %86 = vector.extract_strided_slice %3 {offsets = [0, 24], sizes = [8, 8], strides = [1, 1]} : vector<8x64xbf16> to vector<8x8xbf16>
    %cst_36 = arith.constant dense<0.000000e+00> : vector<8x8xf32>
    %87 = tpu.matmul %85, %86, %cst_36 {dimension_numbers = #tpu.dot_dimension_numbers<[1], [1], [0], [0], [0, 0, 1, 0], [], []>} : vector<8x8xbf16>, vector<8x8xbf16>, vector<8x8xf32> -> vector<8x8xf32>
    %cst_37 = arith.constant 0.353553385 : f32
    %88 = vector.broadcast %cst_37 : f32 to vector<8x8xf32>
    %89 = arith.mulf %87, %88 : vector<8x8xf32>
    %cst_38 = arith.constant -1.000000e+09 : f32
    %90 = vector.broadcast %cst_38 : f32 to vector<8x8xf32>
    %91 = arith.select %11, %90, %89 : vector<8x8xi1>, vector<8x8xf32>
    %cst_39 = arith.constant dense<0xFF800000> : vector<8xf32>
    %92 = vector.multi_reduction <maximumf>, %91, %cst_39 [1] : vector<8x8xf32> to vector<8xf32>
    %93 = vector.shape_cast %92 : vector<8xf32> to vector<8x1xf32>
    %94 = vector.broadcast %93 : vector<8x1xf32> to vector<8x8xf32>
    %95 = arith.subf %91, %94 : vector<8x8xf32>
    %96 = math.exp %95 : vector<8x8xf32>
    %cst_40 = arith.constant dense<0.000000e+00> : vector<8xf32>
    %97 = vector.multi_reduction <add>, %96, %cst_40 [1] : vector<8x8xf32> to vector<8xf32>
    %98 = vector.shape_cast %97 : vector<8xf32> to vector<8x1xf32>
    %99 = tpu.reciprocal %98 {approx = true} : vector<8x1xf32> -> vector<8x1xf32>
    %100 = vector.broadcast %99 : vector<8x1xf32> to vector<8x8xf32>
    %101 = arith.mulf %96, %100 : vector<8x8xf32>
    %102 = arith.truncf %101 : vector<8x8xf32> to vector<8x8xbf16>
    %103 = vector.extract_strided_slice %3 {offsets = [0, 56], sizes = [8, 8], strides = [1, 1]} : vector<8x64xbf16> to vector<8x8xbf16>
    %cst_41 = arith.constant dense<0.000000e+00> : vector<8x8xf32>
    %104 = tpu.matmul %102, %103, %cst_41 {dimension_numbers = #tpu.dot_dimension_numbers<[1], [0], [0], [1], [0, 0, 1, 1], [], []>} : vector<8x8xbf16>, vector<8x8xbf16>, vector<8x8xf32> -> vector<8x8xf32>
    %105 = arith.truncf %104 : vector<8x8xf32> to vector<8x8xbf16>
    %c24 = arith.constant 24 : index
    %c0_42 = arith.constant 0 : index
    %106 = vector.load %arg6[%c24, %c0_42] : memref<32x32xbf16, #tpu.memory_space<vmem>>, vector<8x32xbf16>
    %cst_43 = arith.constant dense<0.000000e+00> : vector<8x32xf32>
    %107 = tpu.matmul %105, %106, %cst_43 {dimension_numbers = #tpu.dot_dimension_numbers<[1], [0], [0], [1], [0, 0, 1, 1], [], []>} : vector<8x8xbf16>, vector<8x32xbf16>, vector<8x32xf32> -> vector<8x32xf32>
    %108 = arith.addf %84, %107 : vector<8x32xf32>
    %c0_44 = arith.constant 0 : index
    %c0_45 = arith.constant 0 : index
    %109 = vector.load %arg7[%c0_44, %c0_45] : memref<1x32xf32, #tpu.memory_space<vmem>>, vector<1x32xf32>
    %110 = vector.broadcast %109 : vector<1x32xf32> to vector<8x32xf32>
    %111 = arith.addf %108, %110 : vector<8x32xf32>
    %112 = arith.addf %111, %5 : vector<8x32xf32>
    %c0_46 = arith.constant 0 : index
    %c0_47 = arith.constant 0 : index
    %c0_48 = arith.constant 0 : index
    %113 = vector.load %arg8[%c0_46, %c0_47, %c0_48] : memref<1x8x32xf32, #tpu.memory_space<vmem>>, vector<1x8x32xf32>
    %114 = vector.shape_cast %113 : vector<1x8x32xf32> to vector<8x32xf32>
    %115 = vector.shape_cast %112 : vector<8x32xf32> to vector<1x8x32xf32>
    tpu.vector_store %arg8[%c0_46, %c0_47, %c0_48], %115 {strides = array<i32>} : memref<1x8x32xf32, #tpu.memory_space<vmem>>, vector<1x8x32xf32>,
    return
  }
  func.func @transform_0(%arg0: i32, %arg1: i32) -> (i32, i32, i32) {
    %c0_i32 = arith.constant 0 : i32
    %c0_i32_0 = arith.constant 0 : i32
    return %arg0, %arg1, %c0_i32 : i32, i32, i32
  }
  func.func @transform_1(%arg0: i32, %arg1: i32) -> (i32, i32, i32) {
    %c0_i32 = arith.constant 0 : i32
    %c0_i32_0 = arith.constant 0 : i32
    %c0_i32_1 = arith.constant 0 : i32
    return %arg0, %c0_i32, %c0_i32_0 : i32, i32, i32
  }
  func.func @transform_2(%arg0: i32, %arg1: i32) -> (i32, i32, i32) {
    %c0_i32 = arith.constant 0 : i32
    %c0_i32_0 = arith.constant 0 : i32
    %c0_i32_1 = arith.constant 0 : i32
    return %arg0, %c0_i32, %c0_i32_0 : i32, i32, i32
  }
  func.func @transform_3(%arg0: i32, %arg1: i32) -> (i32, i32, i32) {
    %c0_i32 = arith.constant 0 : i32
    %c0_i32_0 = arith.constant 0 : i32
    return %arg0, %arg1, %c0_i32 : i32, i32, i32
  }
  func.func @transform_4(%arg0: i32, %arg1: i32) -> (i32, i32) {
    %c0_i32 = arith.constant 0 : i32
    %c0_i32_0 = arith.constant 0 : i32
    %c0_i32_1 = arith.constant 0 : i32
    return %c0_i32, %c0_i32_0 : i32, i32
  }
  func.func @transform_5(%arg0: i32, %arg1: i32) -> (i32, i32) {
    %c0_i32 = arith.constant 0 : i32
    %c0_i32_0 = arith.constant 0 : i32
    %c0_i32_1 = arith.constant 0 : i32
    return %c0_i32, %c0_i32_0 : i32, i32
  }
  func.func @transform_6(%arg0: i32, %arg1: i32) -> (i32, i32, i32) {
    %c0_i32 = arith.constant 0 : i32
    %c0_i32_0 = arith.constant 0 : i32
    return %arg0, %arg1, %c0_i32 : i32, i32, i32
  }
}

module attributes {stable_mosaic.version = 11 : i64} {
  func.func @_ln_ffn_kernel(%arg0: i32, %arg1: i32, %arg2: memref<16x32xf32, #tpu.memory_space<vmem>>, %arg3: memref<1x32xf32, #tpu.memory_space<vmem>>, %arg4: memref<1x32xf32, #tpu.memory_space<vmem>>, %arg5: memref<32x64xbf16, #tpu.memory_space<vmem>>, %arg6: memref<1x64xf32, #tpu.memory_space<vmem>>, %arg7: memref<64x32xbf16, #tpu.memory_space<vmem>>, %arg8: memref<1x32xf32, #tpu.memory_space<vmem>>, %arg9: memref<16x32xf32, #tpu.memory_space<vmem>>, %arg10: memref<16x32xbf16, #tpu.memory_space<vmem>>, %arg11: memref<16x32xf32, #tpu.memory_space<vmem>>) attributes {dimension_semantics = [#tpu.dimension_semantics<parallel>, #tpu.dimension_semantics<arbitrary>], iteration_bounds = array<i64: 1, 1>, scalar_prefetch = 0 : i64, scratch_operands = 2 : i64, tpu.core_type = #tpu.core_type<tc>, window_params = [{transform_indices = @transform_0, window_bounds = array<i64: 16, 32>}, {pipeline_mode = #tpu.pipeline_mode<synchronous>, transform_indices = @transform_1, window_bounds = array<i64: 1, 32>}, {pipeline_mode = #tpu.pipeline_mode<synchronous>, transform_indices = @transform_2, window_bounds = array<i64: 1, 32>}, {transform_indices = @transform_3, window_bounds = array<i64: 32, 64>}, {transform_indices = @transform_4, window_bounds = array<i64: 1, 64>}, {transform_indices = @transform_5, window_bounds = array<i64: 64, 32>}, {pipeline_mode = #tpu.pipeline_mode<synchronous>, transform_indices = @transform_6, window_bounds = array<i64: 1, 32>}, {transform_indices = @transform_7, window_bounds = array<i64: 16, 32>}]} {
    %c0_i32 = arith.constant 0 : i32
    %0 = arith.cmpi eq, %arg1, %c0_i32 : i32
    %1 = arith.extui %0 : i1 to i32
    %c0_i32_0 = arith.constant 0 : i32
    %2 = arith.cmpi ne, %1, %c0_i32_0 : i32
    scf.if %2 {
      %c0_16 = arith.constant 0 : index
      %c0_17 = arith.constant 0 : index
      %20 = vector.load %arg2[%c0_16, %c0_17] : memref<16x32xf32, #tpu.memory_space<vmem>>, vector<16x32xf32>
      %c0_18 = arith.constant 0 : index
      %c0_19 = arith.constant 0 : index
      %21 = vector.load %arg3[%c0_18, %c0_19] : memref<1x32xf32, #tpu.memory_space<vmem>>, vector<1x32xf32>
      %c0_20 = arith.constant 0 : index
      %c0_21 = arith.constant 0 : index
      %22 = vector.load %arg4[%c0_20, %c0_21] : memref<1x32xf32, #tpu.memory_space<vmem>>, vector<1x32xf32>
      %cst_22 = arith.constant dense<0.000000e+00> : vector<16xf32>
      %23 = vector.multi_reduction <add>, %20, %cst_22 [1] : vector<16x32xf32> to vector<16xf32>
      %24 = vector.shape_cast %23 : vector<16xf32> to vector<16x1xf32>
      %cst_23 = arith.constant 3.200000e+01 : f32
      %25 = vector.broadcast %cst_23 : f32 to vector<16x1xf32>
      %26 = arith.divf %24, %25 : vector<16x1xf32>
      %27 = vector.broadcast %26 : vector<16x1xf32> to vector<16x32xf32>
      %28 = arith.subf %20, %27 : vector<16x32xf32>
      %29 = arith.mulf %28, %28 : vector<16x32xf32>
      %cst_24 = arith.constant dense<0.000000e+00> : vector<16xf32>
      %30 = vector.multi_reduction <add>, %29, %cst_24 [1] : vector<16x32xf32> to vector<16xf32>
      %31 = vector.shape_cast %30 : vector<16xf32> to vector<16x1xf32>
      %cst_25 = arith.constant 3.200000e+01 : f32
      %32 = vector.broadcast %cst_25 : f32 to vector<16x1xf32>
      %33 = arith.divf %31, %32 : vector<16x1xf32>
      %cst_26 = arith.constant 9.99999997E-7 : f32
      %34 = vector.broadcast %cst_26 : f32 to vector<16x1xf32>
      %35 = arith.addf %33, %34 : vector<16x1xf32>
      %36 = math.rsqrt %35 : vector<16x1xf32>
      %37 = vector.broadcast %36 : vector<16x1xf32> to vector<16x32xf32>
      %38 = arith.mulf %28, %37 : vector<16x32xf32>
      %39 = vector.broadcast %21 : vector<1x32xf32> to vector<16x32xf32>
      %40 = arith.mulf %38, %39 : vector<16x32xf32>
      %41 = vector.broadcast %22 : vector<1x32xf32> to vector<16x32xf32>
      %42 = arith.addf %40, %41 : vector<16x32xf32>
      %43 = arith.truncf %42 : vector<16x32xf32> to vector<16x32xbf16>
      %c0_27 = arith.constant 0 : index
      %c0_28 = arith.constant 0 : index
      %44 = vector.load %arg10[%c0_27, %c0_28] : memref<16x32xbf16, #tpu.memory_space<vmem>>, vector<16x32xbf16>
      tpu.vector_store %arg10[%c0_27, %c0_28], %43 {strides = array<i32>} : memref<16x32xbf16, #tpu.memory_space<vmem>>, vector<16x32xbf16>,
      %cst_29 = arith.constant 0.000000e+00 : f32
      %45 = vector.broadcast %cst_29 : f32 to vector<16x32xf32>
      %c0_30 = arith.constant 0 : index
      %c0_31 = arith.constant 0 : index
      %46 = vector.load %arg11[%c0_30, %c0_31] : memref<16x32xf32, #tpu.memory_space<vmem>>, vector<16x32xf32>
      tpu.vector_store %arg11[%c0_30, %c0_31], %45 {strides = array<i32>} : memref<16x32xf32, #tpu.memory_space<vmem>>, vector<16x32xf32>,
    } else {
    }
    %c0 = arith.constant 0 : index
    %c0_1 = arith.constant 0 : index
    %3 = vector.load %arg10[%c0, %c0_1] : memref<16x32xbf16, #tpu.memory_space<vmem>>, vector<16x32xbf16>
    %c0_2 = arith.constant 0 : index
    %c0_3 = arith.constant 0 : index
    %4 = vector.load %arg5[%c0_2, %c0_3] : memref<32x64xbf16, #tpu.memory_space<vmem>>, vector<32x64xbf16>
    %cst = arith.constant dense<0.000000e+00> : vector<16x64xf32>
    %5 = tpu.matmul %3, %4, %cst {dimension_numbers = #tpu.dot_dimension_numbers<[1], [0], [0], [1], [0, 0, 1, 1], [], []>} : vector<16x32xbf16>, vector<32x64xbf16>, vector<16x64xf32> -> vector<16x64xf32>
    %c0_4 = arith.constant 0 : index
    %c0_5 = arith.constant 0 : index
    %6 = vector.load %arg6[%c0_4, %c0_5] : memref<1x64xf32, #tpu.memory_space<vmem>>, vector<1x64xf32>
    %7 = vector.broadcast %6 : vector<1x64xf32> to vector<16x64xf32>
    %8 = arith.addf %5, %7 : vector<16x64xf32>
    %cst_6 = arith.constant 0.000000e+00 : f32
    %9 = vector.broadcast %cst_6 : f32 to vector<16x64xf32>
    %10 = arith.maximumf %8, %9 : vector<16x64xf32>
    %c0_7 = arith.constant 0 : index
    %c0_8 = arith.constant 0 : index
    %11 = vector.load %arg11[%c0_7, %c0_8] : memref<16x32xf32, #tpu.memory_space<vmem>>, vector<16x32xf32>
    %12 = arith.truncf %10 : vector<16x64xf32> to vector<16x64xbf16>
    %c0_9 = arith.constant 0 : index
    %c0_10 = arith.constant 0 : index
    %13 = vector.load %arg7[%c0_9, %c0_10] : memref<64x32xbf16, #tpu.memory_space<vmem>>, vector<64x32xbf16>
    %cst_11 = arith.constant dense<0.000000e+00> : vector<16x32xf32>
    %14 = tpu.matmul %12, %13, %cst_11 {dimension_numbers = #tpu.dot_dimension_numbers<[1], [0], [0], [1], [0, 0, 1, 1], [], []>} : vector<16x64xbf16>, vector<64x32xbf16>, vector<16x32xf32> -> vector<16x32xf32>
    %15 = arith.addf %11, %14 : vector<16x32xf32>
    %c0_12 = arith.constant 0 : index
    %c0_13 = arith.constant 0 : index
    %16 = vector.load %arg11[%c0_12, %c0_13] : memref<16x32xf32, #tpu.memory_space<vmem>>, vector<16x32xf32>
    tpu.vector_store %arg11[%c0_12, %c0_13], %15 {strides = array<i32>} : memref<16x32xf32, #tpu.memory_space<vmem>>, vector<16x32xf32>,
    %c0_i32_14 = arith.constant 0 : i32
    %17 = arith.cmpi eq, %arg1, %c0_i32_14 : i32
    %18 = arith.extui %17 : i1 to i32
    %c0_i32_15 = arith.constant 0 : i32
    %19 = arith.cmpi ne, %18, %c0_i32_15 : i32
    scf.if %19 {
      %c0_16 = arith.constant 0 : index
      %c0_17 = arith.constant 0 : index
      %20 = vector.load %arg2[%c0_16, %c0_17] : memref<16x32xf32, #tpu.memory_space<vmem>>, vector<16x32xf32>
      %c0_18 = arith.constant 0 : index
      %c0_19 = arith.constant 0 : index
      %21 = vector.load %arg11[%c0_18, %c0_19] : memref<16x32xf32, #tpu.memory_space<vmem>>, vector<16x32xf32>
      %22 = arith.addf %20, %21 : vector<16x32xf32>
      %c0_20 = arith.constant 0 : index
      %c0_21 = arith.constant 0 : index
      %23 = vector.load %arg8[%c0_20, %c0_21] : memref<1x32xf32, #tpu.memory_space<vmem>>, vector<1x32xf32>
      %24 = vector.broadcast %23 : vector<1x32xf32> to vector<16x32xf32>
      %25 = arith.addf %22, %24 : vector<16x32xf32>
      %c0_22 = arith.constant 0 : index
      %c0_23 = arith.constant 0 : index
      %26 = vector.load %arg9[%c0_22, %c0_23] : memref<16x32xf32, #tpu.memory_space<vmem>>, vector<16x32xf32>
      tpu.vector_store %arg9[%c0_22, %c0_23], %25 {strides = array<i32>} : memref<16x32xf32, #tpu.memory_space<vmem>>, vector<16x32xf32>,
    } else {
    }
    return
  }
  func.func @transform_0(%arg0: i32, %arg1: i32) -> (i32, i32) {
    %c0_i32 = arith.constant 0 : i32
    %c0_i32_0 = arith.constant 0 : i32
    return %arg0, %c0_i32 : i32, i32
  }
  func.func @transform_1(%arg0: i32, %arg1: i32) -> (i32, i32) {
    %c0_i32 = arith.constant 0 : i32
    %c0_i32_0 = arith.constant 0 : i32
    %c0_i32_1 = arith.constant 0 : i32
    return %c0_i32, %c0_i32_0 : i32, i32
  }
  func.func @transform_2(%arg0: i32, %arg1: i32) -> (i32, i32) {
    %c0_i32 = arith.constant 0 : i32
    %c0_i32_0 = arith.constant 0 : i32
    %c0_i32_1 = arith.constant 0 : i32
    return %c0_i32, %c0_i32_0 : i32, i32
  }
  func.func @transform_3(%arg0: i32, %arg1: i32) -> (i32, i32) {
    %c0_i32 = arith.constant 0 : i32
    %c0_i32_0 = arith.constant 0 : i32
    return %c0_i32, %arg1 : i32, i32
  }
  func.func @transform_4(%arg0: i32, %arg1: i32) -> (i32, i32) {
    %c0_i32 = arith.constant 0 : i32
    %c0_i32_0 = arith.constant 0 : i32
    return %c0_i32, %arg1 : i32, i32
  }
  func.func @transform_5(%arg0: i32, %arg1: i32) -> (i32, i32) {
    %c0_i32 = arith.constant 0 : i32
    %c0_i32_0 = arith.constant 0 : i32
    return %arg1, %c0_i32 : i32, i32
  }
  func.func @transform_6(%arg0: i32, %arg1: i32) -> (i32, i32) {
    %c0_i32 = arith.constant 0 : i32
    %c0_i32_0 = arith.constant 0 : i32
    %c0_i32_1 = arith.constant 0 : i32
    return %c0_i32, %c0_i32_0 : i32, i32
  }
  func.func @transform_7(%arg0: i32, %arg1: i32) -> (i32, i32) {
    %c0_i32 = arith.constant 0 : i32
    %c0_i32_0 = arith.constant 0 : i32
    return %arg0, %c0_i32 : i32, i32
  }
}

module attributes {stable_mosaic.version = 11 : i64} {
  func.func @_mm_bias_kernel(%arg0: i32, %arg1: i32, %arg2: i32, %arg3: memref<16x32xbf16, #tpu.memory_space<vmem>>, %arg4: memref<32x64xbf16, #tpu.memory_space<vmem>>, %arg5: memref<1x64xf32, #tpu.memory_space<vmem>>, %arg6: memref<16x64xbf16, #tpu.memory_space<vmem>>, %arg7: memref<16x64xf32, #tpu.memory_space<vmem>>) attributes {dimension_semantics = [#tpu.dimension_semantics<parallel>, #tpu.dimension_semantics<parallel>, #tpu.dimension_semantics<arbitrary>], iteration_bounds = array<i64: 1, 1, 1>, scalar_prefetch = 0 : i64, scratch_operands = 1 : i64, tpu.core_type = #tpu.core_type<tc>, window_params = [{transform_indices = @transform_0, window_bounds = array<i64: 16, 32>}, {transform_indices = @transform_1, window_bounds = array<i64: 32, 64>}, {transform_indices = @transform_2, window_bounds = array<i64: 1, 64>}, {transform_indices = @transform_3, window_bounds = array<i64: 16, 64>}]} {
    %c0_i32 = arith.constant 0 : i32
    %0 = arith.cmpi eq, %arg2, %c0_i32 : i32
    %1 = arith.extui %0 : i1 to i32
    %c0_i32_0 = arith.constant 0 : i32
    %2 = arith.cmpi ne, %1, %c0_i32_0 : i32
    scf.if %2 {
      %cst_10 = arith.constant 0.000000e+00 : f32
      %12 = vector.broadcast %cst_10 : f32 to vector<16x64xf32>
      %c0_11 = arith.constant 0 : index
      %c0_12 = arith.constant 0 : index
      %13 = vector.load %arg7[%c0_11, %c0_12] : memref<16x64xf32, #tpu.memory_space<vmem>>, vector<16x64xf32>
      tpu.vector_store %arg7[%c0_11, %c0_12], %12 {strides = array<i32>} : memref<16x64xf32, #tpu.memory_space<vmem>>, vector<16x64xf32>,
    } else {
    }
    %c0 = arith.constant 0 : index
    %c0_1 = arith.constant 0 : index
    %3 = vector.load %arg3[%c0, %c0_1] : memref<16x32xbf16, #tpu.memory_space<vmem>>, vector<16x32xbf16>
    %c0_2 = arith.constant 0 : index
    %c0_3 = arith.constant 0 : index
    %4 = vector.load %arg7[%c0_2, %c0_3] : memref<16x64xf32, #tpu.memory_space<vmem>>, vector<16x64xf32>
    %c0_4 = arith.constant 0 : index
    %c0_5 = arith.constant 0 : index
    %5 = vector.load %arg4[%c0_4, %c0_5] : memref<32x64xbf16, #tpu.memory_space<vmem>>, vector<32x64xbf16>
    %cst = arith.constant dense<0.000000e+00> : vector<16x64xf32>
    %6 = tpu.matmul %3, %5, %cst {dimension_numbers = #tpu.dot_dimension_numbers<[1], [0], [0], [1], [0, 0, 1, 1], [], []>} : vector<16x32xbf16>, vector<32x64xbf16>, vector<16x64xf32> -> vector<16x64xf32>
    %7 = arith.addf %4, %6 : vector<16x64xf32>
    %c0_6 = arith.constant 0 : index
    %c0_7 = arith.constant 0 : index
    %8 = vector.load %arg7[%c0_6, %c0_7] : memref<16x64xf32, #tpu.memory_space<vmem>>, vector<16x64xf32>
    tpu.vector_store %arg7[%c0_6, %c0_7], %7 {strides = array<i32>} : memref<16x64xf32, #tpu.memory_space<vmem>>, vector<16x64xf32>,
    %c0_i32_8 = arith.constant 0 : i32
    %9 = arith.cmpi eq, %arg2, %c0_i32_8 : i32
    %10 = arith.extui %9 : i1 to i32
    %c0_i32_9 = arith.constant 0 : i32
    %11 = arith.cmpi ne, %10, %c0_i32_9 : i32
    scf.if %11 {
      %c0_10 = arith.constant 0 : index
      %c0_11 = arith.constant 0 : index
      %12 = vector.load %arg7[%c0_10, %c0_11] : memref<16x64xf32, #tpu.memory_space<vmem>>, vector<16x64xf32>
      %c0_12 = arith.constant 0 : index
      %c0_13 = arith.constant 0 : index
      %13 = vector.load %arg5[%c0_12, %c0_13] : memref<1x64xf32, #tpu.memory_space<vmem>>, vector<1x64xf32>
      %14 = vector.broadcast %13 : vector<1x64xf32> to vector<16x64xf32>
      %15 = arith.addf %12, %14 : vector<16x64xf32>
      %16 = arith.truncf %15 : vector<16x64xf32> to vector<16x64xbf16>
      %c0_14 = arith.constant 0 : index
      %c0_15 = arith.constant 0 : index
      %17 = vector.load %arg6[%c0_14, %c0_15] : memref<16x64xbf16, #tpu.memory_space<vmem>>, vector<16x64xbf16>
      tpu.vector_store %arg6[%c0_14, %c0_15], %16 {strides = array<i32>} : memref<16x64xbf16, #tpu.memory_space<vmem>>, vector<16x64xbf16>,
    } else {
    }
    return
  }
  func.func @transform_0(%arg0: i32, %arg1: i32, %arg2: i32) -> (i32, i32) {
    %c0_i32 = arith.constant 0 : i32
    return %arg0, %arg2 : i32, i32
  }
  func.func @transform_1(%arg0: i32, %arg1: i32, %arg2: i32) -> (i32, i32) {
    %c0_i32 = arith.constant 0 : i32
    return %arg2, %arg1 : i32, i32
  }
  func.func @transform_2(%arg0: i32, %arg1: i32, %arg2: i32) -> (i32, i32) {
    %c0_i32 = arith.constant 0 : i32
    %c0_i32_0 = arith.constant 0 : i32
    return %c0_i32, %arg1 : i32, i32
  }
  func.func @transform_3(%arg0: i32, %arg1: i32, %arg2: i32) -> (i32, i32) {
    %c0_i32 = arith.constant 0 : i32
    return %arg0, %arg1 : i32, i32
  }
}

module attributes {stable_mosaic.version = 11 : i64} {
  func.func @_ln_ffn_kernel(%arg0: i32, %arg1: i32, %arg2: memref<16x32xf32, #tpu.memory_space<vmem>>, %arg3: memref<1x32xf32, #tpu.memory_space<vmem>>, %arg4: memref<1x32xf32, #tpu.memory_space<vmem>>, %arg5: memref<32x64xbf16, #tpu.memory_space<vmem>>, %arg6: memref<1x64xf32, #tpu.memory_space<vmem>>, %arg7: memref<64x32xbf16, #tpu.memory_space<vmem>>, %arg8: memref<1x32xf32, #tpu.memory_space<vmem>>, %arg9: memref<1x32xf32, #tpu.memory_space<vmem>>, %arg10: memref<1x32xf32, #tpu.memory_space<vmem>>, %arg11: memref<16x32xbf16, #tpu.memory_space<vmem>>, %arg12: memref<16x32xbf16, #tpu.memory_space<vmem>>, %arg13: memref<16x32xf32, #tpu.memory_space<vmem>>) attributes {dimension_semantics = [#tpu.dimension_semantics<parallel>, #tpu.dimension_semantics<arbitrary>], iteration_bounds = array<i64: 1, 1>, scalar_prefetch = 0 : i64, scratch_operands = 2 : i64, tpu.core_type = #tpu.core_type<tc>, window_params = [{transform_indices = @transform_0, window_bounds = array<i64: 16, 32>}, {pipeline_mode = #tpu.pipeline_mode<synchronous>, transform_indices = @transform_1, window_bounds = array<i64: 1, 32>}, {pipeline_mode = #tpu.pipeline_mode<synchronous>, transform_indices = @transform_2, window_bounds = array<i64: 1, 32>}, {transform_indices = @transform_3, window_bounds = array<i64: 32, 64>}, {transform_indices = @transform_4, window_bounds = array<i64: 1, 64>}, {transform_indices = @transform_5, window_bounds = array<i64: 64, 32>}, {pipeline_mode = #tpu.pipeline_mode<synchronous>, transform_indices = @transform_6, window_bounds = array<i64: 1, 32>}, {pipeline_mode = #tpu.pipeline_mode<synchronous>, transform_indices = @transform_7, window_bounds = array<i64: 1, 32>}, {pipeline_mode = #tpu.pipeline_mode<synchronous>, transform_indices = @transform_8, window_bounds = array<i64: 1, 32>}, {transform_indices = @transform_9, window_bounds = array<i64: 16, 32>}]} {
    %c0_i32 = arith.constant 0 : i32
    %0 = arith.cmpi eq, %arg1, %c0_i32 : i32
    %1 = arith.extui %0 : i1 to i32
    %c0_i32_0 = arith.constant 0 : i32
    %2 = arith.cmpi ne, %1, %c0_i32_0 : i32
    scf.if %2 {
      %c0_16 = arith.constant 0 : index
      %c0_17 = arith.constant 0 : index
      %20 = vector.load %arg2[%c0_16, %c0_17] : memref<16x32xf32, #tpu.memory_space<vmem>>, vector<16x32xf32>
      %c0_18 = arith.constant 0 : index
      %c0_19 = arith.constant 0 : index
      %21 = vector.load %arg3[%c0_18, %c0_19] : memref<1x32xf32, #tpu.memory_space<vmem>>, vector<1x32xf32>
      %c0_20 = arith.constant 0 : index
      %c0_21 = arith.constant 0 : index
      %22 = vector.load %arg4[%c0_20, %c0_21] : memref<1x32xf32, #tpu.memory_space<vmem>>, vector<1x32xf32>
      %cst_22 = arith.constant dense<0.000000e+00> : vector<16xf32>
      %23 = vector.multi_reduction <add>, %20, %cst_22 [1] : vector<16x32xf32> to vector<16xf32>
      %24 = vector.shape_cast %23 : vector<16xf32> to vector<16x1xf32>
      %cst_23 = arith.constant 3.200000e+01 : f32
      %25 = vector.broadcast %cst_23 : f32 to vector<16x1xf32>
      %26 = arith.divf %24, %25 : vector<16x1xf32>
      %27 = vector.broadcast %26 : vector<16x1xf32> to vector<16x32xf32>
      %28 = arith.subf %20, %27 : vector<16x32xf32>
      %29 = arith.mulf %28, %28 : vector<16x32xf32>
      %cst_24 = arith.constant dense<0.000000e+00> : vector<16xf32>
      %30 = vector.multi_reduction <add>, %29, %cst_24 [1] : vector<16x32xf32> to vector<16xf32>
      %31 = vector.shape_cast %30 : vector<16xf32> to vector<16x1xf32>
      %cst_25 = arith.constant 3.200000e+01 : f32
      %32 = vector.broadcast %cst_25 : f32 to vector<16x1xf32>
      %33 = arith.divf %31, %32 : vector<16x1xf32>
      %cst_26 = arith.constant 9.99999997E-7 : f32
      %34 = vector.broadcast %cst_26 : f32 to vector<16x1xf32>
      %35 = arith.addf %33, %34 : vector<16x1xf32>
      %36 = math.rsqrt %35 : vector<16x1xf32>
      %37 = vector.broadcast %36 : vector<16x1xf32> to vector<16x32xf32>
      %38 = arith.mulf %28, %37 : vector<16x32xf32>
      %39 = vector.broadcast %21 : vector<1x32xf32> to vector<16x32xf32>
      %40 = arith.mulf %38, %39 : vector<16x32xf32>
      %41 = vector.broadcast %22 : vector<1x32xf32> to vector<16x32xf32>
      %42 = arith.addf %40, %41 : vector<16x32xf32>
      %43 = arith.truncf %42 : vector<16x32xf32> to vector<16x32xbf16>
      %c0_27 = arith.constant 0 : index
      %c0_28 = arith.constant 0 : index
      %44 = vector.load %arg12[%c0_27, %c0_28] : memref<16x32xbf16, #tpu.memory_space<vmem>>, vector<16x32xbf16>
      tpu.vector_store %arg12[%c0_27, %c0_28], %43 {strides = array<i32>} : memref<16x32xbf16, #tpu.memory_space<vmem>>, vector<16x32xbf16>,
      %cst_29 = arith.constant 0.000000e+00 : f32
      %45 = vector.broadcast %cst_29 : f32 to vector<16x32xf32>
      %c0_30 = arith.constant 0 : index
      %c0_31 = arith.constant 0 : index
      %46 = vector.load %arg13[%c0_30, %c0_31] : memref<16x32xf32, #tpu.memory_space<vmem>>, vector<16x32xf32>
      tpu.vector_store %arg13[%c0_30, %c0_31], %45 {strides = array<i32>} : memref<16x32xf32, #tpu.memory_space<vmem>>, vector<16x32xf32>,
    } else {
    }
    %c0 = arith.constant 0 : index
    %c0_1 = arith.constant 0 : index
    %3 = vector.load %arg12[%c0, %c0_1] : memref<16x32xbf16, #tpu.memory_space<vmem>>, vector<16x32xbf16>
    %c0_2 = arith.constant 0 : index
    %c0_3 = arith.constant 0 : index
    %4 = vector.load %arg5[%c0_2, %c0_3] : memref<32x64xbf16, #tpu.memory_space<vmem>>, vector<32x64xbf16>
    %cst = arith.constant dense<0.000000e+00> : vector<16x64xf32>
    %5 = tpu.matmul %3, %4, %cst {dimension_numbers = #tpu.dot_dimension_numbers<[1], [0], [0], [1], [0, 0, 1, 1], [], []>} : vector<16x32xbf16>, vector<32x64xbf16>, vector<16x64xf32> -> vector<16x64xf32>
    %c0_4 = arith.constant 0 : index
    %c0_5 = arith.constant 0 : index
    %6 = vector.load %arg6[%c0_4, %c0_5] : memref<1x64xf32, #tpu.memory_space<vmem>>, vector<1x64xf32>
    %7 = vector.broadcast %6 : vector<1x64xf32> to vector<16x64xf32>
    %8 = arith.addf %5, %7 : vector<16x64xf32>
    %cst_6 = arith.constant 0.000000e+00 : f32
    %9 = vector.broadcast %cst_6 : f32 to vector<16x64xf32>
    %10 = arith.maximumf %8, %9 : vector<16x64xf32>
    %c0_7 = arith.constant 0 : index
    %c0_8 = arith.constant 0 : index
    %11 = vector.load %arg13[%c0_7, %c0_8] : memref<16x32xf32, #tpu.memory_space<vmem>>, vector<16x32xf32>
    %12 = arith.truncf %10 : vector<16x64xf32> to vector<16x64xbf16>
    %c0_9 = arith.constant 0 : index
    %c0_10 = arith.constant 0 : index
    %13 = vector.load %arg7[%c0_9, %c0_10] : memref<64x32xbf16, #tpu.memory_space<vmem>>, vector<64x32xbf16>
    %cst_11 = arith.constant dense<0.000000e+00> : vector<16x32xf32>
    %14 = tpu.matmul %12, %13, %cst_11 {dimension_numbers = #tpu.dot_dimension_numbers<[1], [0], [0], [1], [0, 0, 1, 1], [], []>} : vector<16x64xbf16>, vector<64x32xbf16>, vector<16x32xf32> -> vector<16x32xf32>
    %15 = arith.addf %11, %14 : vector<16x32xf32>
    %c0_12 = arith.constant 0 : index
    %c0_13 = arith.constant 0 : index
    %16 = vector.load %arg13[%c0_12, %c0_13] : memref<16x32xf32, #tpu.memory_space<vmem>>, vector<16x32xf32>
    tpu.vector_store %arg13[%c0_12, %c0_13], %15 {strides = array<i32>} : memref<16x32xf32, #tpu.memory_space<vmem>>, vector<16x32xf32>,
    %c0_i32_14 = arith.constant 0 : i32
    %17 = arith.cmpi eq, %arg1, %c0_i32_14 : i32
    %18 = arith.extui %17 : i1 to i32
    %c0_i32_15 = arith.constant 0 : i32
    %19 = arith.cmpi ne, %18, %c0_i32_15 : i32
    scf.if %19 {
      %c0_16 = arith.constant 0 : index
      %c0_17 = arith.constant 0 : index
      %20 = vector.load %arg2[%c0_16, %c0_17] : memref<16x32xf32, #tpu.memory_space<vmem>>, vector<16x32xf32>
      %c0_18 = arith.constant 0 : index
      %c0_19 = arith.constant 0 : index
      %21 = vector.load %arg13[%c0_18, %c0_19] : memref<16x32xf32, #tpu.memory_space<vmem>>, vector<16x32xf32>
      %22 = arith.addf %20, %21 : vector<16x32xf32>
      %c0_20 = arith.constant 0 : index
      %c0_21 = arith.constant 0 : index
      %23 = vector.load %arg8[%c0_20, %c0_21] : memref<1x32xf32, #tpu.memory_space<vmem>>, vector<1x32xf32>
      %24 = vector.broadcast %23 : vector<1x32xf32> to vector<16x32xf32>
      %25 = arith.addf %22, %24 : vector<16x32xf32>
      %c0_22 = arith.constant 0 : index
      %c0_23 = arith.constant 0 : index
      %26 = vector.load %arg9[%c0_22, %c0_23] : memref<1x32xf32, #tpu.memory_space<vmem>>, vector<1x32xf32>
      %c0_24 = arith.constant 0 : index
      %c0_25 = arith.constant 0 : index
      %27 = vector.load %arg10[%c0_24, %c0_25] : memref<1x32xf32, #tpu.memory_space<vmem>>, vector<1x32xf32>
      %cst_26 = arith.constant dense<0.000000e+00> : vector<16xf32>
      %28 = vector.multi_reduction <add>, %25, %cst_26 [1] : vector<16x32xf32> to vector<16xf32>
      %29 = vector.shape_cast %28 : vector<16xf32> to vector<16x1xf32>
      %cst_27 = arith.constant 3.200000e+01 : f32
      %30 = vector.broadcast %cst_27 : f32 to vector<16x1xf32>
      %31 = arith.divf %29, %30 : vector<16x1xf32>
      %32 = vector.broadcast %31 : vector<16x1xf32> to vector<16x32xf32>
      %33 = arith.subf %25, %32 : vector<16x32xf32>
      %34 = arith.mulf %33, %33 : vector<16x32xf32>
      %cst_28 = arith.constant dense<0.000000e+00> : vector<16xf32>
      %35 = vector.multi_reduction <add>, %34, %cst_28 [1] : vector<16x32xf32> to vector<16xf32>
      %36 = vector.shape_cast %35 : vector<16xf32> to vector<16x1xf32>
      %cst_29 = arith.constant 3.200000e+01 : f32
      %37 = vector.broadcast %cst_29 : f32 to vector<16x1xf32>
      %38 = arith.divf %36, %37 : vector<16x1xf32>
      %cst_30 = arith.constant 9.99999997E-7 : f32
      %39 = vector.broadcast %cst_30 : f32 to vector<16x1xf32>
      %40 = arith.addf %38, %39 : vector<16x1xf32>
      %41 = math.rsqrt %40 : vector<16x1xf32>
      %42 = vector.broadcast %41 : vector<16x1xf32> to vector<16x32xf32>
      %43 = arith.mulf %33, %42 : vector<16x32xf32>
      %44 = vector.broadcast %26 : vector<1x32xf32> to vector<16x32xf32>
      %45 = arith.mulf %43, %44 : vector<16x32xf32>
      %46 = vector.broadcast %27 : vector<1x32xf32> to vector<16x32xf32>
      %47 = arith.addf %45, %46 : vector<16x32xf32>
      %48 = arith.truncf %47 : vector<16x32xf32> to vector<16x32xbf16>
      %c0_31 = arith.constant 0 : index
      %c0_32 = arith.constant 0 : index
      %49 = vector.load %arg11[%c0_31, %c0_32] : memref<16x32xbf16, #tpu.memory_space<vmem>>, vector<16x32xbf16>
      tpu.vector_store %arg11[%c0_31, %c0_32], %48 {strides = array<i32>} : memref<16x32xbf16, #tpu.memory_space<vmem>>, vector<16x32xbf16>,
    } else {
    }
    return
  }
  func.func @transform_0(%arg0: i32, %arg1: i32) -> (i32, i32) {
    %c0_i32 = arith.constant 0 : i32
    %c0_i32_0 = arith.constant 0 : i32
    return %arg0, %c0_i32 : i32, i32
  }
  func.func @transform_1(%arg0: i32, %arg1: i32) -> (i32, i32) {
    %c0_i32 = arith.constant 0 : i32
    %c0_i32_0 = arith.constant 0 : i32
    %c0_i32_1 = arith.constant 0 : i32
    return %c0_i32, %c0_i32_0 : i32, i32
  }
  func.func @transform_2(%arg0: i32, %arg1: i32) -> (i32, i32) {
    %c0_i32 = arith.constant 0 : i32
    %c0_i32_0 = arith.constant 0 : i32
    %c0_i32_1 = arith.constant 0 : i32
    return %c0_i32, %c0_i32_0 : i32, i32
  }
  func.func @transform_3(%arg0: i32, %arg1: i32) -> (i32, i32) {
    %c0_i32 = arith.constant 0 : i32
    %c0_i32_0 = arith.constant 0 : i32
    return %c0_i32, %arg1 : i32, i32
  }
  func.func @transform_4(%arg0: i32, %arg1: i32) -> (i32, i32) {
    %c0_i32 = arith.constant 0 : i32
    %c0_i32_0 = arith.constant 0 : i32
    return %c0_i32, %arg1 : i32, i32
  }
  func.func @transform_5(%arg0: i32, %arg1: i32) -> (i32, i32) {
    %c0_i32 = arith.constant 0 : i32
    %c0_i32_0 = arith.constant 0 : i32
    return %arg1, %c0_i32 : i32, i32
  }
  func.func @transform_6(%arg0: i32, %arg1: i32) -> (i32, i32) {
    %c0_i32 = arith.constant 0 : i32
    %c0_i32_0 = arith.constant 0 : i32
    %c0_i32_1 = arith.constant 0 : i32
    return %c0_i32, %c0_i32_0 : i32, i32
  }
  func.func @transform_7(%arg0: i32, %arg1: i32) -> (i32, i32) {
    %c0_i32 = arith.constant 0 : i32
    %c0_i32_0 = arith.constant 0 : i32
    %c0_i32_1 = arith.constant 0 : i32
    return %c0_i32, %c0_i32_0 : i32, i32
  }
  func.func @transform_8(%arg0: i32, %arg1: i32) -> (i32, i32) {
    %c0_i32 = arith.constant 0 : i32
    %c0_i32_0 = arith.constant 0 : i32
    %c0_i32_1 = arith.constant 0 : i32
    return %c0_i32, %c0_i32_0 : i32, i32
  }
  func.func @transform_9(%arg0: i32, %arg1: i32) -> (i32, i32) {
    %c0_i32 = arith.constant 0 : i32
    %c0_i32_0 = arith.constant 0 : i32
    return %arg0, %c0_i32 : i32, i32
  }
}

module attributes {stable_mosaic.version = 11 : i64} {
  func.func @_attn_kernel(%arg0: i32, %arg1: i32, %arg2: memref<1x8x32xbf16, #tpu.memory_space<vmem>>, %arg3: memref<1x8x64xbf16, #tpu.memory_space<vmem>>, %arg4: memref<1x1x8xi32, #tpu.memory_space<vmem>>, %arg5: memref<1x8x32xf32, #tpu.memory_space<vmem>>, %arg6: memref<32x32xbf16, #tpu.memory_space<vmem>>, %arg7: memref<1x32xf32, #tpu.memory_space<vmem>>, %arg8: memref<1x8x32xf32, #tpu.memory_space<vmem>>) attributes {dimension_semantics = [#tpu.dimension_semantics<parallel>, #tpu.dimension_semantics<parallel>], iteration_bounds = array<i64: 2, 1>, scalar_prefetch = 0 : i64, scratch_operands = 0 : i64, tpu.core_type = #tpu.core_type<tc>, window_params = [{transform_indices = @transform_0, window_bounds = array<i64: 1, 8, 32>}, {transform_indices = @transform_1, window_bounds = array<i64: 1, 8, 64>}, {transform_indices = @transform_2, window_bounds = array<i64: 1, 1, 8>}, {transform_indices = @transform_3, window_bounds = array<i64: 1, 8, 32>}, {pipeline_mode = #tpu.pipeline_mode<synchronous>, transform_indices = @transform_4, window_bounds = array<i64: 32, 32>}, {pipeline_mode = #tpu.pipeline_mode<synchronous>, transform_indices = @transform_5, window_bounds = array<i64: 1, 32>}, {transform_indices = @transform_6, window_bounds = array<i64: 1, 8, 32>}]} {
    %c0 = arith.constant 0 : index
    %c0_0 = arith.constant 0 : index
    %c0_1 = arith.constant 0 : index
    %0 = vector.load %arg2[%c0, %c0_0, %c0_1] : memref<1x8x32xbf16, #tpu.memory_space<vmem>>, vector<1x8x32xbf16>
    %1 = vector.shape_cast %0 : vector<1x8x32xbf16> to vector<8x32xbf16>
    %c0_2 = arith.constant 0 : index
    %c0_3 = arith.constant 0 : index
    %c0_4 = arith.constant 0 : index
    %2 = vector.load %arg3[%c0_2, %c0_3, %c0_4] : memref<1x8x64xbf16, #tpu.memory_space<vmem>>, vector<1x8x64xbf16>
    %3 = vector.shape_cast %2 : vector<1x8x64xbf16> to vector<8x64xbf16>
    %c0_5 = arith.constant 0 : index
    %c0_6 = arith.constant 0 : index
    %c0_7 = arith.constant 0 : index
    %4 = vector.load %arg5[%c0_5, %c0_6, %c0_7] : memref<1x8x32xf32, #tpu.memory_space<vmem>>, vector<1x8x32xf32>
    %5 = vector.shape_cast %4 : vector<1x8x32xf32> to vector<8x32xf32>
    %c0_8 = arith.constant 0 : index
    %c0_9 = arith.constant 0 : index
    %c0_10 = arith.constant 0 : index
    %6 = vector.load %arg4[%c0_8, %c0_9, %c0_10] : memref<1x1x8xi32, #tpu.memory_space<vmem>>, vector<1x1x8xi32>
    %7 = vector.shape_cast %6 : vector<1x1x8xi32> to vector<1x8xi32>
    %c0_i32 = arith.constant 0 : i32
    %8 = vector.broadcast %c0_i32 : i32 to vector<1x8xi32>
    %9 = arith.cmpi sgt, %7, %8 : vector<1x8xi32>
    %10 = vector.shape_cast %9 : vector<1x8xi1> to vector<1x8xi1>
    %11 = vector.broadcast %10 : vector<1x8xi1> to vector<8x8xi1>
    %c8_i32 = arith.constant 8 : i32
    %12 = arith.muli %arg1, %c8_i32 : i32
    %13 = tpu.iota {dimensions = array<i32: 0>} : vector<8x8xi32>
    %14 = vector.broadcast %12 : i32 to vector<8x8xi32>
    %15 = arith.addi %14, %13 : vector<8x8xi32>
    %16 = tpu.iota {dimensions = array<i32: 1>} : vector<8x8xi32>
    %17 = arith.cmpi sgt, %16, %15 : vector<8x8xi32>
    %18 = arith.ori %11, %17 : vector<8x8xi1>
    %cst = arith.constant 0.000000e+00 : f32
    %19 = vector.broadcast %cst : f32 to vector<8x32xf32>
    %20 = vector.extract_strided_slice %1 {offsets = [0, 0], sizes = [8, 8], strides = [1, 1]} : vector<8x32xbf16> to vector<8x8xbf16>
    %21 = vector.extract_strided_slice %3 {offsets = [0, 0], sizes = [8, 8], strides = [1, 1]} : vector<8x64xbf16> to vector<8x8xbf16>
    %cst_11 = arith.constant dense<0.000000e+00> : vector<8x8xf32>
    %22 = tpu.matmul %20, %21, %cst_11 {dimension_numbers = #tpu.dot_dimension_numbers<[1], [1], [0], [0], [0, 0, 1, 0], [], []>} : vector<8x8xbf16>, vector<8x8xbf16>, vector<8x8xf32> -> vector<8x8xf32>
    %cst_12 = arith.constant 0.353553385 : f32
    %23 = vector.broadcast %cst_12 : f32 to vector<8x8xf32>
    %24 = arith.mulf %22, %23 : vector<8x8xf32>
    %cst_13 = arith.constant -1.000000e+09 : f32
    %25 = vector.broadcast %cst_13 : f32 to vector<8x8xf32>
    %26 = arith.select %18, %25, %24 : vector<8x8xi1>, vector<8x8xf32>
    %cst_14 = arith.constant dense<0xFF800000> : vector<8xf32>
    %27 = vector.multi_reduction <maximumf>, %26, %cst_14 [1] : vector<8x8xf32> to vector<8xf32>
    %28 = vector.shape_cast %27 : vector<8xf32> to vector<8x1xf32>
    %29 = vector.broadcast %28 : vector<8x1xf32> to vector<8x8xf32>
    %30 = arith.subf %26, %29 : vector<8x8xf32>
    %31 = math.exp %30 : vector<8x8xf32>
    %cst_15 = arith.constant dense<0.000000e+00> : vector<8xf32>
    %32 = vector.multi_reduction <add>, %31, %cst_15 [1] : vector<8x8xf32> to vector<8xf32>
    %33 = vector.shape_cast %32 : vector<8xf32> to vector<8x1xf32>
    %34 = tpu.reciprocal %33 {approx = true} : vector<8x1xf32> -> vector<8x1xf32>
    %35 = vector.broadcast %34 : vector<8x1xf32> to vector<8x8xf32>
    %36 = arith.mulf %31, %35 : vector<8x8xf32>
    %37 = arith.truncf %36 : vector<8x8xf32> to vector<8x8xbf16>
    %38 = vector.extract_strided_slice %3 {offsets = [0, 32], sizes = [8, 8], strides = [1, 1]} : vector<8x64xbf16> to vector<8x8xbf16>
    %cst_16 = arith.constant dense<0.000000e+00> : vector<8x8xf32>
    %39 = tpu.matmul %37, %38, %cst_16 {dimension_numbers = #tpu.dot_dimension_numbers<[1], [0], [0], [1], [0, 0, 1, 1], [], []>} : vector<8x8xbf16>, vector<8x8xbf16>, vector<8x8xf32> -> vector<8x8xf32>
    %40 = arith.truncf %39 : vector<8x8xf32> to vector<8x8xbf16>
    %c0_17 = arith.constant 0 : index
    %c0_18 = arith.constant 0 : index
    %41 = vector.load %arg6[%c0_17, %c0_18] : memref<32x32xbf16, #tpu.memory_space<vmem>>, vector<8x32xbf16>
    %cst_19 = arith.constant dense<0.000000e+00> : vector<8x32xf32>
    %42 = tpu.matmul %40, %41, %cst_19 {dimension_numbers = #tpu.dot_dimension_numbers<[1], [0], [0], [1], [0, 0, 1, 1], [], []>} : vector<8x8xbf16>, vector<8x32xbf16>, vector<8x32xf32> -> vector<8x32xf32>
    %43 = arith.addf %19, %42 : vector<8x32xf32>
    %44 = vector.extract_strided_slice %1 {offsets = [0, 8], sizes = [8, 8], strides = [1, 1]} : vector<8x32xbf16> to vector<8x8xbf16>
    %45 = vector.extract_strided_slice %3 {offsets = [0, 8], sizes = [8, 8], strides = [1, 1]} : vector<8x64xbf16> to vector<8x8xbf16>
    %cst_20 = arith.constant dense<0.000000e+00> : vector<8x8xf32>
    %46 = tpu.matmul %44, %45, %cst_20 {dimension_numbers = #tpu.dot_dimension_numbers<[1], [1], [0], [0], [0, 0, 1, 0], [], []>} : vector<8x8xbf16>, vector<8x8xbf16>, vector<8x8xf32> -> vector<8x8xf32>
    %cst_21 = arith.constant 0.353553385 : f32
    %47 = vector.broadcast %cst_21 : f32 to vector<8x8xf32>
    %48 = arith.mulf %46, %47 : vector<8x8xf32>
    %cst_22 = arith.constant -1.000000e+09 : f32
    %49 = vector.broadcast %cst_22 : f32 to vector<8x8xf32>
    %50 = arith.select %18, %49, %48 : vector<8x8xi1>, vector<8x8xf32>
    %cst_23 = arith.constant dense<0xFF800000> : vector<8xf32>
    %51 = vector.multi_reduction <maximumf>, %50, %cst_23 [1] : vector<8x8xf32> to vector<8xf32>
    %52 = vector.shape_cast %51 : vector<8xf32> to vector<8x1xf32>
    %53 = vector.broadcast %52 : vector<8x1xf32> to vector<8x8xf32>
    %54 = arith.subf %50, %53 : vector<8x8xf32>
    %55 = math.exp %54 : vector<8x8xf32>
    %cst_24 = arith.constant dense<0.000000e+00> : vector<8xf32>
    %56 = vector.multi_reduction <add>, %55, %cst_24 [1] : vector<8x8xf32> to vector<8xf32>
    %57 = vector.shape_cast %56 : vector<8xf32> to vector<8x1xf32>
    %58 = tpu.reciprocal %57 {approx = true} : vector<8x1xf32> -> vector<8x1xf32>
    %59 = vector.broadcast %58 : vector<8x1xf32> to vector<8x8xf32>
    %60 = arith.mulf %55, %59 : vector<8x8xf32>
    %61 = arith.truncf %60 : vector<8x8xf32> to vector<8x8xbf16>
    %62 = vector.extract_strided_slice %3 {offsets = [0, 40], sizes = [8, 8], strides = [1, 1]} : vector<8x64xbf16> to vector<8x8xbf16>
    %cst_25 = arith.constant dense<0.000000e+00> : vector<8x8xf32>
    %63 = tpu.matmul %61, %62, %cst_25 {dimension_numbers = #tpu.dot_dimension_numbers<[1], [0], [0], [1], [0, 0, 1, 1], [], []>} : vector<8x8xbf16>, vector<8x8xbf16>, vector<8x8xf32> -> vector<8x8xf32>
    %64 = arith.truncf %63 : vector<8x8xf32> to vector<8x8xbf16>
    %c8 = arith.constant 8 : index
    %c0_26 = arith.constant 0 : index
    %65 = vector.load %arg6[%c8, %c0_26] : memref<32x32xbf16, #tpu.memory_space<vmem>>, vector<8x32xbf16>
    %cst_27 = arith.constant dense<0.000000e+00> : vector<8x32xf32>
    %66 = tpu.matmul %64, %65, %cst_27 {dimension_numbers = #tpu.dot_dimension_numbers<[1], [0], [0], [1], [0, 0, 1, 1], [], []>} : vector<8x8xbf16>, vector<8x32xbf16>, vector<8x32xf32> -> vector<8x32xf32>
    %67 = arith.addf %43, %66 : vector<8x32xf32>
    %68 = vector.extract_strided_slice %1 {offsets = [0, 16], sizes = [8, 8], strides = [1, 1]} : vector<8x32xbf16> to vector<8x8xbf16>
    %69 = vector.extract_strided_slice %3 {offsets = [0, 16], sizes = [8, 8], strides = [1, 1]} : vector<8x64xbf16> to vector<8x8xbf16>
    %cst_28 = arith.constant dense<0.000000e+00> : vector<8x8xf32>
    %70 = tpu.matmul %68, %69, %cst_28 {dimension_numbers = #tpu.dot_dimension_numbers<[1], [1], [0], [0], [0, 0, 1, 0], [], []>} : vector<8x8xbf16>, vector<8x8xbf16>, vector<8x8xf32> -> vector<8x8xf32>
    %cst_29 = arith.constant 0.353553385 : f32
    %71 = vector.broadcast %cst_29 : f32 to vector<8x8xf32>
    %72 = arith.mulf %70, %71 : vector<8x8xf32>
    %cst_30 = arith.constant -1.000000e+09 : f32
    %73 = vector.broadcast %cst_30 : f32 to vector<8x8xf32>
    %74 = arith.select %18, %73, %72 : vector<8x8xi1>, vector<8x8xf32>
    %cst_31 = arith.constant dense<0xFF800000> : vector<8xf32>
    %75 = vector.multi_reduction <maximumf>, %74, %cst_31 [1] : vector<8x8xf32> to vector<8xf32>
    %76 = vector.shape_cast %75 : vector<8xf32> to vector<8x1xf32>
    %77 = vector.broadcast %76 : vector<8x1xf32> to vector<8x8xf32>
    %78 = arith.subf %74, %77 : vector<8x8xf32>
    %79 = math.exp %78 : vector<8x8xf32>
    %cst_32 = arith.constant dense<0.000000e+00> : vector<8xf32>
    %80 = vector.multi_reduction <add>, %79, %cst_32 [1] : vector<8x8xf32> to vector<8xf32>
    %81 = vector.shape_cast %80 : vector<8xf32> to vector<8x1xf32>
    %82 = tpu.reciprocal %81 {approx = true} : vector<8x1xf32> -> vector<8x1xf32>
    %83 = vector.broadcast %82 : vector<8x1xf32> to vector<8x8xf32>
    %84 = arith.mulf %79, %83 : vector<8x8xf32>
    %85 = arith.truncf %84 : vector<8x8xf32> to vector<8x8xbf16>
    %86 = vector.extract_strided_slice %3 {offsets = [0, 48], sizes = [8, 8], strides = [1, 1]} : vector<8x64xbf16> to vector<8x8xbf16>
    %cst_33 = arith.constant dense<0.000000e+00> : vector<8x8xf32>
    %87 = tpu.matmul %85, %86, %cst_33 {dimension_numbers = #tpu.dot_dimension_numbers<[1], [0], [0], [1], [0, 0, 1, 1], [], []>} : vector<8x8xbf16>, vector<8x8xbf16>, vector<8x8xf32> -> vector<8x8xf32>
    %88 = arith.truncf %87 : vector<8x8xf32> to vector<8x8xbf16>
    %c16 = arith.constant 16 : index
    %c0_34 = arith.constant 0 : index
    %89 = vector.load %arg6[%c16, %c0_34] : memref<32x32xbf16, #tpu.memory_space<vmem>>, vector<8x32xbf16>
    %cst_35 = arith.constant dense<0.000000e+00> : vector<8x32xf32>
    %90 = tpu.matmul %88, %89, %cst_35 {dimension_numbers = #tpu.dot_dimension_numbers<[1], [0], [0], [1], [0, 0, 1, 1], [], []>} : vector<8x8xbf16>, vector<8x32xbf16>, vector<8x32xf32> -> vector<8x32xf32>
    %91 = arith.addf %67, %90 : vector<8x32xf32>
    %92 = vector.extract_strided_slice %1 {offsets = [0, 24], sizes = [8, 8], strides = [1, 1]} : vector<8x32xbf16> to vector<8x8xbf16>
    %93 = vector.extract_strided_slice %3 {offsets = [0, 24], sizes = [8, 8], strides = [1, 1]} : vector<8x64xbf16> to vector<8x8xbf16>
    %cst_36 = arith.constant dense<0.000000e+00> : vector<8x8xf32>
    %94 = tpu.matmul %92, %93, %cst_36 {dimension_numbers = #tpu.dot_dimension_numbers<[1], [1], [0], [0], [0, 0, 1, 0], [], []>} : vector<8x8xbf16>, vector<8x8xbf16>, vector<8x8xf32> -> vector<8x8xf32>
    %cst_37 = arith.constant 0.353553385 : f32
    %95 = vector.broadcast %cst_37 : f32 to vector<8x8xf32>
    %96 = arith.mulf %94, %95 : vector<8x8xf32>
    %cst_38 = arith.constant -1.000000e+09 : f32
    %97 = vector.broadcast %cst_38 : f32 to vector<8x8xf32>
    %98 = arith.select %18, %97, %96 : vector<8x8xi1>, vector<8x8xf32>
    %cst_39 = arith.constant dense<0xFF800000> : vector<8xf32>
    %99 = vector.multi_reduction <maximumf>, %98, %cst_39 [1] : vector<8x8xf32> to vector<8xf32>
    %100 = vector.shape_cast %99 : vector<8xf32> to vector<8x1xf32>
    %101 = vector.broadcast %100 : vector<8x1xf32> to vector<8x8xf32>
    %102 = arith.subf %98, %101 : vector<8x8xf32>
    %103 = math.exp %102 : vector<8x8xf32>
    %cst_40 = arith.constant dense<0.000000e+00> : vector<8xf32>
    %104 = vector.multi_reduction <add>, %103, %cst_40 [1] : vector<8x8xf32> to vector<8xf32>
    %105 = vector.shape_cast %104 : vector<8xf32> to vector<8x1xf32>
    %106 = tpu.reciprocal %105 {approx = true} : vector<8x1xf32> -> vector<8x1xf32>
    %107 = vector.broadcast %106 : vector<8x1xf32> to vector<8x8xf32>
    %108 = arith.mulf %103, %107 : vector<8x8xf32>
    %109 = arith.truncf %108 : vector<8x8xf32> to vector<8x8xbf16>
    %110 = vector.extract_strided_slice %3 {offsets = [0, 56], sizes = [8, 8], strides = [1, 1]} : vector<8x64xbf16> to vector<8x8xbf16>
    %cst_41 = arith.constant dense<0.000000e+00> : vector<8x8xf32>
    %111 = tpu.matmul %109, %110, %cst_41 {dimension_numbers = #tpu.dot_dimension_numbers<[1], [0], [0], [1], [0, 0, 1, 1], [], []>} : vector<8x8xbf16>, vector<8x8xbf16>, vector<8x8xf32> -> vector<8x8xf32>
    %112 = arith.truncf %111 : vector<8x8xf32> to vector<8x8xbf16>
    %c24 = arith.constant 24 : index
    %c0_42 = arith.constant 0 : index
    %113 = vector.load %arg6[%c24, %c0_42] : memref<32x32xbf16, #tpu.memory_space<vmem>>, vector<8x32xbf16>
    %cst_43 = arith.constant dense<0.000000e+00> : vector<8x32xf32>
    %114 = tpu.matmul %112, %113, %cst_43 {dimension_numbers = #tpu.dot_dimension_numbers<[1], [0], [0], [1], [0, 0, 1, 1], [], []>} : vector<8x8xbf16>, vector<8x32xbf16>, vector<8x32xf32> -> vector<8x32xf32>
    %115 = arith.addf %91, %114 : vector<8x32xf32>
    %c0_44 = arith.constant 0 : index
    %c0_45 = arith.constant 0 : index
    %116 = vector.load %arg7[%c0_44, %c0_45] : memref<1x32xf32, #tpu.memory_space<vmem>>, vector<1x32xf32>
    %117 = vector.broadcast %116 : vector<1x32xf32> to vector<8x32xf32>
    %118 = arith.addf %115, %117 : vector<8x32xf32>
    %119 = arith.addf %118, %5 : vector<8x32xf32>
    %c0_46 = arith.constant 0 : index
    %c0_47 = arith.constant 0 : index
    %c0_48 = arith.constant 0 : index
    %120 = vector.load %arg8[%c0_46, %c0_47, %c0_48] : memref<1x8x32xf32, #tpu.memory_space<vmem>>, vector<1x8x32xf32>
    %121 = vector.shape_cast %120 : vector<1x8x32xf32> to vector<8x32xf32>
    %122 = vector.shape_cast %119 : vector<8x32xf32> to vector<1x8x32xf32>
    tpu.vector_store %arg8[%c0_46, %c0_47, %c0_48], %122 {strides = array<i32>} : memref<1x8x32xf32, #tpu.memory_space<vmem>>, vector<1x8x32xf32>,
    return
  }
  func.func @transform_0(%arg0: i32, %arg1: i32) -> (i32, i32, i32) {
    %c0_i32 = arith.constant 0 : i32
    %c0_i32_0 = arith.constant 0 : i32
    return %arg0, %arg1, %c0_i32 : i32, i32, i32
  }
  func.func @transform_1(%arg0: i32, %arg1: i32) -> (i32, i32, i32) {
    %c0_i32 = arith.constant 0 : i32
    %c0_i32_0 = arith.constant 0 : i32
    %c0_i32_1 = arith.constant 0 : i32
    return %arg0, %c0_i32, %c0_i32_0 : i32, i32, i32
  }
  func.func @transform_2(%arg0: i32, %arg1: i32) -> (i32, i32, i32) {
    %c0_i32 = arith.constant 0 : i32
    %c0_i32_0 = arith.constant 0 : i32
    %c0_i32_1 = arith.constant 0 : i32
    return %arg0, %c0_i32, %c0_i32_0 : i32, i32, i32
  }
  func.func @transform_3(%arg0: i32, %arg1: i32) -> (i32, i32, i32) {
    %c0_i32 = arith.constant 0 : i32
    %c0_i32_0 = arith.constant 0 : i32
    return %arg0, %arg1, %c0_i32 : i32, i32, i32
  }
  func.func @transform_4(%arg0: i32, %arg1: i32) -> (i32, i32) {
    %c0_i32 = arith.constant 0 : i32
    %c0_i32_0 = arith.constant 0 : i32
    %c0_i32_1 = arith.constant 0 : i32
    return %c0_i32, %c0_i32_0 : i32, i32
  }
  func.func @transform_5(%arg0: i32, %arg1: i32) -> (i32, i32) {
    %c0_i32 = arith.constant 0 : i32
    %c0_i32_0 = arith.constant 0 : i32
    %c0_i32_1 = arith.constant 0 : i32
    return %c0_i32, %c0_i32_0 : i32, i32
  }
  func.func @transform_6(%arg0: i32, %arg1: i32) -> (i32, i32, i32) {
    %c0_i32 = arith.constant 0 : i32
    %c0_i32_0 = arith.constant 0 : i32
    return %arg0, %arg1, %c0_i32 : i32, i32, i32
  }
}

module attributes {stable_mosaic.version = 11 : i64} {
  func.func @_attn_kernel(%arg0: i32, %arg1: i32, %arg2: memref<1x8x32xbf16, #tpu.memory_space<vmem>>, %arg3: memref<1x8x64xbf16, #tpu.memory_space<vmem>>, %arg4: memref<1x1x8xi32, #tpu.memory_space<vmem>>, %arg5: memref<1x8x32xf32, #tpu.memory_space<vmem>>, %arg6: memref<32x32xbf16, #tpu.memory_space<vmem>>, %arg7: memref<1x32xf32, #tpu.memory_space<vmem>>, %arg8: memref<1x8x32xf32, #tpu.memory_space<vmem>>, %arg9: memref<1x4x8x8xf32, #tpu.memory_space<vmem>>) attributes {dimension_semantics = [#tpu.dimension_semantics<parallel>, #tpu.dimension_semantics<parallel>], iteration_bounds = array<i64: 2, 1>, scalar_prefetch = 0 : i64, scratch_operands = 0 : i64, tpu.core_type = #tpu.core_type<tc>, window_params = [{transform_indices = @transform_0, window_bounds = array<i64: 1, 8, 32>}, {transform_indices = @transform_1, window_bounds = array<i64: 1, 8, 64>}, {transform_indices = @transform_2, window_bounds = array<i64: 1, 1, 8>}, {transform_indices = @transform_3, window_bounds = array<i64: 1, 8, 32>}, {pipeline_mode = #tpu.pipeline_mode<synchronous>, transform_indices = @transform_4, window_bounds = array<i64: 32, 32>}, {pipeline_mode = #tpu.pipeline_mode<synchronous>, transform_indices = @transform_5, window_bounds = array<i64: 1, 32>}, {transform_indices = @transform_6, window_bounds = array<i64: 1, 8, 32>}, {transform_indices = @transform_7, window_bounds = array<i64: 1, 4, 8, 8>}]} {
    %c0 = arith.constant 0 : index
    %c0_0 = arith.constant 0 : index
    %c0_1 = arith.constant 0 : index
    %0 = vector.load %arg2[%c0, %c0_0, %c0_1] : memref<1x8x32xbf16, #tpu.memory_space<vmem>>, vector<1x8x32xbf16>
    %1 = vector.shape_cast %0 : vector<1x8x32xbf16> to vector<8x32xbf16>
    %c0_2 = arith.constant 0 : index
    %c0_3 = arith.constant 0 : index
    %c0_4 = arith.constant 0 : index
    %2 = vector.load %arg3[%c0_2, %c0_3, %c0_4] : memref<1x8x64xbf16, #tpu.memory_space<vmem>>, vector<1x8x64xbf16>
    %3 = vector.shape_cast %2 : vector<1x8x64xbf16> to vector<8x64xbf16>
    %c0_5 = arith.constant 0 : index
    %c0_6 = arith.constant 0 : index
    %c0_7 = arith.constant 0 : index
    %4 = vector.load %arg5[%c0_5, %c0_6, %c0_7] : memref<1x8x32xf32, #tpu.memory_space<vmem>>, vector<1x8x32xf32>
    %5 = vector.shape_cast %4 : vector<1x8x32xf32> to vector<8x32xf32>
    %c0_8 = arith.constant 0 : index
    %c0_9 = arith.constant 0 : index
    %c0_10 = arith.constant 0 : index
    %6 = vector.load %arg4[%c0_8, %c0_9, %c0_10] : memref<1x1x8xi32, #tpu.memory_space<vmem>>, vector<1x1x8xi32>
    %7 = vector.shape_cast %6 : vector<1x1x8xi32> to vector<1x8xi32>
    %c0_i32 = arith.constant 0 : i32
    %8 = vector.broadcast %c0_i32 : i32 to vector<1x8xi32>
    %9 = arith.cmpi sgt, %7, %8 : vector<1x8xi32>
    %10 = vector.shape_cast %9 : vector<1x8xi1> to vector<1x8xi1>
    %11 = vector.broadcast %10 : vector<1x8xi1> to vector<8x8xi1>
    %cst = arith.constant 0.000000e+00 : f32
    %12 = vector.broadcast %cst : f32 to vector<8x32xf32>
    %13 = vector.extract_strided_slice %1 {offsets = [0, 0], sizes = [8, 8], strides = [1, 1]} : vector<8x32xbf16> to vector<8x8xbf16>
    %14 = vector.extract_strided_slice %3 {offsets = [0, 0], sizes = [8, 8], strides = [1, 1]} : vector<8x64xbf16> to vector<8x8xbf16>
    %cst_11 = arith.constant dense<0.000000e+00> : vector<8x8xf32>
    %15 = tpu.matmul %13, %14, %cst_11 {dimension_numbers = #tpu.dot_dimension_numbers<[1], [1], [0], [0], [0, 0, 1, 0], [], []>} : vector<8x8xbf16>, vector<8x8xbf16>, vector<8x8xf32> -> vector<8x8xf32>
    %cst_12 = arith.constant 0.353553385 : f32
    %16 = vector.broadcast %cst_12 : f32 to vector<8x8xf32>
    %17 = arith.mulf %15, %16 : vector<8x8xf32>
    %cst_13 = arith.constant -1.000000e+09 : f32
    %18 = vector.broadcast %cst_13 : f32 to vector<8x8xf32>
    %19 = arith.select %11, %18, %17 : vector<8x8xi1>, vector<8x8xf32>
    %cst_14 = arith.constant dense<0xFF800000> : vector<8xf32>
    %20 = vector.multi_reduction <maximumf>, %19, %cst_14 [1] : vector<8x8xf32> to vector<8xf32>
    %21 = vector.shape_cast %20 : vector<8xf32> to vector<8x1xf32>
    %22 = vector.broadcast %21 : vector<8x1xf32> to vector<8x8xf32>
    %23 = arith.subf %19, %22 : vector<8x8xf32>
    %24 = math.exp %23 : vector<8x8xf32>
    %cst_15 = arith.constant dense<0.000000e+00> : vector<8xf32>
    %25 = vector.multi_reduction <add>, %24, %cst_15 [1] : vector<8x8xf32> to vector<8xf32>
    %26 = vector.shape_cast %25 : vector<8xf32> to vector<8x1xf32>
    %27 = tpu.reciprocal %26 {approx = true} : vector<8x1xf32> -> vector<8x1xf32>
    %28 = vector.broadcast %27 : vector<8x1xf32> to vector<8x8xf32>
    %29 = arith.mulf %24, %28 : vector<8x8xf32>
    %c0_16 = arith.constant 0 : index
    %c0_17 = arith.constant 0 : index
    %c0_18 = arith.constant 0 : index
    %c0_19 = arith.constant 0 : index
    %30 = vector.load %arg9[%c0_16, %c0_17, %c0_18, %c0_19] : memref<1x4x8x8xf32, #tpu.memory_space<vmem>>, vector<1x1x8x8xf32>
    %31 = vector.shape_cast %30 : vector<1x1x8x8xf32> to vector<8x8xf32>
    %32 = vector.shape_cast %29 : vector<8x8xf32> to vector<1x1x8x8xf32>
    tpu.vector_store %arg9[%c0_16, %c0_17, %c0_18, %c0_19], %32 {strides = array<i32>} : memref<1x4x8x8xf32, #tpu.memory_space<vmem>>, vector<1x1x8x8xf32>,
    %33 = arith.truncf %29 : vector<8x8xf32> to vector<8x8xbf16>
    %34 = vector.extract_strided_slice %3 {offsets = [0, 32], sizes = [8, 8], strides = [1, 1]} : vector<8x64xbf16> to vector<8x8xbf16>
    %cst_20 = arith.constant dense<0.000000e+00> : vector<8x8xf32>
    %35 = tpu.matmul %33, %34, %cst_20 {dimension_numbers = #tpu.dot_dimension_numbers<[1], [0], [0], [1], [0, 0, 1, 1], [], []>} : vector<8x8xbf16>, vector<8x8xbf16>, vector<8x8xf32> -> vector<8x8xf32>
    %36 = arith.truncf %35 : vector<8x8xf32> to vector<8x8xbf16>
    %c0_21 = arith.constant 0 : index
    %c0_22 = arith.constant 0 : index
    %37 = vector.load %arg6[%c0_21, %c0_22] : memref<32x32xbf16, #tpu.memory_space<vmem>>, vector<8x32xbf16>
    %cst_23 = arith.constant dense<0.000000e+00> : vector<8x32xf32>
    %38 = tpu.matmul %36, %37, %cst_23 {dimension_numbers = #tpu.dot_dimension_numbers<[1], [0], [0], [1], [0, 0, 1, 1], [], []>} : vector<8x8xbf16>, vector<8x32xbf16>, vector<8x32xf32> -> vector<8x32xf32>
    %39 = arith.addf %12, %38 : vector<8x32xf32>
    %40 = vector.extract_strided_slice %1 {offsets = [0, 8], sizes = [8, 8], strides = [1, 1]} : vector<8x32xbf16> to vector<8x8xbf16>
    %41 = vector.extract_strided_slice %3 {offsets = [0, 8], sizes = [8, 8], strides = [1, 1]} : vector<8x64xbf16> to vector<8x8xbf16>
    %cst_24 = arith.constant dense<0.000000e+00> : vector<8x8xf32>
    %42 = tpu.matmul %40, %41, %cst_24 {dimension_numbers = #tpu.dot_dimension_numbers<[1], [1], [0], [0], [0, 0, 1, 0], [], []>} : vector<8x8xbf16>, vector<8x8xbf16>, vector<8x8xf32> -> vector<8x8xf32>
    %cst_25 = arith.constant 0.353553385 : f32
    %43 = vector.broadcast %cst_25 : f32 to vector<8x8xf32>
    %44 = arith.mulf %42, %43 : vector<8x8xf32>
    %cst_26 = arith.constant -1.000000e+09 : f32
    %45 = vector.broadcast %cst_26 : f32 to vector<8x8xf32>
    %46 = arith.select %11, %45, %44 : vector<8x8xi1>, vector<8x8xf32>
    %cst_27 = arith.constant dense<0xFF800000> : vector<8xf32>
    %47 = vector.multi_reduction <maximumf>, %46, %cst_27 [1] : vector<8x8xf32> to vector<8xf32>
    %48 = vector.shape_cast %47 : vector<8xf32> to vector<8x1xf32>
    %49 = vector.broadcast %48 : vector<8x1xf32> to vector<8x8xf32>
    %50 = arith.subf %46, %49 : vector<8x8xf32>
    %51 = math.exp %50 : vector<8x8xf32>
    %cst_28 = arith.constant dense<0.000000e+00> : vector<8xf32>
    %52 = vector.multi_reduction <add>, %51, %cst_28 [1] : vector<8x8xf32> to vector<8xf32>
    %53 = vector.shape_cast %52 : vector<8xf32> to vector<8x1xf32>
    %54 = tpu.reciprocal %53 {approx = true} : vector<8x1xf32> -> vector<8x1xf32>
    %55 = vector.broadcast %54 : vector<8x1xf32> to vector<8x8xf32>
    %56 = arith.mulf %51, %55 : vector<8x8xf32>
    %c0_29 = arith.constant 0 : index
    %c1 = arith.constant 1 : index
    %c0_30 = arith.constant 0 : index
    %c0_31 = arith.constant 0 : index
    %57 = vector.load %arg9[%c0_29, %c1, %c0_30, %c0_31] : memref<1x4x8x8xf32, #tpu.memory_space<vmem>>, vector<1x1x8x8xf32>
    %58 = vector.shape_cast %57 : vector<1x1x8x8xf32> to vector<8x8xf32>
    %59 = vector.shape_cast %56 : vector<8x8xf32> to vector<1x1x8x8xf32>
    tpu.vector_store %arg9[%c0_29, %c1, %c0_30, %c0_31], %59 {strides = array<i32>} : memref<1x4x8x8xf32, #tpu.memory_space<vmem>>, vector<1x1x8x8xf32>,
    %60 = arith.truncf %56 : vector<8x8xf32> to vector<8x8xbf16>
    %61 = vector.extract_strided_slice %3 {offsets = [0, 40], sizes = [8, 8], strides = [1, 1]} : vector<8x64xbf16> to vector<8x8xbf16>
    %cst_32 = arith.constant dense<0.000000e+00> : vector<8x8xf32>
    %62 = tpu.matmul %60, %61, %cst_32 {dimension_numbers = #tpu.dot_dimension_numbers<[1], [0], [0], [1], [0, 0, 1, 1], [], []>} : vector<8x8xbf16>, vector<8x8xbf16>, vector<8x8xf32> -> vector<8x8xf32>
    %63 = arith.truncf %62 : vector<8x8xf32> to vector<8x8xbf16>
    %c8 = arith.constant 8 : index
    %c0_33 = arith.constant 0 : index
    %64 = vector.load %arg6[%c8, %c0_33] : memref<32x32xbf16, #tpu.memory_space<vmem>>, vector<8x32xbf16>
    %cst_34 = arith.constant dense<0.000000e+00> : vector<8x32xf32>
    %65 = tpu.matmul %63, %64, %cst_34 {dimension_numbers = #tpu.dot_dimension_numbers<[1], [0], [0], [1], [0, 0, 1, 1], [], []>} : vector<8x8xbf16>, vector<8x32xbf16>, vector<8x32xf32> -> vector<8x32xf32>
    %66 = arith.addf %39, %65 : vector<8x32xf32>
    %67 = vector.extract_strided_slice %1 {offsets = [0, 16], sizes = [8, 8], strides = [1, 1]} : vector<8x32xbf16> to vector<8x8xbf16>
    %68 = vector.extract_strided_slice %3 {offsets = [0, 16], sizes = [8, 8], strides = [1, 1]} : vector<8x64xbf16> to vector<8x8xbf16>
    %cst_35 = arith.constant dense<0.000000e+00> : vector<8x8xf32>
    %69 = tpu.matmul %67, %68, %cst_35 {dimension_numbers = #tpu.dot_dimension_numbers<[1], [1], [0], [0], [0, 0, 1, 0], [], []>} : vector<8x8xbf16>, vector<8x8xbf16>, vector<8x8xf32> -> vector<8x8xf32>
    %cst_36 = arith.constant 0.353553385 : f32
    %70 = vector.broadcast %cst_36 : f32 to vector<8x8xf32>
    %71 = arith.mulf %69, %70 : vector<8x8xf32>
    %cst_37 = arith.constant -1.000000e+09 : f32
    %72 = vector.broadcast %cst_37 : f32 to vector<8x8xf32>
    %73 = arith.select %11, %72, %71 : vector<8x8xi1>, vector<8x8xf32>
    %cst_38 = arith.constant dense<0xFF800000> : vector<8xf32>
    %74 = vector.multi_reduction <maximumf>, %73, %cst_38 [1] : vector<8x8xf32> to vector<8xf32>
    %75 = vector.shape_cast %74 : vector<8xf32> to vector<8x1xf32>
    %76 = vector.broadcast %75 : vector<8x1xf32> to vector<8x8xf32>
    %77 = arith.subf %73, %76 : vector<8x8xf32>
    %78 = math.exp %77 : vector<8x8xf32>
    %cst_39 = arith.constant dense<0.000000e+00> : vector<8xf32>
    %79 = vector.multi_reduction <add>, %78, %cst_39 [1] : vector<8x8xf32> to vector<8xf32>
    %80 = vector.shape_cast %79 : vector<8xf32> to vector<8x1xf32>
    %81 = tpu.reciprocal %80 {approx = true} : vector<8x1xf32> -> vector<8x1xf32>
    %82 = vector.broadcast %81 : vector<8x1xf32> to vector<8x8xf32>
    %83 = arith.mulf %78, %82 : vector<8x8xf32>
    %c0_40 = arith.constant 0 : index
    %c2 = arith.constant 2 : index
    %c0_41 = arith.constant 0 : index
    %c0_42 = arith.constant 0 : index
    %84 = vector.load %arg9[%c0_40, %c2, %c0_41, %c0_42] : memref<1x4x8x8xf32, #tpu.memory_space<vmem>>, vector<1x1x8x8xf32>
    %85 = vector.shape_cast %84 : vector<1x1x8x8xf32> to vector<8x8xf32>
    %86 = vector.shape_cast %83 : vector<8x8xf32> to vector<1x1x8x8xf32>
    tpu.vector_store %arg9[%c0_40, %c2, %c0_41, %c0_42], %86 {strides = array<i32>} : memref<1x4x8x8xf32, #tpu.memory_space<vmem>>, vector<1x1x8x8xf32>,
    %87 = arith.truncf %83 : vector<8x8xf32> to vector<8x8xbf16>
    %88 = vector.extract_strided_slice %3 {offsets = [0, 48], sizes = [8, 8], strides = [1, 1]} : vector<8x64xbf16> to vector<8x8xbf16>
    %cst_43 = arith.constant dense<0.000000e+00> : vector<8x8xf32>
    %89 = tpu.matmul %87, %88, %cst_43 {dimension_numbers = #tpu.dot_dimension_numbers<[1], [0], [0], [1], [0, 0, 1, 1], [], []>} : vector<8x8xbf16>, vector<8x8xbf16>, vector<8x8xf32> -> vector<8x8xf32>
    %90 = arith.truncf %89 : vector<8x8xf32> to vector<8x8xbf16>
    %c16 = arith.constant 16 : index
    %c0_44 = arith.constant 0 : index
    %91 = vector.load %arg6[%c16, %c0_44] : memref<32x32xbf16, #tpu.memory_space<vmem>>, vector<8x32xbf16>
    %cst_45 = arith.constant dense<0.000000e+00> : vector<8x32xf32>
    %92 = tpu.matmul %90, %91, %cst_45 {dimension_numbers = #tpu.dot_dimension_numbers<[1], [0], [0], [1], [0, 0, 1, 1], [], []>} : vector<8x8xbf16>, vector<8x32xbf16>, vector<8x32xf32> -> vector<8x32xf32>
    %93 = arith.addf %66, %92 : vector<8x32xf32>
    %94 = vector.extract_strided_slice %1 {offsets = [0, 24], sizes = [8, 8], strides = [1, 1]} : vector<8x32xbf16> to vector<8x8xbf16>
    %95 = vector.extract_strided_slice %3 {offsets = [0, 24], sizes = [8, 8], strides = [1, 1]} : vector<8x64xbf16> to vector<8x8xbf16>
    %cst_46 = arith.constant dense<0.000000e+00> : vector<8x8xf32>
    %96 = tpu.matmul %94, %95, %cst_46 {dimension_numbers = #tpu.dot_dimension_numbers<[1], [1], [0], [0], [0, 0, 1, 0], [], []>} : vector<8x8xbf16>, vector<8x8xbf16>, vector<8x8xf32> -> vector<8x8xf32>
    %cst_47 = arith.constant 0.353553385 : f32
    %97 = vector.broadcast %cst_47 : f32 to vector<8x8xf32>
    %98 = arith.mulf %96, %97 : vector<8x8xf32>
    %cst_48 = arith.constant -1.000000e+09 : f32
    %99 = vector.broadcast %cst_48 : f32 to vector<8x8xf32>
    %100 = arith.select %11, %99, %98 : vector<8x8xi1>, vector<8x8xf32>
    %cst_49 = arith.constant dense<0xFF800000> : vector<8xf32>
    %101 = vector.multi_reduction <maximumf>, %100, %cst_49 [1] : vector<8x8xf32> to vector<8xf32>
    %102 = vector.shape_cast %101 : vector<8xf32> to vector<8x1xf32>
    %103 = vector.broadcast %102 : vector<8x1xf32> to vector<8x8xf32>
    %104 = arith.subf %100, %103 : vector<8x8xf32>
    %105 = math.exp %104 : vector<8x8xf32>
    %cst_50 = arith.constant dense<0.000000e+00> : vector<8xf32>
    %106 = vector.multi_reduction <add>, %105, %cst_50 [1] : vector<8x8xf32> to vector<8xf32>
    %107 = vector.shape_cast %106 : vector<8xf32> to vector<8x1xf32>
    %108 = tpu.reciprocal %107 {approx = true} : vector<8x1xf32> -> vector<8x1xf32>
    %109 = vector.broadcast %108 : vector<8x1xf32> to vector<8x8xf32>
    %110 = arith.mulf %105, %109 : vector<8x8xf32>
    %c0_51 = arith.constant 0 : index
    %c3 = arith.constant 3 : index
    %c0_52 = arith.constant 0 : index
    %c0_53 = arith.constant 0 : index
    %111 = vector.load %arg9[%c0_51, %c3, %c0_52, %c0_53] : memref<1x4x8x8xf32, #tpu.memory_space<vmem>>, vector<1x1x8x8xf32>
    %112 = vector.shape_cast %111 : vector<1x1x8x8xf32> to vector<8x8xf32>
    %113 = vector.shape_cast %110 : vector<8x8xf32> to vector<1x1x8x8xf32>
    tpu.vector_store %arg9[%c0_51, %c3, %c0_52, %c0_53], %113 {strides = array<i32>} : memref<1x4x8x8xf32, #tpu.memory_space<vmem>>, vector<1x1x8x8xf32>,
    %114 = arith.truncf %110 : vector<8x8xf32> to vector<8x8xbf16>
    %115 = vector.extract_strided_slice %3 {offsets = [0, 56], sizes = [8, 8], strides = [1, 1]} : vector<8x64xbf16> to vector<8x8xbf16>
    %cst_54 = arith.constant dense<0.000000e+00> : vector<8x8xf32>
    %116 = tpu.matmul %114, %115, %cst_54 {dimension_numbers = #tpu.dot_dimension_numbers<[1], [0], [0], [1], [0, 0, 1, 1], [], []>} : vector<8x8xbf16>, vector<8x8xbf16>, vector<8x8xf32> -> vector<8x8xf32>
    %117 = arith.truncf %116 : vector<8x8xf32> to vector<8x8xbf16>
    %c24 = arith.constant 24 : index
    %c0_55 = arith.constant 0 : index
    %118 = vector.load %arg6[%c24, %c0_55] : memref<32x32xbf16, #tpu.memory_space<vmem>>, vector<8x32xbf16>
    %cst_56 = arith.constant dense<0.000000e+00> : vector<8x32xf32>
    %119 = tpu.matmul %117, %118, %cst_56 {dimension_numbers = #tpu.dot_dimension_numbers<[1], [0], [0], [1], [0, 0, 1, 1], [], []>} : vector<8x8xbf16>, vector<8x32xbf16>, vector<8x32xf32> -> vector<8x32xf32>
    %120 = arith.addf %93, %119 : vector<8x32xf32>
    %c0_57 = arith.constant 0 : index
    %c0_58 = arith.constant 0 : index
    %121 = vector.load %arg7[%c0_57, %c0_58] : memref<1x32xf32, #tpu.memory_space<vmem>>, vector<1x32xf32>
    %122 = vector.broadcast %121 : vector<1x32xf32> to vector<8x32xf32>
    %123 = arith.addf %120, %122 : vector<8x32xf32>
    %124 = arith.addf %123, %5 : vector<8x32xf32>
    %c0_59 = arith.constant 0 : index
    %c0_60 = arith.constant 0 : index
    %c0_61 = arith.constant 0 : index
    %125 = vector.load %arg8[%c0_59, %c0_60, %c0_61] : memref<1x8x32xf32, #tpu.memory_space<vmem>>, vector<1x8x32xf32>
    %126 = vector.shape_cast %125 : vector<1x8x32xf32> to vector<8x32xf32>
    %127 = vector.shape_cast %124 : vector<8x32xf32> to vector<1x8x32xf32>
    tpu.vector_store %arg8[%c0_59, %c0_60, %c0_61], %127 {strides = array<i32>} : memref<1x8x32xf32, #tpu.memory_space<vmem>>, vector<1x8x32xf32>,
    return
  }
  func.func @transform_0(%arg0: i32, %arg1: i32) -> (i32, i32, i32) {
    %c0_i32 = arith.constant 0 : i32
    %c0_i32_0 = arith.constant 0 : i32
    return %arg0, %arg1, %c0_i32 : i32, i32, i32
  }
  func.func @transform_1(%arg0: i32, %arg1: i32) -> (i32, i32, i32) {
    %c0_i32 = arith.constant 0 : i32
    %c0_i32_0 = arith.constant 0 : i32
    %c0_i32_1 = arith.constant 0 : i32
    return %arg0, %c0_i32, %c0_i32_0 : i32, i32, i32
  }
  func.func @transform_2(%arg0: i32, %arg1: i32) -> (i32, i32, i32) {
    %c0_i32 = arith.constant 0 : i32
    %c0_i32_0 = arith.constant 0 : i32
    %c0_i32_1 = arith.constant 0 : i32
    return %arg0, %c0_i32, %c0_i32_0 : i32, i32, i32
  }
  func.func @transform_3(%arg0: i32, %arg1: i32) -> (i32, i32, i32) {
    %c0_i32 = arith.constant 0 : i32
    %c0_i32_0 = arith.constant 0 : i32
    return %arg0, %arg1, %c0_i32 : i32, i32, i32
  }
  func.func @transform_4(%arg0: i32, %arg1: i32) -> (i32, i32) {
    %c0_i32 = arith.constant 0 : i32
    %c0_i32_0 = arith.constant 0 : i32
    %c0_i32_1 = arith.constant 0 : i32
    return %c0_i32, %c0_i32_0 : i32, i32
  }
  func.func @transform_5(%arg0: i32, %arg1: i32) -> (i32, i32) {
    %c0_i32 = arith.constant 0 : i32
    %c0_i32_0 = arith.constant 0 : i32
    %c0_i32_1 = arith.constant 0 : i32
    return %c0_i32, %c0_i32_0 : i32, i32
  }
  func.func @transform_6(%arg0: i32, %arg1: i32) -> (i32, i32, i32) {
    %c0_i32 = arith.constant 0 : i32
    %c0_i32_0 = arith.constant 0 : i32
    return %arg0, %arg1, %c0_i32 : i32, i32, i32
  }
  func.func @transform_7(%arg0: i32, %arg1: i32) -> (i32, i32, i32, i32) {
    %c0_i32 = arith.constant 0 : i32
    %c0_i32_0 = arith.constant 0 : i32
    %c0_i32_1 = arith.constant 0 : i32
    return %arg0, %c0_i32, %arg1, %c0_i32_0 : i32, i32, i32, i32
  }
}

module attributes {stable_mosaic.version = 11 : i64} {
  func.func @_ln_mm_bias_kernel(%arg0: i32, %arg1: i32, %arg2: memref<16x32xf32, #tpu.memory_space<vmem>>, %arg3: memref<1x32xf32, #tpu.memory_space<vmem>>, %arg4: memref<1x32xf32, #tpu.memory_space<vmem>>, %arg5: memref<32x60xbf16, #tpu.memory_space<vmem>>, %arg6: memref<1x60xf32, #tpu.memory_space<vmem>>, %arg7: memref<16x60xf32, #tpu.memory_space<vmem>>, %arg8: memref<16x32xbf16, #tpu.memory_space<vmem>>) attributes {dimension_semantics = [#tpu.dimension_semantics<parallel>, #tpu.dimension_semantics<arbitrary>], iteration_bounds = array<i64: 1, 1>, scalar_prefetch = 0 : i64, scratch_operands = 1 : i64, tpu.core_type = #tpu.core_type<tc>, window_params = [{transform_indices = @transform_0, window_bounds = array<i64: 16, 32>}, {pipeline_mode = #tpu.pipeline_mode<synchronous>, transform_indices = @transform_1, window_bounds = array<i64: 1, 32>}, {pipeline_mode = #tpu.pipeline_mode<synchronous>, transform_indices = @transform_2, window_bounds = array<i64: 1, 32>}, {transform_indices = @transform_3, window_bounds = array<i64: 32, 60>}, {transform_indices = @transform_4, window_bounds = array<i64: 1, 60>}, {transform_indices = @transform_5, window_bounds = array<i64: 16, 60>}]} {
    %c0_i32 = arith.constant 0 : i32
    %0 = arith.cmpi eq, %arg1, %c0_i32 : i32
    %1 = arith.extui %0 : i1 to i32
    %c0_i32_0 = arith.constant 0 : i32
    %2 = arith.cmpi ne, %1, %c0_i32_0 : i32
    scf.if %2 {
      %c0_8 = arith.constant 0 : index
      %c0_9 = arith.constant 0 : index
      %10 = vector.load %arg2[%c0_8, %c0_9] : memref<16x32xf32, #tpu.memory_space<vmem>>, vector<16x32xf32>
      %c0_10 = arith.constant 0 : index
      %c0_11 = arith.constant 0 : index
      %11 = vector.load %arg3[%c0_10, %c0_11] : memref<1x32xf32, #tpu.memory_space<vmem>>, vector<1x32xf32>
      %c0_12 = arith.constant 0 : index
      %c0_13 = arith.constant 0 : index
      %12 = vector.load %arg4[%c0_12, %c0_13] : memref<1x32xf32, #tpu.memory_space<vmem>>, vector<1x32xf32>
      %cst_14 = arith.constant dense<0.000000e+00> : vector<16xf32>
      %13 = vector.multi_reduction <add>, %10, %cst_14 [1] : vector<16x32xf32> to vector<16xf32>
      %14 = vector.shape_cast %13 : vector<16xf32> to vector<16x1xf32>
      %cst_15 = arith.constant 3.200000e+01 : f32
      %15 = vector.broadcast %cst_15 : f32 to vector<16x1xf32>
      %16 = arith.divf %14, %15 : vector<16x1xf32>
      %17 = vector.broadcast %16 : vector<16x1xf32> to vector<16x32xf32>
      %18 = arith.subf %10, %17 : vector<16x32xf32>
      %19 = arith.mulf %18, %18 : vector<16x32xf32>
      %cst_16 = arith.constant dense<0.000000e+00> : vector<16xf32>
      %20 = vector.multi_reduction <add>, %19, %cst_16 [1] : vector<16x32xf32> to vector<16xf32>
      %21 = vector.shape_cast %20 : vector<16xf32> to vector<16x1xf32>
      %cst_17 = arith.constant 3.200000e+01 : f32
      %22 = vector.broadcast %cst_17 : f32 to vector<16x1xf32>
      %23 = arith.divf %21, %22 : vector<16x1xf32>
      %cst_18 = arith.constant 9.99999997E-7 : f32
      %24 = vector.broadcast %cst_18 : f32 to vector<16x1xf32>
      %25 = arith.addf %23, %24 : vector<16x1xf32>
      %26 = math.rsqrt %25 : vector<16x1xf32>
      %27 = vector.broadcast %26 : vector<16x1xf32> to vector<16x32xf32>
      %28 = arith.mulf %18, %27 : vector<16x32xf32>
      %29 = vector.broadcast %11 : vector<1x32xf32> to vector<16x32xf32>
      %30 = arith.mulf %28, %29 : vector<16x32xf32>
      %31 = vector.broadcast %12 : vector<1x32xf32> to vector<16x32xf32>
      %32 = arith.addf %30, %31 : vector<16x32xf32>
      %33 = arith.truncf %32 : vector<16x32xf32> to vector<16x32xbf16>
      %c0_19 = arith.constant 0 : index
      %c0_20 = arith.constant 0 : index
      %34 = vector.load %arg8[%c0_19, %c0_20] : memref<16x32xbf16, #tpu.memory_space<vmem>>, vector<16x32xbf16>
      tpu.vector_store %arg8[%c0_19, %c0_20], %33 {strides = array<i32>} : memref<16x32xbf16, #tpu.memory_space<vmem>>, vector<16x32xbf16>,
    } else {
    }
    %c0 = arith.constant 0 : index
    %c0_1 = arith.constant 0 : index
    %3 = vector.load %arg8[%c0, %c0_1] : memref<16x32xbf16, #tpu.memory_space<vmem>>, vector<16x32xbf16>
    %c0_2 = arith.constant 0 : index
    %c0_3 = arith.constant 0 : index
    %4 = vector.load %arg5[%c0_2, %c0_3] : memref<32x60xbf16, #tpu.memory_space<vmem>>, vector<32x60xbf16>
    %cst = arith.constant dense<0.000000e+00> : vector<16x60xf32>
    %5 = tpu.matmul %3, %4, %cst {dimension_numbers = #tpu.dot_dimension_numbers<[1], [0], [0], [1], [0, 0, 1, 1], [], []>} : vector<16x32xbf16>, vector<32x60xbf16>, vector<16x60xf32> -> vector<16x60xf32>
    %c0_4 = arith.constant 0 : index
    %c0_5 = arith.constant 0 : index
    %6 = vector.load %arg6[%c0_4, %c0_5] : memref<1x60xf32, #tpu.memory_space<vmem>>, vector<1x60xf32>
    %7 = vector.broadcast %6 : vector<1x60xf32> to vector<16x60xf32>
    %8 = arith.addf %5, %7 : vector<16x60xf32>
    %c0_6 = arith.constant 0 : index
    %c0_7 = arith.constant 0 : index
    %9 = vector.load %arg7[%c0_6, %c0_7] : memref<16x60xf32, #tpu.memory_space<vmem>>, vector<16x60xf32>
    tpu.vector_store %arg7[%c0_6, %c0_7], %8 {strides = array<i32>} : memref<16x60xf32, #tpu.memory_space<vmem>>, vector<16x60xf32>,
    return
  }
  func.func @transform_0(%arg0: i32, %arg1: i32) -> (i32, i32) {
    %c0_i32 = arith.constant 0 : i32
    %c0_i32_0 = arith.constant 0 : i32
    return %arg0, %c0_i32 : i32, i32
  }
  func.func @transform_1(%arg0: i32, %arg1: i32) -> (i32, i32) {
    %c0_i32 = arith.constant 0 : i32
    %c0_i32_0 = arith.constant 0 : i32
    %c0_i32_1 = arith.constant 0 : i32
    return %c0_i32, %c0_i32_0 : i32, i32
  }
  func.func @transform_2(%arg0: i32, %arg1: i32) -> (i32, i32) {
    %c0_i32 = arith.constant 0 : i32
    %c0_i32_0 = arith.constant 0 : i32
    %c0_i32_1 = arith.constant 0 : i32
    return %c0_i32, %c0_i32_0 : i32, i32
  }
  func.func @transform_3(%arg0: i32, %arg1: i32) -> (i32, i32) {
    %c0_i32 = arith.constant 0 : i32
    %c0_i32_0 = arith.constant 0 : i32
    return %c0_i32, %arg1 : i32, i32
  }
  func.func @transform_4(%arg0: i32, %arg1: i32) -> (i32, i32) {
    %c0_i32 = arith.constant 0 : i32
    %c0_i32_0 = arith.constant 0 : i32
    return %c0_i32, %arg1 : i32, i32
  }
  func.func @transform_5(%arg0: i32, %arg1: i32) -> (i32, i32) {
    %c0_i32 = arith.constant 0 : i32
    return %arg0, %arg1 : i32, i32
  }
}

</mosaic_0001>

<bundles_post_ra>
// kernel: transformer_forward.16
= control target key start
LH: loop header
LB: loop body
LE: loop exit
PB: predicated region body
PF: predicated region fallthrough
CT: control target
= control target key end

     0   :  { %vm29_vm0 = vcmask 261120   ;;  %v176_v4 = vmov 32.0   ;;  %vm93_vm6 = vcmask 257024   ;;  %s243_s0 = inlined_call_operand.vmem [shape: f32[16,32], index: 0, kind: input, shape index: {}]   ;;  %s244_s1 = inlined_call_operand.vmem [shape: f32[1,32], index: 1, kind: input, shape index: {}]   ;;  %s245_s2 = inlined_call_operand.vmem [shape: f32[1,32], index: 2, kind: input, shape index: {}]   ;;  %s246_s4 = inlined_call_operand.vmem [shape: f32[1,32], index: 4, kind: input, shape index: {}]   ;;  %s247_s3 = inlined_call_operand.vmem [shape: bf16[32,32], index: 3, kind: input, shape index: {}]   ;;  %s248_s5 = inlined_call_operand.vmem [shape: bf16[16,32], index: 5, kind: output, shape index: {}]  }
   0x1   :  { %v25_v0 = vld [vmem:[%s243_s0] sm:$0xff]  ;;  %v26_v2 = vld [vmem:[%s243_s0 + $0x8] sm:$0xff]  ;;  %170 = vrcp.f32 %v176_v4 }
   0x2   :  { %v30_v1 = vsel %vm29_vm0, %v25_v0, 0.0  ;;  %v33_v3 = vsel %vm29_vm0, %v26_v2, 0.0  ;;  %v165_v24 = vld [vmem:[%s247_s3 + $0x8] sm:$0xff]  ;;  %v164_v27 = vld [vmem:[%s247_s3] sm:$0xff] }
   0x3   :  { %31 = vadd.xlane.f32.xlu0 %v30_v1  ;;  %133 = vmatpush.bf16.msra.mxu0 %v165_v24  ;;  %v167_v37 = vld [vmem:[%s244_s1] ss:$0 sm:$0xff] }
   0x4   :  { %v168_v40 = vld [vmem:[%s245_s2] ss:$0 sm:$0xff] }
   0x5   :  { %v169_v54 = vld [vmem:[%s246_s4] ss:$0 sm:$0xff] }
   0x7   :  { %v171_v5 = vpop.eup %170  ;;  %134 = vmatpush.bf16.msra.mxu0 %v164_v27 }
   0x8   :  { %v37_v6 = vmul.f32 32.0, %v171_v5  ;;  %vm41_vm1 = vweird.f32 %v171_v5 }
   0xa   :  { %v38_v7 = vsub.f32 1.0, %v37_v6 }
   0xb   :  { %34 = vadd.xlane.f32.xlu0 %v33_v3 }
   0xc   :  { %v39_v8 = vmul.f32 %v171_v5, %v38_v7 }
   0xe   :  { %v40_v9 = vadd.f32 %v171_v5, %v39_v8 }
  0x10   :  { %v42_v10 = vsel %vm41_vm1, %v171_v5, %v40_v9 }
  0x76   :  { %v32_v11 = vpop.xlane.xlu0 %31 }
  0x77   :  { %v43_v12 = vmul.f32 %v42_v10, %v32_v11 }
  0x79   :  { %v45_v13 = vsub.f32 %v25_v0, %v43_v12 }
  0x7b   :  { %v47_v14 = vmul.f32 %v45_v13, %v45_v13 }
  0x7d   :  { %v49_v15 = vsel %vm29_vm0, %v47_v14, 0.0 }
  0x7e   :  { %50 = vadd.xlane.f32.xlu1 %v49_v15  ;;  %v35_v16 = vpop.xlane.xlu0 %34 }
  0x7f   :  { %v44_v17 = vmul.f32 %v42_v10, %v35_v16 }
  0x81   :  { %v46_v18 = vsub.f32 %v26_v2, %v44_v17 }
  0x83   :  { %v48_v19 = vmul.f32 %v46_v18, %v46_v18 }
  0x85   :  { %v52_v20 = vsel %vm29_vm0, %v48_v19, 0.0 }
  0x86   :  { %53 = vadd.xlane.f32.xlu1 %v52_v20 }
  0xf1   :  { %v51_v21 = vpop.xlane.xlu1 %50 }
  0xf2   :  { %v55_v22 = vmul.f32 %v51_v21, %v42_v10 }
  0xf4   :  { %v57_v23 = vadd.f32 1e-06, %v55_v22 }
  0xf6   :  { %172 = vrsqrt.f32 %v57_v23  ;;  %vm65_vm3 = vweird.f32 %v57_v23 }
  0xf9   :  { %v54_v25 = vpop.xlane.xlu1 %53 }
  0xfa   :  { %v56_v26 = vmul.f32 %v54_v25, %v42_v10 }
  0xfc   :  { %v173_v28 = vpop.eup %172  ;;  %v58_v29 = vadd.f32 1e-06, %v56_v26 }
  0xfd   :  { %v60_v30 = vmul.f32 %v173_v28, %v57_v23  ;;  %vm66_vm2 = vweird.f32 %v173_v28 }
  0xfe   :  { %174 = vrsqrt.f32 %v58_v29  ;;  %vm67_vm4 = vmor %vm65_vm3, %vm66_vm2  ;;  %vm75_vm7 = vweird.f32 %v58_v29 }
  0xff   :  { %v61_v31 = vmul.f32 %v173_v28, %v60_v30 }
 0x101   :  { %v62_v32 = vmul.f32 0.5, %v61_v31 }
 0x103   :  { %v63_v33 = vsub.f32 1.5, %v62_v32 }
 0x104   :  { %v175_v34 = vpop.eup %174 }
 0x105   :  { %v64_v35 = vmul.f32 %v173_v28, %v63_v33  ;;  %v70_v36 = vmul.f32 %v175_v34, %v58_v29  ;;  %vm76_vm5 = vweird.f32 %v175_v34 }
 0x106   :  { %vm77_vm8 = vmor %vm75_vm7, %vm76_vm5 }
 0x107   :  { %v68_v38 = vsel %vm67_vm4, %v173_v28, %v64_v35  ;;  %v71_v39 = vmul.f32 %v175_v34, %v70_v36 }
 0x108   :  { %v79_v41 = vmul.f32 %v68_v38, %v45_v13 }
 0x109   :  { %v72_v42 = vmul.f32 0.5, %v71_v39 }
 0x10a   :  { %v84_v43 = vmul.f32 %v167_v37, %v79_v41 }
 0x10b   :  { %v73_v44 = vsub.f32 1.5, %v72_v42 }
 0x10c   :  { %v89_v45 = vadd.f32 %v168_v40, %v84_v43 }
 0x10d   :  { %v74_v46 = vmul.f32 %v175_v34, %v73_v44 }
 0x10e   :  { %v91_v47 = vpack.c.bf16 %v89_v45, %v89_v45 }
 0x10f   :  { %v78_v48 = vsel %vm77_vm8, %v175_v34, %v74_v46 }
 0x110   :  { %94 = vst.msk [vmem:[#allocation2] sm:$0xf] %vm93_vm6, %v91_v47  ;;  %v80_v49 = vmul.f32 %v78_v48, %v46_v18 }
 0x112   :  { %v85_v50 = vmul.f32 %v167_v37, %v80_v49 }
 0x114   :  { %v90_v51 = vadd.f32 %v168_v40, %v85_v50 }
 0x116   :  { %v92_v52 = vpack.c.bf16 %v90_v51, %v90_v51 }
 0x118   :  { %95 = vst.msk [vmem:[#allocation2 + $0x4] sm:$0xf] %vm93_vm6, %v92_v52 }
 0x11f   :  { %v163_v53 = vld [vmem:[#allocation2] sm:$0xff] }
 0x120   :  { %162 = vmatmul.msk.bf16.vlgmr.msra.gmra.mxu0 %vm29_vm0, %v163_v53 }
 0x19d   :  { %v136_v55 = vpop.f32.mrf.mxu0 }
 0x19e   :  { %v137_v56 = vadd.f32 %v169_v54, %v136_v55 }
 0x1a0   :  { %v141_v57 = vpack.c.bf16 %v137_v56, %v137_v56 }
 0x1a2   :  { %144 = vst.msk [vmem:[%s248_s5] sm:$0xf] %vm93_vm6, %v141_v57 }
 0x1a5   :  { %v138_v58 = vpop.f32.mrf.mxu0 }
 0x1a6   :  { %v139_v59 = vadd.f32 %v169_v54, %v138_v58 }
 0x1a8   :  { %v142_v60 = vpack.c.bf16 %v139_v59, %v139_v59 }
 0x1aa   :  { %145 = vst.msk [vmem:[%s248_s5 + $0x4] sm:$0xf] %vm93_vm6, %v142_v60 }

// kernel: transformer_forward.17
= control target key start
LH: loop header
LB: loop body
LE: loop exit
PB: predicated region body
PF: predicated region fallthrough
CT: control target
= control target key end

     0   :  { %vm29_vm0 = vcmask 261120   ;;  %v176_v4 = vmov 32.0   ;;  %vm93_vm6 = vcmask 257024   ;;  %vm143_vm9 = vcmask 519168   ;;  %s239_s0 = inlined_call_operand.vmem [shape: f32[16,32], index: 0, kind: input, shape index: {}]   ;;  %s240_s1 = inlined_call_operand.vmem [shape: f32[1,32], index: 1, kind: input, shape index: {}]   ;;  %s241_s2 = inlined_call_operand.vmem [shape: f32[1,32], index: 2, kind: input, shape index: {}]   ;;  %s242_s4 = inlined_call_operand.vmem [shape: f32[1,64], index: 4, kind: input, shape index: {}]   ;;  %s243_s3 = inlined_call_operand.vmem [shape: bf16[32,64], index: 3, kind: input, shape index: {}]   ;;  %s244_s5 = inlined_call_operand.vmem [shape: bf16[16,64], index: 5, kind: output, shape index: {}]  }
   0x1   :  { %v25_v0 = vld [vmem:[%s239_s0] sm:$0xff]  ;;  %v26_v2 = vld [vmem:[%s239_s0 + $0x8] sm:$0xff]  ;;  %170 = vrcp.f32 %v176_v4 }
   0x2   :  { %v30_v1 = vsel %vm29_vm0, %v25_v0, 0.0  ;;  %v33_v3 = vsel %vm29_vm0, %v26_v2, 0.0  ;;  %v165_v24 = vld [vmem:[%s243_s3 + $0x8] sm:$0xff]  ;;  %v164_v27 = vld [vmem:[%s243_s3] sm:$0xff] }
   0x3   :  { %31 = vadd.xlane.f32.xlu0 %v30_v1  ;;  %133 = vmatpush.bf16.msra.mxu0 %v165_v24  ;;  %v167_v37 = vld [vmem:[%s240_s1] ss:$0 sm:$0xff] }
   0x4   :  { %v168_v40 = vld [vmem:[%s241_s2] ss:$0 sm:$0xff] }
   0x5   :  { %v169_v54 = vld [vmem:[%s242_s4] ss:$0 sm:$0xff] }
   0x7   :  { %v171_v5 = vpop.eup %170  ;;  %134 = vmatpush.bf16.msra.mxu0 %v164_v27 }
   0x8   :  { %v37_v6 = vmul.f32 32.0, %v171_v5  ;;  %vm41_vm1 = vweird.f32 %v171_v5 }
   0xa   :  { %v38_v7 = vsub.f32 1.0, %v37_v6 }
   0xb   :  { %34 = vadd.xlane.f32.xlu0 %v33_v3 }
   0xc   :  { %v39_v8 = vmul.f32 %v171_v5, %v38_v7 }
   0xe   :  { %v40_v9 = vadd.f32 %v171_v5, %v39_v8 }
  0x10   :  { %v42_v10 = vsel %vm41_vm1, %v171_v5, %v40_v9 }
  0x76   :  { %v32_v11 = vpop.xlane.xlu0 %31 }
  0x77   :  { %v43_v12 = vmul.f32 %v42_v10, %v32_v11 }
  0x79   :  { %v45_v13 = vsub.f32 %v25_v0, %v43_v12 }
  0x7b   :  { %v47_v14 = vmul.f32 %v45_v13, %v45_v13 }
  0x7d   :  { %v49_v15 = vsel %vm29_vm0, %v47_v14, 0.0 }
  0x7e   :  { %50 = vadd.xlane.f32.xlu1 %v49_v15  ;;  %v35_v16 = vpop.xlane.xlu0 %34 }
  0x7f   :  { %v44_v17 = vmul.f32 %v42_v10, %v35_v16 }
  0x81   :  { %v46_v18 = vsub.f32 %v26_v2, %v44_v17 }
  0x83   :  { %v48_v19 = vmul.f32 %v46_v18, %v46_v18 }
  0x85   :  { %v52_v20 = vsel %vm29_vm0, %v48_v19, 0.0 }
  0x86   :  { %53 = vadd.xlane.f32.xlu1 %v52_v20 }
  0xf1   :  { %v51_v21 = vpop.xlane.xlu1 %50 }
  0xf2   :  { %v55_v22 = vmul.f32 %v51_v21, %v42_v10 }
  0xf4   :  { %v57_v23 = vadd.f32 1e-06, %v55_v22 }
  0xf6   :  { %172 = vrsqrt.f32 %v57_v23  ;;  %vm65_vm3 = vweird.f32 %v57_v23 }
  0xf9   :  { %v54_v25 = vpop.xlane.xlu1 %53 }
  0xfa   :  { %v56_v26 = vmul.f32 %v54_v25, %v42_v10 }
  0xfc   :  { %v173_v28 = vpop.eup %172  ;;  %v58_v29 = vadd.f32 1e-06, %v56_v26 }
  0xfd   :  { %v60_v30 = vmul.f32 %v173_v28, %v57_v23  ;;  %vm66_vm2 = vweird.f32 %v173_v28 }
  0xfe   :  { %174 = vrsqrt.f32 %v58_v29  ;;  %vm67_vm4 = vmor %vm65_vm3, %vm66_vm2  ;;  %vm75_vm7 = vweird.f32 %v58_v29 }
  0xff   :  { %v61_v31 = vmul.f32 %v173_v28, %v60_v30 }
 0x101   :  { %v62_v32 = vmul.f32 0.5, %v61_v31 }
 0x103   :  { %v63_v33 = vsub.f32 1.5, %v62_v32 }
 0x104   :  { %v175_v34 = vpop.eup %174 }
 0x105   :  { %v64_v35 = vmul.f32 %v173_v28, %v63_v33  ;;  %v70_v36 = vmul.f32 %v175_v34, %v58_v29  ;;  %vm76_vm5 = vweird.f32 %v175_v34 }
 0x106   :  { %vm77_vm8 = vmor %vm75_vm7, %vm76_vm5 }
 0x107   :  { %v68_v38 = vsel %vm67_vm4, %v173_v28, %v64_v35  ;;  %v71_v39 = vmul.f32 %v175_v34, %v70_v36 }
 0x108   :  { %v79_v41 = vmul.f32 %v68_v38, %v45_v13 }
 0x109   :  { %v72_v42 = vmul.f32 0.5, %v71_v39 }
 0x10a   :  { %v84_v43 = vmul.f32 %v167_v37, %v79_v41 }
 0x10b   :  { %v73_v44 = vsub.f32 1.5, %v72_v42 }
 0x10c   :  { %v89_v45 = vadd.f32 %v168_v40, %v84_v43 }
 0x10d   :  { %v74_v46 = vmul.f32 %v175_v34, %v73_v44 }
 0x10e   :  { %v91_v47 = vpack.c.bf16 %v89_v45, %v89_v45 }
 0x10f   :  { %v78_v48 = vsel %vm77_vm8, %v175_v34, %v74_v46 }
 0x110   :  { %94 = vst.msk [vmem:[#allocation2] sm:$0xf] %vm93_vm6, %v91_v47  ;;  %v80_v49 = vmul.f32 %v78_v48, %v46_v18 }
 0x112   :  { %v85_v50 = vmul.f32 %v167_v37, %v80_v49 }
 0x114   :  { %v90_v51 = vadd.f32 %v168_v40, %v85_v50 }
 0x116   :  { %v92_v52 = vpack.c.bf16 %v90_v51, %v90_v51 }
 0x118   :  { %95 = vst.msk [vmem:[#allocation2 + $0x4] sm:$0xf] %vm93_vm6, %v92_v52 }
 0x11f   :  { %v163_v53 = vld [vmem:[#allocation2] sm:$0xff] }
 0x120   :  { %162 = vmatmul.msk.bf16.vlgmr.msra.gmra.mxu0 %vm29_vm0, %v163_v53 }
 0x19d   :  { %v136_v55 = vpop.f32.mrf.mxu0 }
 0x19e   :  { %v137_v56 = vadd.f32 %v169_v54, %v136_v55 }
 0x1a0   :  { %v141_v57 = vpack.c.bf16 %v137_v56, %v137_v56 }
 0x1a2   :  { %144 = vst.msk [vmem:[%s244_s5] sm:$0xf] %vm143_vm9, %v141_v57 }
 0x1a5   :  { %v138_v58 = vpop.f32.mrf.mxu0 }
 0x1a6   :  { %v139_v59 = vadd.f32 %v169_v54, %v138_v58 }
 0x1a8   :  { %v142_v60 = vpack.c.bf16 %v139_v59, %v139_v59 }
 0x1aa   :  { %145 = vst.msk [vmem:[%s244_s5 + $0x4] sm:$0xf] %vm143_vm9, %v142_v60 }

// kernel: transformer_forward.19
= control target key start
LH: loop header
LB: loop body
LE: loop exit
PB: predicated region body
PF: predicated region fallthrough
CT: control target
= control target key end

     0   :  { %vm35_vm0 = vcmask 261120   ;;  %v278_v4 = vmov 32.0   ;;  %vm99_vm6 = vcmask 257024   ;;  %v279_v58 = vmov 0.0   ;;  %s383_s0 = inlined_call_operand.vmem [shape: f32[16,32], index: 0, kind: input, shape index: {}]   ;;  %s384_s1 = inlined_call_operand.vmem [shape: f32[1,32], index: 1, kind: input, shape index: {}]   ;;  %s385_s2 = inlined_call_operand.vmem [shape: f32[1,32], index: 2, kind: input, shape index: {}]   ;;  %s386_s4 = inlined_call_operand.vmem [shape: f32[1,64], index: 4, kind: input, shape index: {}]   ;;  %s387_s3 = inlined_call_operand.vmem [shape: bf16[32,64], index: 3, kind: input, shape index: {}]   ;;  %s388_s6 = inlined_call_operand.vmem [shape: f32[1,32], index: 6, kind: input, shape index: {}]   ;;  %s389_s5 = inlined_call_operand.vmem [shape: bf16[64,32], index: 5, kind: input, shape index: {}]   ;;  %s390_s7 = inlined_call_operand.vmem [shape: f32[16,32], index: 7, kind: output, shape index: {}]  }
   0x1   :  { %v323_v0 = vld [vmem:[%s383_s0] sm:$0xff]  ;;  %v330_v2 = vld [vmem:[%s383_s0 + $0x8] sm:$0xff]  ;;  %272 = vrcp.f32 %v278_v4  ;;  %v265_v54 = vld [vmem:[%s389_s5 + $0x18] sm:$0xff]  ;;  %102 = vst.msk [vmem:[#allocation3] sm:$0xff] %vm35_vm0, %v279_v58  ;;  %vm186_vm9 = vcmask 523264  }
   0x2   :  { %v36_v1 = vsel %vm35_vm0, %v323_v0, 0.0  ;;  %v39_v3 = vsel %vm35_vm0, %v330_v2, 0.0  ;;  %v261_v24 = vld [vmem:[%s387_s3 + $0x8] sm:$0xff]  ;;  %v260_v27 = vld [vmem:[%s387_s3] sm:$0xff]  ;;  %194 = vmatpush.bf16.msra.mxu1 %v265_v54  ;;  %v264_v55 = vld [vmem:[%s389_s5 + $0x10] sm:$0xff]  ;;  %103 = vst.msk [vmem:[#allocation3 + $0x8] sm:$0xff] %vm35_vm0, %v279_v58 }
   0x3   :  { %37 = vadd.xlane.f32.xlu0 %v36_v1  ;;  %141 = vmatpush.bf16.msra.mxu0 %v261_v24  ;;  %v268_v37 = vld [vmem:[%s384_s1] ss:$0 sm:$0xff]  ;;  %v263_v56 = vld [vmem:[%s389_s5 + $0x8] sm:$0xff] }
   0x4   :  { %v269_v40 = vld [vmem:[%s385_s2] ss:$0 sm:$0xff] }
   0x5   :  { %v262_v57 = vld [vmem:[%s389_s5] sm:$0xff] }
   0x6   :  { %195 = vmatpush.bf16.msra.mxu1 %v264_v55  ;;  %v270_v60 = vld [vmem:[%s386_s4] ss:$0 sm:$0xff] }
   0x7   :  { %v273_v5 = vpop.eup %272  ;;  %142 = vmatpush.bf16.msra.mxu0 %v260_v27 }
   0x8   :  { %v43_v6 = vmul.f32 32.0, %v273_v5  ;;  %vm47_vm1 = vweird.f32 %v273_v5 }
   0xa   :  { %v44_v7 = vsub.f32 1.0, %v43_v6  ;;  %196 = vmatpush.bf16.msra.mxu1 %v263_v56 }
   0xb   :  { %40 = vadd.xlane.f32.xlu0 %v39_v3 }
   0xc   :  { %v45_v8 = vmul.f32 %v273_v5, %v44_v7 }
   0xe   :  { %v46_v9 = vadd.f32 %v273_v5, %v45_v8  ;;  %197 = vmatpush.bf16.msra.mxu1 %v262_v57  ;;  %v152_v8 = vld [vmem:[#allocation3 + $0x8] sm:$0xff] }
  0x10   :  { %v48_v10 = vsel %vm47_vm1, %v273_v5, %v46_v9  ;;  %v151_v5 = vld [vmem:[#allocation3] sm:$0xff] }
  0x76   :  { %v38_v11 = vpop.xlane.xlu0 %37 }
  0x77   :  { %v49_v12 = vmul.f32 %v48_v10, %v38_v11 }
  0x79   :  { %v51_v13 = vsub.f32 %v323_v0, %v49_v12 }
  0x7b   :  { %v53_v14 = vmul.f32 %v51_v13, %v51_v13 }
  0x7d   :  { %v55_v15 = vsel %vm35_vm0, %v53_v14, 0.0 }
  0x7e   :  { %56 = vadd.xlane.f32.xlu1 %v55_v15  ;;  %v41_v16 = vpop.xlane.xlu0 %40 }
  0x7f   :  { %v50_v17 = vmul.f32 %v48_v10, %v41_v16 }
  0x81   :  { %v52_v18 = vsub.f32 %v330_v2, %v50_v17 }
  0x83   :  { %v54_v19 = vmul.f32 %v52_v18, %v52_v18 }
  0x85   :  { %v58_v20 = vsel %vm35_vm0, %v54_v19, 0.0 }
  0x86   :  { %59 = vadd.xlane.f32.xlu1 %v58_v20 }
  0xf1   :  { %v57_v21 = vpop.xlane.xlu1 %56 }
  0xf2   :  { %v61_v22 = vmul.f32 %v57_v21, %v48_v10 }
  0xf4   :  { %v63_v23 = vadd.f32 1e-06, %v61_v22 }
  0xf6   :  { %274 = vrsqrt.f32 %v63_v23  ;;  %vm71_vm3 = vweird.f32 %v63_v23 }
  0xf9   :  { %v60_v25 = vpop.xlane.xlu1 %59 }
  0xfa   :  { %v62_v26 = vmul.f32 %v60_v25, %v48_v10  ;;  %v271_v10 = vld [vmem:[%s388_s6] ss:$0 sm:$0xff] }
  0xfc   :  { %v275_v28 = vpop.eup %274  ;;  %v64_v29 = vadd.f32 1e-06, %v62_v26 }
  0xfd   :  { %v66_v30 = vmul.f32 %v275_v28, %v63_v23  ;;  %vm72_vm2 = vweird.f32 %v275_v28 }
  0xfe   :  { %276 = vrsqrt.f32 %v64_v29  ;;  %vm73_vm4 = vmor %vm71_vm3, %vm72_vm2  ;;  %vm81_vm7 = vweird.f32 %v64_v29 }
  0xff   :  { %v67_v31 = vmul.f32 %v275_v28, %v66_v30 }
 0x101   :  { %v68_v32 = vmul.f32 0.5, %v67_v31 }
 0x103   :  { %v69_v33 = vsub.f32 1.5, %v68_v32 }
 0x104   :  { %v277_v34 = vpop.eup %276 }
 0x105   :  { %v70_v35 = vmul.f32 %v275_v28, %v69_v33  ;;  %v76_v36 = vmul.f32 %v277_v34, %v64_v29  ;;  %vm82_vm5 = vweird.f32 %v277_v34 }
 0x106   :  { %vm83_vm8 = vmor %vm81_vm7, %vm82_vm5 }
 0x107   :  { %v74_v38 = vsel %vm73_vm4, %v275_v28, %v70_v35  ;;  %v77_v39 = vmul.f32 %v277_v34, %v76_v36 }
 0x108   :  { %v85_v41 = vmul.f32 %v74_v38, %v51_v13 }
 0x109   :  { %v78_v42 = vmul.f32 0.5, %v77_v39 }
 0x10a   :  { %v90_v43 = vmul.f32 %v268_v37, %v85_v41 }
 0x10b   :  { %v79_v44 = vsub.f32 1.5, %v78_v42 }
 0x10c   :  { %v95_v45 = vadd.f32 %v269_v40, %v90_v43 }
 0x10d   :  { %v80_v46 = vmul.f32 %v277_v34, %v79_v44 }
 0x10e   :  { %v97_v47 = vpack.c.bf16 %v95_v45, %v95_v45 }
 0x10f   :  { %v84_v48 = vsel %vm83_vm8, %v277_v34, %v80_v46 }
 0x110   :  { %100 = vst.msk [vmem:[#allocation2] sm:$0xf] %vm99_vm6, %v97_v47  ;;  %v86_v49 = vmul.f32 %v84_v48, %v52_v18 }
 0x112   :  { %v91_v50 = vmul.f32 %v268_v37, %v86_v49 }
 0x114   :  { %v96_v51 = vadd.f32 %v269_v40, %v91_v50 }
 0x116   :  { %v98_v52 = vpack.c.bf16 %v96_v51, %v96_v51 }
 0x118   :  { %101 = vst.msk [vmem:[#allocation2 + $0x4] sm:$0xf] %vm99_vm6, %v98_v52 }
 0x11f   :  { %v259_v53 = vld [vmem:[#allocation2] sm:$0xff] }
 0x120   :  { %241 = vmatmul.msk.bf16.vlgmr.msra.gmra.mxu0 %vm35_vm0, %v259_v53 }
 0x19d   :  { %v144_v59 = vpop.f32.mrf.mxu0 }
 0x19e   :  { %v145_v61 = vadd.f32 %v270_v60, %v144_v59 }
 0x1a0   :  { %v149_v1 = vmax.f32 %v145_v61, 0.0 }
 0x1a5   :  { %v146_v62 = vpop.f32.mrf.mxu0 }
 0x1a6   :  { %v147_v63 = vadd.f32 %v270_v60, %v146_v62 }
 0x1a8   :  { %v150_v3 = vmax.f32 %v147_v63, 0.0 }
 0x1aa   :  { %v153_v4 = vpack.c.bf16 %v150_v3, %v149_v1 }
 0x1ac   :  { %258 = vmatmul.msk.bf16.vlgmr.msra.gmra.mxu1 %vm186_vm9, %v153_v4 }
 0x229   :  { %v199_v6 = vpop.f32.mrf.mxu1 }
 0x22a   :  { %v204_v7 = vadd.f32 %v199_v6, %v151_v5 }
 0x22c   :  { %206 = vst.msk [vmem:[#allocation3] sm:$0xff] %vm35_vm0, %v204_v7 }
 0x231   :  { %v201_v9 = vpop.f32.mrf.mxu1 }
 0x232   :  { %v205_v11 = vadd.f32 %v201_v9, %v152_v8 }
 0x233   :  { %v213_v12 = vld [vmem:[#allocation3] sm:$0xff] }
 0x234   :  { %v215_v13 = vadd.f32 %v213_v12, %v323_v0  ;;  %207 = vst.msk [vmem:[#allocation3 + $0x8] sm:$0xff] %vm35_vm0, %v205_v11 }
 0x236   :  { %v221_v14 = vadd.f32 %v271_v10, %v215_v13 }
 0x238   :  { %223 = vst.msk [vmem:[%s390_s7] sm:$0xff] %vm35_vm0, %v221_v14 }
 0x23b   :  { %v214_v15 = vld [vmem:[#allocation3 + $0x8] sm:$0xff] }
 0x23c   :  { %v216_v16 = vadd.f32 %v214_v15, %v330_v2 }
 0x23e   :  { %v222_v17 = vadd.f32 %v271_v10, %v216_v16 }
 0x240   :  { %224 = vst.msk [vmem:[%s390_s7 + $0x8] sm:$0xff] %vm35_vm0, %v222_v17 }

// kernel: transformer_forward.18
= control target key start
LH: loop header
LB: loop body
LE: loop exit
PB: predicated region body
PF: predicated region fallthrough
CT: control target
= control target key end

     0   :  { %s925_s21 = smov 0   ;;  %s927_s22 = smov 0   ;;  %s1040_s0 = inlined_call_operand.vmem [shape: bf16[2,8,32], index: 0, kind: input, shape index: {}]   ;;  %s1041_s1 = inlined_call_operand.vmem [shape: bf16[2,8,64], index: 1, kind: input, shape index: {}]   ;;  %s1042_s2 = inlined_call_operand.vmem [shape: s32[2,1,8], index: 2, kind: input, shape index: {}]   ;;  %s1043_s3 = inlined_call_operand.vmem [shape: f32[2,8,32], index: 3, kind: input, shape index: {}]   ;;  %s1044_s4 = inlined_call_operand.vmem [shape: bf16[32,32], index: 4, kind: input, shape index: {}]   ;;  %s1045_s5 = inlined_call_operand.vmem [shape: f32[1,32], index: 5, kind: input, shape index: {}]   ;;  %s1046_s6 = inlined_call_operand.vmem [shape: f32[2,8,32], index: 6, kind: output, shape index: {}]  }
   0x1   :  { %s929_s23 = smov 0  }
   0x2 LB: > { %s28_s24 = sadd.s32 1, %s876_s22  ;;  %p790_p0 = scmp.ge.s32.totalorder %s880_s23, 1  ;;  %s880_s23 = sphi %s929_s23, %s16_s23   ;;  %s876_s22 = sphi %s927_s22, %s1050_s22   ;;  %s872_s21 = sphi %s925_s21, %s1049_s21  }
   0x3   : > { %p30_p1 = scmp.ge.s32.totalorder %s28_s24, 2  ;;  %p261_p2 = scmp.lt.s32.totalorder %s880_s23, 3 }
   0x5   : > { %s1052_s24 = smov (%p30_p1, %s28_s24), 0  ;;  %p262_p3 = pnand %p790_p0, %p261_p2 }
   0x6   : > { %p309_p4 = scmp.lt.s32.totalorder (!%p262_p3), %s872_s21, 1  ;;  %s882_s8 = smov (!%p262_p3), 120  }
   0x7   : > { %265 = sbr.rel (%p262_p3) target bundleno = 1225 (0x4c9), region = 44  ;;  %s883_s9 = smov (!%p262_p3), 96  }
   0x8   : > { %s885_s13 = smov (!%p262_p3), 104   ;;  %s886_s14 = smov (!%p262_p3), 88  }
   0x9   : > { %s887_s15 = smov (!%p262_p3), 112   ;;  %s888_s20 = smov (!%p262_p3), 80  }
   0xc   : > { %s1054_s21 = smov (!%p309_p4, %s872_s21), 1  ;;  %vm346_vm0 = vcmask 64512   ;;  %v884_v11 = vmov 0   ;;  %vm388_vm3 = vcmask 1043456   ;;  %v406_v47 = vld [vmem:[%s1044_s4] sm:$0xf] }
   0xd   : > { %s791_s25 = sshll.u32 %s1054_s21, 2  ;;  %s322_s12 = scalar_lea.vmem %s1042_s2, %s1054_s21  ;;  %v493_v48 = vsel %vm388_vm3, %v406_v47, 0  ;;  %v469_v63 = vld [vmem:[%s1044_s4 + $0x4] sm:$0xf]  ;;  %vm674_vm4 = vcmask 261120  }
   0xe   : > { %s319_s28 = scalar_lea.vmem %s1041_s1, %s791_s25  ;;  %s315_s7 = scalar_lea.vmem %s1040_s0, %s791_s25  ;;  %v341_v9 = vld [vmem:[%s322_s12] sm:$0x1] }
   0xf   : > { %v339_v0 = vld [vmem:[%s319_s28] sm:$0xf]  ;;  %vm342_vm1 = vcmp.gt.s32.totalorder %v341_v9, 0  ;;  %s889_s25 = smov 72   ;;  %s793_s30 = sshll.u32 %s1054_s21, 3 }
  0x10   : > { %v351_v1 = vsel %vm346_vm0, %v339_v0, 0  ;;  %v381_v2 = vunpack.c.l.b16 %v339_v0  ;;  %v338_v3 = vld [vmem:[%s315_s7] sm:$0xf]  ;;  %v343_v12 = vsel %vm342_vm1, 1, %v884_v11  ;;  %v474_v0 = vsel %vm388_vm3, %v469_v63, 0 }
  0x11   : > { %360 = vmatpush.bf16.xpose.msra.mxu0 %v351_v1  ;;  %v408_v5 = vunpack.c.l.b16 %v338_v3  ;;  %v344_v13 = vperm.slane %v343_v12, 0 }
  0x12   : > { %v953_v4 = vpack.c.b16 %v381_v2, %v381_v2 }
  0x13   : > { %v409_v6 = vpack.c.b16 %v408_v5, %v408_v5  ;;  %vm964_vm2 = vcmp.eq.s32.totalorder %v344_v13, 1 }
  0x14   : > { %412 = vrot.lane.b32.xlu0 %v953_v4, %s882_s8  ;;  %383 = vrot.lane.b32.xlu2 %v953_v4, %s883_s9  ;;  %s329_s9 = scalar_lea.vmem %s1043_s3, %s793_s30 }
  0x18   : > { %795 = vmatmul.msk.bf16.vlgmr.msra.gmra.mxu0 %vm346_vm0, %v338_v3 }
  0x1c   : > { %410 = vrot.lane.b32.xlu0 %v409_v6, %s882_s8 }
  0x6e   : > { %v384_v30 = vpop.permute.xlu2 %383 }
  0x6f   : > { %v390_v31 = vsel %vm388_vm3, %v384_v30, 0 }
  0x70   : > { %399 = vmatpush.bf16.msra.mxu1 %v390_v31  ;;  %v567_v31 = vld [vmem:[%s1044_s4 + $0x8] sm:$0xf] }
  0x74   : > { %483 = vmatpush.bf16.msrb.mxu1 %v474_v0 }
  0x86   : > { %v413_v7 = vpop.permute.xlu0 %412 }
  0x87   : > { %v418_v8 = vsel %vm346_vm0, %v413_v7, 0 }
  0x88   : > { %427 = vmatpush.bf16.xpose.msra.mxu2 %v418_v8 }
  0x8e   : > { %v411_v10 = vpop.permute.xlu0 %410 }
  0x8f   : > { %797 = vmatmul.msk.bf16.vlgmr.msra.gmra.mxu2 %vm346_vm0, %v411_v10 }
  0x95   : > { %v362_v14 = vpop.f32.mrf.mxu0 }
  0x96   : > { %v366_v16 = vmul.f32 0.35355338, %v362_v14 }
  0x98   : > { %v367_v17 = vsel %vm964_vm2, -1e+09, %v366_v16 }
  0x99   : > { %v368_v18 = vsel %vm346_vm0, %v367_v17, -inf }
  0x9a   : > { %369 = vmax.xlane.f32.xlu1 %v368_v18 }
  0x9d   : > { %v364_v19 = vpop.f32.mrf.mxu0 }
 0x10d   : > { %v370_v20 = vpop.xlane.xlu1 %369 }
 0x10e   : > { %v371_v21 = vsub.f32 %v367_v17, %v370_v20 }
 0x110   : > { %v372_v22 = vmul.f32 1.442695, %v371_v21 }
 0x112   : > { %842 = vpow2.f32 %v372_v22  ;;  %v429_v23 = vpop.f32.mrf.mxu2 }
 0x113   : > { %v433_v24 = vmul.f32 0.35355338, %v429_v23 }
 0x115   : > { %v434_v25 = vsel %vm964_vm2, -1e+09, %v433_v24 }
 0x116   : > { %v435_v26 = vsel %vm346_vm0, %v434_v25, -inf }
 0x117   : > { %436 = vmax.xlane.f32.xlu2 %v435_v26 }
 0x118   : > { %v843_v27 = vpop.eup %842 }
 0x119   : > { %v374_v28 = vsel %vm346_vm0, %v843_v27, 0.0 }
 0x11a   : > { %v431_v29 = vpop.f32.mrf.mxu2  ;;  %375 = vadd.xlane.f32.xlu1 %v374_v28 }
 0x12f   : > { %588 = vrot.lane.b32.xlu2 %v409_v6, %s885_s13 }
 0x133   : > { %447 = vrot.lane.b32.xlu1 %v953_v4, %s886_s14  ;;  %s336_s14 = scalar_lea.vmem %s1046_s6, %s793_s30 }
 0x13b   : > { %590 = vrot.lane.b32.xlu1 %v953_v4, %s885_s13 }
 0x143   : > { %510 = vrot.lane.b32.xlu1 %v953_v4, %s887_s15 }
 0x14b   : > { %508 = vrot.lane.b32.xlu1 %v409_v6, %s887_s15 }
 0x18a   : > { %v437_v32 = vpop.xlane.xlu2 %436 }
 0x18b   : > { %v438_v33 = vsub.f32 %v434_v25, %v437_v32  ;;  %v572_v32 = vsel %vm388_vm3, %v567_v31, 0 }
 0x18d   : > { %v439_v34 = vmul.f32 1.442695, %v438_v33  ;;  %v376_v35 = vpop.xlane.xlu1 %375 }
 0x18e   : > { %844 = vrcp.f32 %v376_v35 }
 0x18f   : > { %846 = vpow2.f32 %v439_v34  ;;  %v647_v34 = vld [vmem:[%s1044_s4 + $0xc] sm:$0xf] }
 0x190   : > { %v652_v35 = vsel %vm388_vm3, %v647_v34, 0 }
 0x192   : > { %v589_v57 = vpop.permute.xlu2 %588 }
 0x194   : > { %v845_v36 = vpop.eup %844 }
 0x195   : > { %v847_v37 = vpop.eup %846  ;;  %v378_v38 = vmul.f32 %v845_v36, %v843_v27 }
 0x196   : > { %v441_v39 = vsel %vm346_vm0, %v847_v37, 0.0 }
 0x197   : > { %442 = vadd.xlane.f32.xlu0 %v441_v39  ;;  %v379_v40 = vpack.c.bf16 %v378_v38, %v378_v38 }
 0x199   : > { %796 = vmatmul.msk.bf16.vlgmr.msra.gmra.mxu1 %vm346_vm0, %v379_v40 }
 0x19a   : > { %581 = vmatpush.bf16.msra.mxu1 %v572_v32 }
 0x1a5   : > { %v448_v41 = vpop.permute.xlu1 %447 }
 0x1a6   : > { %v453_v42 = vsel %vm388_vm3, %v448_v41, 0 }
 0x1a7   : > { %462 = vmatpush.bf16.msra.mxu3 %v453_v42 }
 0x1ab   : > { %502 = vmatpush.bf16.msrb.mxu3 %v493_v48 }
 0x1ad   : > { %v591_v43 = vpop.permute.xlu1 %590 }
 0x1ae   : > { %v596_v52 = vsel %vm346_vm0, %v591_v43, 0 }
 0x1b5   : > { %v511_v44 = vpop.permute.xlu1 %510 }
 0x1b6   : > { %v516_v45 = vsel %vm346_vm0, %v511_v44, 0 }
 0x1b7   : > { %525 = vmatpush.bf16.xpose.msrb.mxu0 %v516_v45 }
 0x1bd   : > { %v509_v46 = vpop.permute.xlu1 %508 }
 0x1be   : > { %801 = vmatmul.msk.bf16.vlgmr.msrb.gmra.mxu0 %vm346_vm0, %v509_v46 }
 0x20a   : > { %v443_v49 = vpop.xlane.xlu0 %442 }
 0x20b   : > { %848 = vrcp.f32 %v443_v49  ;;  %v841_v49 = vld [vmem:[%s1045_s5] ss:$0 sm:$0xff] }
 0x211   : > { %v849_v50 = vpop.eup %848 }
 0x212   : > { %v445_v51 = vmul.f32 %v849_v50, %v847_v37 }
 0x214   : > { %v446_v53 = vpack.c.bf16 %v445_v51, %v445_v51 }
 0x216   : > { %v401_v54 = vpop.f32.mrf.mxu1  ;;  %798 = vmatmul.msk.bf16.vlgmr.msra.gmra.mxu3 %vm346_vm0, %v446_v53 }
 0x217   : > { %605 = vmatpush.bf16.xpose.msra.mxu3 %v596_v52  ;;  %v405_v56 = vpack.c.bf16 %v401_v54, %v401_v54  ;;  %v340_v52 = vld [vmem:[%s329_s9] sm:$0xff] }
 0x21e   : > { %v403_v55 = vpop.f32.mrf.mxu1 }
 0x226   : > { %800 = vmatmul.msk.bf16.vlgmr.msrb.gmra.mxu3 %vm346_vm0, %v405_v56 }
 0x236   : > { %804 = vmatmul.msk.bf16.vlgmr.msra.gmra.mxu3 %vm346_vm0, %v589_v57 }
 0x23b   : > { %v527_v58 = vpop.f32.mrf.mxu0 }
 0x23c   : > { %v531_v59 = vmul.f32 0.35355338, %v527_v58 }
 0x23e   : > { %v532_v60 = vsel %vm964_vm2, -1e+09, %v531_v59 }
 0x23f   : > { %v533_v61 = vsel %vm346_vm0, %v532_v60, -inf }
 0x240   : > { %534 = vmax.xlane.f32.xlu0 %v533_v61 }
 0x243   : > { %v529_v62 = vpop.f32.mrf.mxu0 }
 0x299   : > { %v464_v1 = vpop.f32.mrf.mxu3 }
 0x29a   : > { %v468_v2 = vpack.c.bf16 %v464_v1, %v464_v1 }
 0x29c   : > { %799 = vmatmul.msk.bf16.vlgmr.msrb.gmra.mxu1 %vm346_vm0, %v468_v2 }
 0x2a1   : > { %v466_v3 = vpop.f32.mrf.mxu3 }
 0x2a9   : > { %v504_v5 = vpop.f32.mrf.mxu3 }
 0x2b1   : > { %v506_v6 = vpop.f32.mrf.mxu3 }
 0x2b3   : > { %v535_v7 = vpop.xlane.xlu0 %534 }
 0x2b4   : > { %v536_v8 = vsub.f32 %v532_v60, %v535_v7 }
 0x2b6   : > { %v537_v9 = vmul.f32 1.442695, %v536_v8 }
 0x2b8   : > { %850 = vpow2.f32 %v537_v9 }
 0x2b9   : > { %v607_v10 = vpop.f32.mrf.mxu3 }
 0x2ba   : > { %v611_v11 = vmul.f32 0.35355338, %v607_v10 }
 0x2bc   : > { %v612_v12 = vsel %vm964_vm2, -1e+09, %v611_v11 }
 0x2bd   : > { %v613_v13 = vsel %vm346_vm0, %v612_v12, -inf }
 0x2be   : > { %v851_v14 = vpop.eup %850  ;;  %614 = vmax.xlane.f32.xlu1 %v613_v13 }
 0x2bf   : > { %v539_v16 = vsel %vm346_vm0, %v851_v14, 0.0 }
 0x2c0   : > { %540 = vadd.xlane.f32.xlu0 %v539_v16 }
 0x2c1   : > { %v609_v17 = vpop.f32.mrf.mxu3 }
 0x2d4   : > { %545 = vrot.lane.b32.xlu0 %v953_v4, %s888_s20 }
 0x2dc   : > { %625 = vrot.lane.b32.xlu0 %v953_v4, %s889_s25 }
 0x319   : > { %v485_v18 = vpop.f32.mrf.mxu1 }
 0x31a   : > { %v505_v45 = vadd.f32 %v504_v5, %v485_v18 }
 0x321   : > { %v487_v19 = vpop.f32.mrf.mxu1 }
 0x331   : > { %v615_v20 = vpop.xlane.xlu1 %614 }
 0x332   : > { %v616_v21 = vsub.f32 %v612_v12, %v615_v20 }
 0x333   : > { %v541_v22 = vpop.xlane.xlu0 %540 }
 0x334   : > { %v617_v15 = vmul.f32 1.442695, %v616_v21 }
 0x336   : > { %852 = vpow2.f32 %v617_v15 }
 0x337   : > { %854 = vrcp.f32 %v541_v22 }
 0x33c   : > { %v853_v23 = vpop.eup %852 }
 0x33d   : > { %v619_v24 = vsel %vm346_vm0, %v853_v23, 0.0  ;;  %v855_v25 = vpop.eup %854 }
 0x33e   : > { %620 = vadd.xlane.f32.xlu2 %v619_v24  ;;  %v543_v26 = vmul.f32 %v855_v25, %v851_v14 }
 0x340   : > { %v544_v29 = vpack.c.bf16 %v543_v26, %v543_v26 }
 0x346   : > { %v546_v27 = vpop.permute.xlu0 %545 }
 0x347   : > { %v551_v28 = vsel %vm388_vm3, %v546_v27, 0 }
 0x348   : > { %560 = vmatpush.bf16.msrb.mxu2 %v551_v28 }
 0x34b   : > { %802 = vmatmul.msk.bf16.vlgmr.msrb.gmra.mxu2 %vm346_vm0, %v544_v29 }
 0x34c   : > { %661 = vmatpush.bf16.msra.mxu2 %v652_v35 }
 0x34e   : > { %v626_v4 = vpop.permute.xlu0 %625 }
 0x34f   : > { %v631_v30 = vsel %vm388_vm3, %v626_v4, 0 }
 0x350   : > { %640 = vmatpush.bf16.msra.mxu0 %v631_v30 }
 0x3b1   : > { %v621_v33 = vpop.xlane.xlu2 %620 }
 0x3b2   : > { %856 = vrcp.f32 %v621_v33 }
 0x3b8   : > { %v857_v36 = vpop.eup %856 }
 0x3b9   : > { %v623_v37 = vmul.f32 %v857_v36, %v853_v23 }
 0x3bb   : > { %v624_v38 = vpack.c.bf16 %v623_v37, %v623_v37 }
 0x3bd   : > { %805 = vmatmul.msk.bf16.vlgmr.msra.gmra.mxu0 %vm346_vm0, %v624_v38 }
 0x3ce   : > { %v562_v39 = vpop.f32.mrf.mxu2 }
 0x3cf   : > { %v566_v40 = vpack.c.bf16 %v562_v39, %v562_v39 }
 0x3d1   : > { %803 = vmatmul.msk.bf16.vlgmr.msra.gmra.mxu1 %vm346_vm0, %v566_v40 }
 0x3d6   : > { %v564_v41 = vpop.f32.mrf.mxu2 }
 0x43a   : > { %v642_v42 = vpop.f32.mrf.mxu0 }
 0x43b   : > { %v646_v43 = vpack.c.bf16 %v642_v42, %v642_v42 }
 0x43d   : > { %806 = vmatmul.msk.bf16.vlgmr.msra.gmra.mxu2 %vm346_vm0, %v646_v43 }
 0x442   : > { %v644_v44 = vpop.f32.mrf.mxu0 }
 0x44e   : > { %v583_v46 = vpop.f32.mrf.mxu1 }
 0x44f   : > { %v587_v47 = vadd.f32 %v583_v46, %v505_v45 }
 0x456   : > { %v585_v48 = vpop.f32.mrf.mxu1 }
 0x4c0   : > { %v663_v50 = vpop.f32.mrf.mxu2 }
 0x4c1   : > { %v667_v51 = vadd.f32 %v663_v50, %v587_v47 }
 0x4c3   : > { %v672_v53 = vadd.f32 %v841_v49, %v667_v51 }
 0x4c5   : > { %v673_v54 = vadd.f32 %v672_v53, %v340_v52 }
 0x4c7   : > { %675 = vst.msk [vmem:[%s336_s14] sm:$0xff] %vm674_vm4, %v673_v54 }
 0x4c8   : > { %v665_v55 = vpop.f32.mrf.mxu2 }
 0x4c9 PF: > { %s16_s23 = sadd.s32 1, %s880_s23   ;;  %s1049_s21 = smov %s876_s22 }
 0x4ca   : > { %p13_p5 = scmp.ge.s32.totalorder %s16_s23, 4   ;;  %s1050_s22 = smov %s1052_s24 }
 0x4cc   :  { %15 = sbr.rel (!%p13_p5) target bundleno = 2 (0x2), region = 83 }

// kernel: transformer_forward.28
= control target key start
LH: loop header
LB: loop body
LE: loop exit
PB: predicated region body
PF: predicated region fallthrough
CT: control target
= control target key end

     0   :  { %vm19_vm0 = vcmask 523264   ;;  %v108_v1 = vmov 0.0   ;;  %vm47_vm1 = vcmask 261120   ;;  %vm83_vm2 = vcmask 519168   ;;  %s151_s1 = inlined_call_operand.vmem [shape: bf16[32,64], index: 1, kind: input, shape index: {}]   ;;  %s152_s2 = inlined_call_operand.vmem [shape: f32[1,64], index: 2, kind: input, shape index: {}]   ;;  %s153_s0 = inlined_call_operand.vmem [shape: bf16[16,32], index: 0, kind: input, shape index: {}]   ;;  %s154_s3 = inlined_call_operand.vmem [shape: bf16[16,64], index: 3, kind: output, shape index: {}]  }
   0x1   :  { %v105_v0 = vld [vmem:[%s151_s1 + $0x8] sm:$0xff]  ;;  %20 = vst.msk [vmem:[#allocation2] sm:$0xff] %vm19_vm0, %v108_v1  ;;  %v104_v2 = vld [vmem:[%s151_s1] sm:$0xff] }
   0x2   :  { %21 = vst.msk [vmem:[#allocation2 + $0x8] sm:$0xff] %vm19_vm0, %v108_v1  ;;  %57 = vmatpush.bf16.msra.mxu0 %v105_v0  ;;  %v103_v3 = vld [vmem:[%s153_s0] sm:$0xff] }
   0x3   :  { %v107_v8 = vld [vmem:[%s152_s2] ss:$0 sm:$0xff] }
   0x6   :  { %58 = vmatpush.bf16.msra.mxu0 %v104_v2 }
   0x8   :  { %v24_v4 = vld [vmem:[#allocation2] sm:$0xff] }
   0x9   :  { %102 = vmatmul.msk.bf16.vlgmr.msra.gmra.mxu0 %vm47_vm1, %v103_v3  ;;  %v25_v7 = vld [vmem:[#allocation2 + $0x8] sm:$0xff] }
  0x86   :  { %v60_v5 = vpop.f32.mrf.mxu0 }
  0x87   :  { %v65_v6 = vadd.f32 %v60_v5, %v24_v4 }
  0x89   :  { %68 = vst.msk [vmem:[#allocation2] sm:$0xff] %vm19_vm0, %v65_v6 }
  0x8e   :  { %v62_v9 = vpop.f32.mrf.mxu0 }
  0x8f   :  { %v66_v10 = vadd.f32 %v62_v9, %v25_v7 }
  0x90   :  { %v73_v11 = vld [vmem:[#allocation2] sm:$0xff] }
  0x91   :  { %v79_v12 = vadd.f32 %v107_v8, %v73_v11  ;;  %69 = vst.msk [vmem:[#allocation2 + $0x8] sm:$0xff] %vm19_vm0, %v66_v10 }
  0x93   :  { %v81_v13 = vpack.c.bf16 %v79_v12, %v79_v12 }
  0x95   :  { %84 = vst.msk [vmem:[%s154_s3] sm:$0xf] %vm83_vm2, %v81_v13 }
  0x98   :  { %v74_v14 = vld [vmem:[#allocation2 + $0x8] sm:$0xff] }
  0x99   :  { %v80_v15 = vadd.f32 %v107_v8, %v74_v14 }
  0x9b   :  { %v82_v16 = vpack.c.bf16 %v80_v15, %v80_v15 }
  0x9d   :  { %85 = vst.msk [vmem:[%s154_s3 + $0x4] sm:$0xf] %vm83_vm2, %v82_v16 }

// kernel: transformer_forward.23
= control target key start
LH: loop header
LB: loop body
LE: loop exit
PB: predicated region body
PF: predicated region fallthrough
CT: control target
= control target key end

     0   :  { %vm41_vm0 = vcmask 261120   ;;  %v356_v4 = vmov 32.0   ;;  %vm105_vm6 = vcmask 257024   ;;  %v357_v58 = vmov 0.0   ;;  %s493_s0 = inlined_call_operand.vmem [shape: f32[16,32], index: 0, kind: input, shape index: {}]   ;;  %s494_s1 = inlined_call_operand.vmem [shape: f32[1,32], index: 1, kind: input, shape index: {}]   ;;  %s495_s2 = inlined_call_operand.vmem [shape: f32[1,32], index: 2, kind: input, shape index: {}]   ;;  %s496_s4 = inlined_call_operand.vmem [shape: f32[1,64], index: 4, kind: input, shape index: {}]   ;;  %s497_s3 = inlined_call_operand.vmem [shape: bf16[32,64], index: 3, kind: input, shape index: {}]   ;;  %s498_s5 = inlined_call_operand.vmem [shape: bf16[64,32], index: 5, kind: input, shape index: {}]   ;;  %s499_s6 = inlined_call_operand.vmem [shape: f32[1,32], index: 6, kind: input, shape index: {}]   ;;  %s500_s7 = inlined_call_operand.vmem [shape: f32[1,32], index: 7, kind: input, shape index: {}]   ;;  %s501_s8 = inlined_call_operand.vmem [shape: f32[1,32], index: 8, kind: input, shape index: {}]   ;;  %s502_s9 = inlined_call_operand.vmem [shape: bf16[16,32], index: 9, kind: output, shape index: {}]  }
   0x1   :  { %v411_v0 = vld [vmem:[%s493_s0] sm:$0xff]  ;;  %v418_v2 = vld [vmem:[%s493_s0 + $0x8] sm:$0xff]  ;;  %346 = vrcp.f32 %v356_v4  ;;  %v337_v54 = vld [vmem:[%s498_s5 + $0x18] sm:$0xff]  ;;  %108 = vst.msk [vmem:[#allocation3] sm:$0xff] %vm41_vm0, %v357_v58  ;;  %vm192_vm9 = vcmask 523264  }
   0x2   :  { %v42_v1 = vsel %vm41_vm0, %v411_v0, 0.0  ;;  %v45_v3 = vsel %vm41_vm0, %v418_v2, 0.0  ;;  %v333_v24 = vld [vmem:[%s497_s3 + $0x8] sm:$0xff]  ;;  %v332_v27 = vld [vmem:[%s497_s3] sm:$0xff]  ;;  %200 = vmatpush.bf16.msra.mxu1 %v337_v54  ;;  %v336_v55 = vld [vmem:[%s498_s5 + $0x10] sm:$0xff]  ;;  %109 = vst.msk [vmem:[#allocation3 + $0x8] sm:$0xff] %vm41_vm0, %v357_v58 }
   0x3   :  { %43 = vadd.xlane.f32.xlu0 %v42_v1  ;;  %147 = vmatpush.bf16.msra.mxu0 %v333_v24  ;;  %v340_v37 = vld [vmem:[%s494_s1] ss:$0 sm:$0xff]  ;;  %v335_v56 = vld [vmem:[%s498_s5 + $0x8] sm:$0xff] }
   0x4   :  { %v341_v40 = vld [vmem:[%s495_s2] ss:$0 sm:$0xff] }
   0x5   :  { %v334_v57 = vld [vmem:[%s498_s5] sm:$0xff] }
   0x6   :  { %201 = vmatpush.bf16.msra.mxu1 %v336_v55  ;;  %v342_v60 = vld [vmem:[%s496_s4] ss:$0 sm:$0xff] }
   0x7   :  { %v347_v5 = vpop.eup %346  ;;  %148 = vmatpush.bf16.msra.mxu0 %v332_v27 }
   0x8   :  { %v49_v6 = vmul.f32 32.0, %v347_v5  ;;  %vm53_vm1 = vweird.f32 %v347_v5 }
   0xa   :  { %v50_v7 = vsub.f32 1.0, %v49_v6  ;;  %202 = vmatpush.bf16.msra.mxu1 %v335_v56 }
   0xb   :  { %46 = vadd.xlane.f32.xlu0 %v45_v3 }
   0xc   :  { %v51_v8 = vmul.f32 %v347_v5, %v50_v7 }
   0xe   :  { %v52_v9 = vadd.f32 %v347_v5, %v51_v8  ;;  %203 = vmatpush.bf16.msra.mxu1 %v334_v57  ;;  %v158_v8 = vld [vmem:[#allocation3 + $0x8] sm:$0xff] }
  0x10   :  { %v422_v10 = vsel %vm53_vm1, %v347_v5, %v52_v9  ;;  %v157_v5 = vld [vmem:[#allocation3] sm:$0xff] }
  0x76   :  { %v44_v11 = vpop.xlane.xlu0 %43 }
  0x77   :  { %v55_v12 = vmul.f32 %v422_v10, %v44_v11 }
  0x79   :  { %v57_v13 = vsub.f32 %v411_v0, %v55_v12  ;;  %v343_v12 = vld [vmem:[%s499_s6] ss:$0 sm:$0xff] }
  0x7b   :  { %v59_v14 = vmul.f32 %v57_v13, %v57_v13 }
  0x7d   :  { %v61_v15 = vsel %vm41_vm0, %v59_v14, 0.0 }
  0x7e   :  { %62 = vadd.xlane.f32.xlu1 %v61_v15  ;;  %v47_v16 = vpop.xlane.xlu0 %46 }
  0x7f   :  { %v56_v17 = vmul.f32 %v422_v10, %v47_v16 }
  0x81   :  { %v58_v18 = vsub.f32 %v418_v2, %v56_v17 }
  0x83   :  { %v60_v19 = vmul.f32 %v58_v18, %v58_v18 }
  0x85   :  { %v64_v20 = vsel %vm41_vm0, %v60_v19, 0.0 }
  0x86   :  { %65 = vadd.xlane.f32.xlu1 %v64_v20 }
  0xf1   :  { %v63_v21 = vpop.xlane.xlu1 %62 }
  0xf2   :  { %v67_v22 = vmul.f32 %v63_v21, %v422_v10 }
  0xf4   :  { %v69_v23 = vadd.f32 1e-06, %v67_v22 }
  0xf6   :  { %348 = vrsqrt.f32 %v69_v23  ;;  %vm77_vm3 = vweird.f32 %v69_v23 }
  0xf9   :  { %v66_v25 = vpop.xlane.xlu1 %65 }
  0xfa   :  { %v68_v26 = vmul.f32 %v66_v25, %v422_v10 }
  0xfc   :  { %v349_v28 = vpop.eup %348  ;;  %v70_v29 = vadd.f32 1e-06, %v68_v26 }
  0xfd   :  { %v72_v30 = vmul.f32 %v349_v28, %v69_v23  ;;  %vm78_vm2 = vweird.f32 %v349_v28 }
  0xfe   :  { %350 = vrsqrt.f32 %v70_v29  ;;  %vm79_vm4 = vmor %vm77_vm3, %vm78_vm2  ;;  %vm87_vm7 = vweird.f32 %v70_v29 }
  0xff   :  { %v73_v31 = vmul.f32 %v349_v28, %v72_v30 }
 0x101   :  { %v74_v32 = vmul.f32 0.5, %v73_v31 }
 0x103   :  { %v75_v33 = vsub.f32 1.5, %v74_v32 }
 0x104   :  { %v351_v34 = vpop.eup %350 }
 0x105   :  { %v76_v35 = vmul.f32 %v349_v28, %v75_v33  ;;  %v82_v36 = vmul.f32 %v351_v34, %v70_v29  ;;  %vm88_vm5 = vweird.f32 %v351_v34 }
 0x106   :  { %vm89_vm8 = vmor %vm87_vm7, %vm88_vm5 }
 0x107   :  { %v80_v38 = vsel %vm79_vm4, %v349_v28, %v76_v35  ;;  %v83_v39 = vmul.f32 %v351_v34, %v82_v36 }
 0x108   :  { %v91_v41 = vmul.f32 %v80_v38, %v57_v13 }
 0x109   :  { %v84_v42 = vmul.f32 0.5, %v83_v39 }
 0x10a   :  { %v96_v43 = vmul.f32 %v340_v37, %v91_v41 }
 0x10b   :  { %v85_v44 = vsub.f32 1.5, %v84_v42 }
 0x10c   :  { %v101_v45 = vadd.f32 %v341_v40, %v96_v43  ;;  %v344_v43 = vld [vmem:[%s500_s7] ss:$0 sm:$0xff] }
 0x10d   :  { %v86_v46 = vmul.f32 %v351_v34, %v85_v44 }
 0x10e   :  { %v103_v47 = vpack.c.bf16 %v101_v45, %v101_v45 }
 0x10f   :  { %v90_v48 = vsel %vm89_vm8, %v351_v34, %v86_v46 }
 0x110   :  { %106 = vst.msk [vmem:[#allocation2] sm:$0xf] %vm105_vm6, %v103_v47  ;;  %v92_v49 = vmul.f32 %v90_v48, %v58_v18 }
 0x112   :  { %v97_v50 = vmul.f32 %v340_v37, %v92_v49 }
 0x114   :  { %v102_v51 = vadd.f32 %v341_v40, %v97_v50 }
 0x116   :  { %v104_v52 = vpack.c.bf16 %v102_v51, %v102_v51 }
 0x118   :  { %107 = vst.msk [vmem:[#allocation2 + $0x4] sm:$0xf] %vm105_vm6, %v104_v52 }
 0x11f   :  { %v331_v53 = vld [vmem:[#allocation2] sm:$0xff] }
 0x120   :  { %313 = vmatmul.msk.bf16.vlgmr.msra.gmra.mxu0 %vm41_vm0, %v331_v53 }
 0x19d   :  { %v150_v59 = vpop.f32.mrf.mxu0 }
 0x19e   :  { %v151_v61 = vadd.f32 %v342_v60, %v150_v59 }
 0x1a0   :  { %v155_v1 = vmax.f32 %v151_v61, 0.0 }
 0x1a5   :  { %v152_v62 = vpop.f32.mrf.mxu0 }
 0x1a6   :  { %v153_v63 = vadd.f32 %v342_v60, %v152_v62 }
 0x1a8   :  { %v156_v3 = vmax.f32 %v153_v63, 0.0 }
 0x1aa   :  { %v159_v4 = vpack.c.bf16 %v156_v3, %v155_v1 }
 0x1ac   :  { %330 = vmatmul.msk.bf16.vlgmr.msra.gmra.mxu1 %vm192_vm9, %v159_v4 }
 0x229   :  { %v205_v6 = vpop.f32.mrf.mxu1 }
 0x22a   :  { %v210_v7 = vadd.f32 %v205_v6, %v157_v5 }
 0x22c   :  { %212 = vst.msk [vmem:[#allocation3] sm:$0xff] %vm41_vm0, %v210_v7 }
 0x231   :  { %v207_v9 = vpop.f32.mrf.mxu1 }
 0x232   :  { %v211_v11 = vadd.f32 %v207_v9, %v158_v8 }
 0x233   :  { %v219_v13 = vld [vmem:[#allocation3] sm:$0xff] }
 0x234   :  { %213 = vst.msk [vmem:[#allocation3 + $0x8] sm:$0xff] %vm41_vm0, %v211_v11  ;;  %v221_v14 = vadd.f32 %v219_v13, %v411_v0 }
 0x236   :  { %v227_v15 = vadd.f32 %v343_v12, %v221_v14 }
 0x238   :  { %v231_v16 = vsel %vm41_vm0, %v227_v15, 0.0 }
 0x239   :  { %232 = vadd.xlane.f32.xlu2 %v231_v16 }
 0x23b   :  { %v220_v17 = vld [vmem:[#allocation3 + $0x8] sm:$0xff] }
 0x23c   :  { %v222_v18 = vadd.f32 %v220_v17, %v418_v2 }
 0x23e   :  { %v228_v19 = vadd.f32 %v343_v12, %v222_v18 }
 0x240   :  { %v234_v20 = vsel %vm41_vm0, %v228_v19, 0.0 }
 0x241   :  { %235 = vadd.xlane.f32.xlu2 %v234_v20 }
 0x2ac   :  { %v233_v21 = vpop.xlane.xlu2 %232 }
 0x2ad   :  { %v244_v22 = vmul.f32 %v233_v21, %v422_v10 }
 0x2af   :  { %v246_v23 = vsub.f32 %v227_v15, %v244_v22 }
 0x2b1   :  { %v248_v24 = vmul.f32 %v246_v23, %v246_v23 }
 0x2b3   :  { %v250_v25 = vsel %vm41_vm0, %v248_v24, 0.0 }
 0x2b4   :  { %251 = vadd.xlane.f32.xlu0 %v250_v25  ;;  %v236_v0 = vpop.xlane.xlu2 %235 }
 0x2b5   :  { %v245_v26 = vmul.f32 %v236_v0, %v422_v10 }
 0x2b7   :  { %v247_v27 = vsub.f32 %v228_v19, %v245_v26 }
 0x2b9   :  { %v249_v28 = vmul.f32 %v247_v27, %v247_v27 }
 0x2bb   :  { %v253_v29 = vsel %vm41_vm0, %v249_v28, 0.0 }
 0x2bc   :  { %254 = vadd.xlane.f32.xlu1 %v253_v29 }
 0x327   :  { %v252_v2 = vpop.xlane.xlu0 %251 }
 0x328   :  { %v256_v30 = vmul.f32 %v252_v2, %v422_v10 }
 0x32a   :  { %v258_v31 = vadd.f32 1e-06, %v256_v30 }
 0x32c   :  { %352 = vrsqrt.f32 %v258_v31  ;;  %vm266_vm11 = vweird.f32 %v258_v31 }
 0x32f   :  { %v255_v32 = vpop.xlane.xlu1 %254 }
 0x330   :  { %v257_v33 = vmul.f32 %v255_v32, %v422_v10  ;;  %v345_v10 = vld [vmem:[%s501_s8] ss:$0 sm:$0xff] }
 0x332   :  { %v353_v34 = vpop.eup %352  ;;  %v259_v35 = vadd.f32 1e-06, %v257_v33 }
 0x333   :  { %v261_v36 = vmul.f32 %v353_v34, %v258_v31  ;;  %vm267_vm10 = vweird.f32 %v353_v34 }
 0x334   :  { %354 = vrsqrt.f32 %v259_v35  ;;  %vm268_vm12 = vmor %vm266_vm11, %vm267_vm10  ;;  %vm276_vm14 = vweird.f32 %v259_v35 }
 0x335   :  { %v262_v37 = vmul.f32 %v353_v34, %v261_v36 }
 0x337   :  { %v263_v38 = vmul.f32 0.5, %v262_v37 }
 0x339   :  { %v264_v39 = vsub.f32 1.5, %v263_v38 }
 0x33a   :  { %v355_v40 = vpop.eup %354 }
 0x33b   :  { %v265_v41 = vmul.f32 %v353_v34, %v264_v39  ;;  %v271_v42 = vmul.f32 %v355_v40, %v259_v35  ;;  %vm277_vm13 = vweird.f32 %v355_v40 }
 0x33c   :  { %vm278_vm15 = vmor %vm276_vm14, %vm277_vm13 }
 0x33d   :  { %v269_v44 = vsel %vm268_vm12, %v353_v34, %v265_v41  ;;  %v272_v45 = vmul.f32 %v355_v40, %v271_v42 }
 0x33e   :  { %v280_v46 = vmul.f32 %v269_v44, %v246_v23 }
 0x33f   :  { %v273_v47 = vmul.f32 0.5, %v272_v45 }
 0x340   :  { %v285_v48 = vmul.f32 %v344_v43, %v280_v46 }
 0x341   :  { %v274_v49 = vsub.f32 1.5, %v273_v47 }
 0x342   :  { %v290_v50 = vadd.f32 %v345_v10, %v285_v48 }
 0x343   :  { %v275_v51 = vmul.f32 %v355_v40, %v274_v49 }
 0x344   :  { %v292_v52 = vpack.c.bf16 %v290_v50, %v290_v50 }
 0x345   :  { %v279_v53 = vsel %vm278_vm15, %v355_v40, %v275_v51 }
 0x346   :  { %295 = vst.msk [vmem:[%s502_s9] sm:$0xf] %vm105_vm6, %v292_v52  ;;  %v281_v54 = vmul.f32 %v279_v53, %v247_v27 }
 0x348   :  { %v286_v55 = vmul.f32 %v344_v43, %v281_v54 }
 0x34a   :  { %v291_v56 = vadd.f32 %v345_v10, %v286_v55 }
 0x34c   :  { %v293_v57 = vpack.c.bf16 %v291_v56, %v291_v56 }
 0x34e   :  { %296 = vst.msk [vmem:[%s502_s9 + $0x4] sm:$0xf] %vm105_vm6, %v293_v57 }

// kernel: transformer_forward.26
= control target key start
LH: loop header
LB: loop body
LE: loop exit
PB: predicated region body
PF: predicated region fallthrough
CT: control target
= control target key end

     0   :  { %s934_s21 = smov 0   ;;  %s936_s22 = smov 0   ;;  %s1049_s0 = inlined_call_operand.vmem [shape: bf16[2,8,32], index: 0, kind: input, shape index: {}]   ;;  %s1050_s1 = inlined_call_operand.vmem [shape: bf16[2,8,64], index: 1, kind: input, shape index: {}]   ;;  %s1051_s2 = inlined_call_operand.vmem [shape: s32[2,1,8], index: 2, kind: input, shape index: {}]   ;;  %s1052_s3 = inlined_call_operand.vmem [shape: f32[2,8,32], index: 3, kind: input, shape index: {}]   ;;  %s1053_s4 = inlined_call_operand.vmem [shape: bf16[32,32], index: 4, kind: input, shape index: {}]   ;;  %s1054_s5 = inlined_call_operand.vmem [shape: f32[1,32], index: 5, kind: input, shape index: {}]   ;;  %s1055_s6 = inlined_call_operand.vmem [shape: f32[2,8,32], index: 6, kind: output, shape index: {}]  }
   0x1   :  { %s938_s23 = smov 0  }
   0x2 LB: > { %s28_s24 = sadd.s32 1, %s885_s22  ;;  %p799_p0 = scmp.ge.s32.totalorder %s889_s23, 1  ;;  %s889_s23 = sphi %s938_s23, %s16_s23   ;;  %s885_s22 = sphi %s936_s22, %s1059_s22   ;;  %s881_s21 = sphi %s934_s21, %s1058_s21  }
   0x3   : > { %p30_p1 = scmp.ge.s32.totalorder %s28_s24, 2  ;;  %p261_p2 = scmp.lt.s32.totalorder %s889_s23, 3 }
   0x5   : > { %s1061_s24 = smov (%p30_p1, %s28_s24), 0  ;;  %p262_p3 = pnand %p799_p0, %p261_p2 }
   0x6   : > { %p309_p4 = scmp.lt.s32.totalorder (!%p262_p3), %s881_s21, 1  ;;  %s891_s8 = smov (!%p262_p3), 120  }
   0x7   : > { %265 = sbr.rel (%p262_p3) target bundleno = 1225 (0x4c9), region = 44  ;;  %s892_s9 = smov (!%p262_p3), 96  }
   0x8   : > { %s894_s13 = smov (!%p262_p3), 104   ;;  %s895_s14 = smov (!%p262_p3), 88  }
   0x9   : > { %s896_s15 = smov (!%p262_p3), 112   ;;  %s897_s20 = smov (!%p262_p3), 80  }
   0xc   : > { %s1063_s21 = smov (!%p309_p4, %s881_s21), 1  ;;  %vm355_vm0 = vcmask 64512   ;;  %v347_v10 = vlaneseq  ;;  %v893_v11 = vmov 0   ;;  %vm397_vm5 = vcmask 1043456   ;;  %v415_v50 = vld [vmem:[%s1053_s4] sm:$0xf] }
   0xd   : > { %s800_s25 = sshll.u32 %s1063_s21, 2  ;;  %s322_s12 = scalar_lea.vmem %s1051_s2, %s1063_s21  ;;  %v502_v51 = vsel %vm397_vm5, %v415_v50, 0  ;;  %vm683_vm6 = vcmask 261120  }
   0xe   : > { %s319_s28 = scalar_lea.vmem %s1050_s1, %s800_s25  ;;  %s315_s7 = scalar_lea.vmem %s1049_s0, %s800_s25  ;;  %v341_v7 = vld [vmem:[%s322_s12] sm:$0x1]  ;;  %v348_v15 = vshrl.u32 %v347_v10, 7  ;;  %v352_v16 = vand.u32 127, %v347_v10 }
   0xf   : > { %v339_v0 = vld [vmem:[%s319_s28] sm:$0xf]  ;;  %vm342_vm1 = vcmp.gt.s32.totalorder %v341_v7, 0  ;;  %s898_s25 = smov 72   ;;  %s802_s30 = sshll.u32 %s1063_s21, 3 }
  0x10   : > { %v360_v1 = vsel %vm355_vm0, %v339_v0, 0  ;;  %v390_v2 = vunpack.c.l.b16 %v339_v0  ;;  %v338_v3 = vld [vmem:[%s315_s7] sm:$0xf]  ;;  %v343_v12 = vsel %vm342_vm1, 1, %v893_v11  ;;  %vm353_vm3 = vcmp.gt.s32.totalorder %v352_v16, %v348_v15 }
  0x11   : > { %369 = vmatpush.bf16.xpose.msra.mxu0 %v360_v1  ;;  %v417_v5 = vunpack.c.l.b16 %v338_v3  ;;  %v344_v14 = vperm.slane %v343_v12, 0 }
  0x12   : > { %v962_v4 = vpack.c.b16 %v390_v2, %v390_v2  ;;  %v478_v2 = vld [vmem:[%s1053_s4 + $0x4] sm:$0xf] }
  0x13   : > { %v418_v6 = vpack.c.b16 %v417_v5, %v417_v5  ;;  %vm345_vm2 = vcmp.eq.s32.totalorder %v344_v14, 1 }
  0x14   : > { %421 = vrot.lane.b32.xlu0 %v962_v4, %s891_s8  ;;  %392 = vrot.lane.b32.xlu2 %v962_v4, %s892_s9  ;;  %vm973_vm4 = vmor %vm345_vm2, %vm353_vm3  ;;  %s329_s9 = scalar_lea.vmem %s1052_s3, %s802_s30 }
  0x18   : > { %804 = vmatmul.msk.bf16.vlgmr.msra.gmra.mxu0 %vm355_vm0, %v338_v3  ;;  %v483_v3 = vsel %vm397_vm5, %v478_v2, 0 }
  0x1c   : > { %419 = vrot.lane.b32.xlu0 %v418_v6, %s891_s8 }
  0x6e   : > { %v393_v33 = vpop.permute.xlu2 %392 }
  0x6f   : > { %v399_v34 = vsel %vm397_vm5, %v393_v33, 0 }
  0x70   : > { %408 = vmatpush.bf16.msra.mxu1 %v399_v34  ;;  %v576_v34 = vld [vmem:[%s1053_s4 + $0x8] sm:$0xf] }
  0x74   : > { %492 = vmatpush.bf16.msrb.mxu1 %v483_v3 }
  0x86   : > { %v422_v8 = vpop.permute.xlu0 %421 }
  0x87   : > { %v427_v9 = vsel %vm355_vm0, %v422_v8, 0 }
  0x88   : > { %436 = vmatpush.bf16.xpose.msra.mxu2 %v427_v9 }
  0x8e   : > { %v420_v13 = vpop.permute.xlu0 %419 }
  0x8f   : > { %806 = vmatmul.msk.bf16.vlgmr.msra.gmra.mxu2 %vm355_vm0, %v420_v13 }
  0x95   : > { %v371_v17 = vpop.f32.mrf.mxu0 }
  0x96   : > { %v375_v19 = vmul.f32 0.35355338, %v371_v17 }
  0x98   : > { %v376_v20 = vsel %vm973_vm4, -1e+09, %v375_v19 }
  0x99   : > { %v377_v21 = vsel %vm355_vm0, %v376_v20, -inf }
  0x9a   : > { %378 = vmax.xlane.f32.xlu1 %v377_v21 }
  0x9d   : > { %v373_v22 = vpop.f32.mrf.mxu0 }
 0x10d   : > { %v379_v23 = vpop.xlane.xlu1 %378 }
 0x10e   : > { %v380_v24 = vsub.f32 %v376_v20, %v379_v23 }
 0x110   : > { %v381_v25 = vmul.f32 1.442695, %v380_v24 }
 0x112   : > { %851 = vpow2.f32 %v381_v25  ;;  %v438_v26 = vpop.f32.mrf.mxu2 }
 0x113   : > { %v442_v27 = vmul.f32 0.35355338, %v438_v26 }
 0x115   : > { %v443_v28 = vsel %vm973_vm4, -1e+09, %v442_v27 }
 0x116   : > { %v444_v29 = vsel %vm355_vm0, %v443_v28, -inf }
 0x117   : > { %445 = vmax.xlane.f32.xlu2 %v444_v29 }
 0x118   : > { %v852_v30 = vpop.eup %851 }
 0x119   : > { %v383_v31 = vsel %vm355_vm0, %v852_v30, 0.0 }
 0x11a   : > { %v440_v32 = vpop.f32.mrf.mxu2  ;;  %384 = vadd.xlane.f32.xlu1 %v383_v31 }
 0x12f   : > { %597 = vrot.lane.b32.xlu2 %v418_v6, %s894_s13 }
 0x133   : > { %456 = vrot.lane.b32.xlu1 %v962_v4, %s895_s14  ;;  %s336_s14 = scalar_lea.vmem %s1055_s6, %s802_s30 }
 0x13b   : > { %599 = vrot.lane.b32.xlu1 %v962_v4, %s894_s13 }
 0x143   : > { %519 = vrot.lane.b32.xlu1 %v962_v4, %s896_s15 }
 0x14b   : > { %517 = vrot.lane.b32.xlu1 %v418_v6, %s896_s15 }
 0x18a   : > { %v446_v35 = vpop.xlane.xlu2 %445 }
 0x18b   : > { %v447_v36 = vsub.f32 %v443_v28, %v446_v35  ;;  %v581_v35 = vsel %vm397_vm5, %v576_v34, 0 }
 0x18d   : > { %v448_v37 = vmul.f32 1.442695, %v447_v36  ;;  %v385_v38 = vpop.xlane.xlu1 %384 }
 0x18e   : > { %853 = vrcp.f32 %v385_v38 }
 0x18f   : > { %855 = vpow2.f32 %v448_v37  ;;  %v656_v37 = vld [vmem:[%s1053_s4 + $0xc] sm:$0xf] }
 0x190   : > { %v661_v38 = vsel %vm397_vm5, %v656_v37, 0 }
 0x192   : > { %v598_v60 = vpop.permute.xlu2 %597 }
 0x194   : > { %v854_v39 = vpop.eup %853 }
 0x195   : > { %v856_v40 = vpop.eup %855  ;;  %v387_v41 = vmul.f32 %v854_v39, %v852_v30 }
 0x196   : > { %v450_v42 = vsel %vm355_vm0, %v856_v40, 0.0 }
 0x197   : > { %451 = vadd.xlane.f32.xlu0 %v450_v42  ;;  %v388_v43 = vpack.c.bf16 %v387_v41, %v387_v41 }
 0x199   : > { %805 = vmatmul.msk.bf16.vlgmr.msra.gmra.mxu1 %vm355_vm0, %v388_v43 }
 0x19a   : > { %590 = vmatpush.bf16.msra.mxu1 %v581_v35 }
 0x1a5   : > { %v457_v44 = vpop.permute.xlu1 %456 }
 0x1a6   : > { %v462_v45 = vsel %vm397_vm5, %v457_v44, 0 }
 0x1a7   : > { %471 = vmatpush.bf16.msra.mxu3 %v462_v45 }
 0x1ab   : > { %511 = vmatpush.bf16.msrb.mxu3 %v502_v51 }
 0x1ad   : > { %v600_v46 = vpop.permute.xlu1 %599 }
 0x1ae   : > { %v605_v55 = vsel %vm355_vm0, %v600_v46, 0 }
 0x1b5   : > { %v520_v47 = vpop.permute.xlu1 %519 }
 0x1b6   : > { %v525_v48 = vsel %vm355_vm0, %v520_v47, 0 }
 0x1b7   : > { %534 = vmatpush.bf16.xpose.msrb.mxu0 %v525_v48 }
 0x1bd   : > { %v518_v49 = vpop.permute.xlu1 %517 }
 0x1be   : > { %810 = vmatmul.msk.bf16.vlgmr.msrb.gmra.mxu0 %vm355_vm0, %v518_v49 }
 0x20a   : > { %v452_v52 = vpop.xlane.xlu0 %451 }
 0x20b   : > { %857 = vrcp.f32 %v452_v52  ;;  %v850_v52 = vld [vmem:[%s1054_s5] ss:$0 sm:$0xff] }
 0x211   : > { %v858_v53 = vpop.eup %857 }
 0x212   : > { %v454_v54 = vmul.f32 %v858_v53, %v856_v40 }
 0x214   : > { %v455_v56 = vpack.c.bf16 %v454_v54, %v454_v54 }
 0x216   : > { %v410_v57 = vpop.f32.mrf.mxu1  ;;  %807 = vmatmul.msk.bf16.vlgmr.msra.gmra.mxu3 %vm355_vm0, %v455_v56 }
 0x217   : > { %614 = vmatpush.bf16.xpose.msra.mxu3 %v605_v55  ;;  %v414_v59 = vpack.c.bf16 %v410_v57, %v410_v57  ;;  %v340_v55 = vld [vmem:[%s329_s9] sm:$0xff] }
 0x21e   : > { %v412_v58 = vpop.f32.mrf.mxu1 }
 0x226   : > { %809 = vmatmul.msk.bf16.vlgmr.msrb.gmra.mxu3 %vm355_vm0, %v414_v59 }
 0x236   : > { %813 = vmatmul.msk.bf16.vlgmr.msra.gmra.mxu3 %vm355_vm0, %v598_v60 }
 0x23b   : > { %v536_v61 = vpop.f32.mrf.mxu0 }
 0x23c   : > { %v540_v62 = vmul.f32 0.35355338, %v536_v61 }
 0x23e   : > { %v541_v63 = vsel %vm973_vm4, -1e+09, %v540_v62 }
 0x23f   : > { %v542_v0 = vsel %vm355_vm0, %v541_v63, -inf }
 0x240   : > { %543 = vmax.xlane.f32.xlu0 %v542_v0 }
 0x243   : > { %v538_v1 = vpop.f32.mrf.mxu0 }
 0x299   : > { %v473_v5 = vpop.f32.mrf.mxu3 }
 0x29a   : > { %v477_v6 = vpack.c.bf16 %v473_v5, %v473_v5 }
 0x29c   : > { %808 = vmatmul.msk.bf16.vlgmr.msrb.gmra.mxu1 %vm355_vm0, %v477_v6 }
 0x2a1   : > { %v475_v7 = vpop.f32.mrf.mxu3 }
 0x2a9   : > { %v513_v8 = vpop.f32.mrf.mxu3 }
 0x2b1   : > { %v515_v9 = vpop.f32.mrf.mxu3 }
 0x2b3   : > { %v544_v10 = vpop.xlane.xlu0 %543 }
 0x2b4   : > { %v545_v11 = vsub.f32 %v541_v63, %v544_v10 }
 0x2b6   : > { %v546_v12 = vmul.f32 1.442695, %v545_v11 }
 0x2b8   : > { %859 = vpow2.f32 %v546_v12 }
 0x2b9   : > { %v616_v13 = vpop.f32.mrf.mxu3 }
 0x2ba   : > { %v620_v14 = vmul.f32 0.35355338, %v616_v13 }
 0x2bc   : > { %v621_v15 = vsel %vm973_vm4, -1e+09, %v620_v14 }
 0x2bd   : > { %v622_v16 = vsel %vm355_vm0, %v621_v15, -inf }
 0x2be   : > { %v860_v17 = vpop.eup %859  ;;  %623 = vmax.xlane.f32.xlu1 %v622_v16 }
 0x2bf   : > { %v548_v19 = vsel %vm355_vm0, %v860_v17, 0.0 }
 0x2c0   : > { %549 = vadd.xlane.f32.xlu0 %v548_v19 }
 0x2c1   : > { %v618_v20 = vpop.f32.mrf.mxu3 }
 0x2d4   : > { %554 = vrot.lane.b32.xlu0 %v962_v4, %s897_s20 }
 0x2dc   : > { %634 = vrot.lane.b32.xlu0 %v962_v4, %s898_s25 }
 0x319   : > { %v494_v21 = vpop.f32.mrf.mxu1 }
 0x31a   : > { %v514_v48 = vadd.f32 %v513_v8, %v494_v21 }
 0x321   : > { %v496_v22 = vpop.f32.mrf.mxu1 }
 0x331   : > { %v624_v23 = vpop.xlane.xlu1 %623 }
 0x332   : > { %v625_v24 = vsub.f32 %v621_v15, %v624_v23 }
 0x333   : > { %v550_v25 = vpop.xlane.xlu0 %549 }
 0x334   : > { %v626_v18 = vmul.f32 1.442695, %v625_v24 }
 0x336   : > { %861 = vpow2.f32 %v626_v18 }
 0x337   : > { %863 = vrcp.f32 %v550_v25 }
 0x33c   : > { %v862_v26 = vpop.eup %861 }
 0x33d   : > { %v628_v27 = vsel %vm355_vm0, %v862_v26, 0.0  ;;  %v864_v28 = vpop.eup %863 }
 0x33e   : > { %629 = vadd.xlane.f32.xlu2 %v628_v27  ;;  %v552_v29 = vmul.f32 %v864_v28, %v860_v17 }
 0x340   : > { %v553_v32 = vpack.c.bf16 %v552_v29, %v552_v29 }
 0x346   : > { %v555_v30 = vpop.permute.xlu0 %554 }
 0x347   : > { %v560_v31 = vsel %vm397_vm5, %v555_v30, 0 }
 0x348   : > { %569 = vmatpush.bf16.msrb.mxu2 %v560_v31 }
 0x34b   : > { %811 = vmatmul.msk.bf16.vlgmr.msrb.gmra.mxu2 %vm355_vm0, %v553_v32 }
 0x34c   : > { %670 = vmatpush.bf16.msra.mxu2 %v661_v38 }
 0x34e   : > { %v635_v4 = vpop.permute.xlu0 %634 }
 0x34f   : > { %v640_v33 = vsel %vm397_vm5, %v635_v4, 0 }
 0x350   : > { %649 = vmatpush.bf16.msra.mxu0 %v640_v33 }
 0x3b1   : > { %v630_v36 = vpop.xlane.xlu2 %629 }
 0x3b2   : > { %865 = vrcp.f32 %v630_v36 }
 0x3b8   : > { %v866_v39 = vpop.eup %865 }
 0x3b9   : > { %v632_v40 = vmul.f32 %v866_v39, %v862_v26 }
 0x3bb   : > { %v633_v41 = vpack.c.bf16 %v632_v40, %v632_v40 }
 0x3bd   : > { %814 = vmatmul.msk.bf16.vlgmr.msra.gmra.mxu0 %vm355_vm0, %v633_v41 }
 0x3ce   : > { %v571_v42 = vpop.f32.mrf.mxu2 }
 0x3cf   : > { %v575_v43 = vpack.c.bf16 %v571_v42, %v571_v42 }
 0x3d1   : > { %812 = vmatmul.msk.bf16.vlgmr.msra.gmra.mxu1 %vm355_vm0, %v575_v43 }
 0x3d6   : > { %v573_v44 = vpop.f32.mrf.mxu2 }
 0x43a   : > { %v651_v45 = vpop.f32.mrf.mxu0 }
 0x43b   : > { %v655_v46 = vpack.c.bf16 %v651_v45, %v651_v45 }
 0x43d   : > { %815 = vmatmul.msk.bf16.vlgmr.msra.gmra.mxu2 %vm355_vm0, %v655_v46 }
 0x442   : > { %v653_v47 = vpop.f32.mrf.mxu0 }
 0x44e   : > { %v592_v49 = vpop.f32.mrf.mxu1 }
 0x44f   : > { %v596_v50 = vadd.f32 %v592_v49, %v514_v48 }
 0x456   : > { %v594_v51 = vpop.f32.mrf.mxu1 }
 0x4c0   : > { %v672_v53 = vpop.f32.mrf.mxu2 }
 0x4c1   : > { %v676_v54 = vadd.f32 %v672_v53, %v596_v50 }
 0x4c3   : > { %v681_v56 = vadd.f32 %v850_v52, %v676_v54 }
 0x4c5   : > { %v682_v57 = vadd.f32 %v681_v56, %v340_v55 }
 0x4c7   : > { %684 = vst.msk [vmem:[%s336_s14] sm:$0xff] %vm683_vm6, %v682_v57 }
 0x4c8   : > { %v674_v58 = vpop.f32.mrf.mxu2 }
 0x4c9 PF: > { %s16_s23 = sadd.s32 1, %s889_s23   ;;  %s1058_s21 = smov %s885_s22 }
 0x4ca   : > { %p13_p5 = scmp.ge.s32.totalorder %s16_s23, 4   ;;  %s1059_s22 = smov %s1061_s24 }
 0x4cc   :  { %15 = sbr.rel (!%p13_p5) target bundleno = 2 (0x2), region = 83 }

// kernel: transformer_forward.29
= control target key start
LH: loop header
LB: loop body
LE: loop exit
PB: predicated region body
PF: predicated region fallthrough
CT: control target
= control target key end

     0   :  { %s1338_s0 = inlined_call_operand.vmem [shape: bf16[2,8,32], index: 0, kind: input, shape index: {}]   ;;  %s1339_s1 = inlined_call_operand.vmem [shape: bf16[2,8,64], index: 1, kind: input, shape index: {}]   ;;  %s1340_s2 = inlined_call_operand.vmem [shape: s32[2,1,8], index: 2, kind: input, shape index: {}]   ;;  %s1341_s3 = inlined_call_operand.vmem [shape: f32[2,8,32], index: 3, kind: input, shape index: {}]   ;;  %s1342_s4 = inlined_call_operand.vmem [shape: bf16[32,32], index: 4, kind: input, shape index: {}]   ;;  %s1343_s5 = inlined_call_operand.vmem [shape: f32[1,32], index: 5, kind: input, shape index: {}]   ;;  %s1344_s6 = inlined_call_operand.vmem [shape: f32[2,8,32], index: 6, kind: output, shape index: {0}]   ;;  %s1345_s7 = inlined_call_operand.hbm [shape: f32[2,4,8,8], index: 7, kind: output, shape index: {1}]  }
   0x1   :  { %1346 = sst [smem:[#allocation5_spill]] %s1338_s0 }
   0x2   :  { %1347 = sst [smem:[#allocation6_spill]] %s1339_s1 }
   0x3   :  { %13 = vsyncpa [#allocation3], 0 }
   0x4   :  { %15 = vsyncpa [#allocation3 + $0x1], 0  ;;  %s1135_s24 = smov 0   ;;  %s1137_s25 = smov 0  }
   0x5   :  { %s1139_s26 = smov 0   ;;  %s1141_s27 = smov 0  }
   0x6   :  { %s1143_s28 = smov 0   ;;  %s1145_s29 = smov 0  }
   0x7 LB: > { %s892_s30 = sadd.s32 4294967295, %s1083_s29   ;;  %s893_s8 = sadd.s32 4294967294, %s1083_s29   ;;  %s1083_s29 = sphi %s1145_s29, %s21_s29   ;;  %s1079_s28 = sphi %s1143_s28, %s1358_s28   ;;  %s1075_s27 = sphi %s1141_s27, %s1357_s27   ;;  %s1071_s26 = sphi %s1139_s26, %s1356_s26   ;;  %s1067_s25 = sphi %s1137_s25, %s1355_s25   ;;  %s1063_s24 = sphi %s1135_s24, %s1354_s24  }
   0x8   : > { %s33_s9 = sadd.s32 1, %s1079_s28  ;;  %s220_s10 = sadd.s32 1, %s1071_s26 }
   0x9   : > { %p35_p0 = scmp.ge.s32.totalorder %s33_s9, 2  ;;  %p230_p1 = scmp.ne.s32.totalorder %s1071_s26, %s1067_s25 }
   0xa   : > { %p231_p2 = scmp.eq.s32.totalorder %s892_s30, 1  ;;  %p236_p3 = scmp.ne.s32.totalorder %s1067_s25, %s1063_s24 }
   0xb   : > { %s1360_s9 = smov (%p35_p0, %s33_s9), 0  ;;  %p237_p5 = scmp.eq.s32.totalorder %s893_s8, 1 }
   0xc   : > { %p1175_p4 = por %p231_p2, %p230_p1  ;;  %s215_s12 = ssub.s32 %s1079_s28, %s1360_s9 }
   0xd   : > { %p896_p6 = scmp.ge.s32.totalorder %s1083_s29, 1  ;;  %p218_p7 = scmp.eq.s32.totalorder %s215_s12, 0 }
   0xe   : > { %p1182_p8 = por %p237_p5, %p236_p3  ;;  %p294_p9 = scmp.lt.s32.totalorder %s1083_s29, 3 }
   0xf   : > { %s1188_s14 = scalar_select %p218_p7, %s1071_s26, %s220_s10  }
  0x10   : > { %p295_p10 = pnand %p896_p6, %p294_p9 }
  0x11   : > { %p349_p11 = scmp.lt.s32.totalorder (!%p295_p10), %s1075_s27, 1  ;;  %s1350_s1 = sld [smem:[#allocation6_spill]] (!%p295_p10) }
  0x12   : > { %298 = sbr.rel (%p295_p10) target bundleno = 1237 (0x4d5), region = 44  ;;  %s1351_s0 = sld [smem:[#allocation5_spill]] (!%p295_p10) }
  0x13   : > { %s1085_s23 = smov (!%p295_p10), 120   ;;  %s1086_s30 = smov (!%p295_p10), 96  }
  0x14   : > { %s1089_s17 = smov (!%p295_p10), 88   ;;  %s1090_s18 = smov (!%p295_p10), 112  }
  0x15   : > { %s1091_s10 = smov (!%p295_p10), 80  }
  0x17   : > { %s1192_s15 = scalar_select %p349_p11, %s1075_s27, 1  ;;  %vm386_vm0 = vcmask 64512   ;;  %v1087_v11 = vmov 0   ;;  %vm429_vm3 = vcmask 1043456   ;;  %v447_v47 = vld [vmem:[%s1342_s4] sm:$0xf] }
  0x18   : > { %v536_v48 = vsel %vm429_vm3, %v447_v47, 0  ;;  %v512_v63 = vld [vmem:[%s1342_s4 + $0x4] sm:$0xf] }
  0x19   : > { %s898_s16 = sshll.u32 %s1192_s15, 2  ;;  %s362_s12 = scalar_lea.vmem %s1340_s2, %s1192_s15 }
  0x1a   : > { %s359_s19 = scalar_lea.vmem %s1350_s1, %s898_s16  ;;  %s355_s22 = scalar_lea.vmem %s1351_s0, %s898_s16  ;;  %v381_v9 = vld [vmem:[%s362_s12] sm:$0x1] }
  0x1b   : > { %v379_v0 = vld [vmem:[%s359_s19] sm:$0xf]  ;;  %vm382_vm1 = vcmp.gt.s32.totalorder %v381_v9, 0  ;;  %s1088_s16 = smov 104   ;;  %s346_s19 = sand.u32 1, %s1067_s25  }
  0x1c   : > { %v391_v1 = vsel %vm386_vm0, %v379_v0, 0  ;;  %v422_v2 = vunpack.c.l.b16 %v379_v0  ;;  %v378_v3 = vld [vmem:[%s355_s22] sm:$0xf]  ;;  %v383_v12 = vsel %vm382_vm1, 1, %v1087_v11  ;;  %s897_s20 = sshll.u32 %s346_s19, 5  ;;  %v517_v0 = vsel %vm429_vm3, %v512_v63, 0 }
  0x1d   : > { %400 = vmatpush.bf16.xpose.msra.mxu0 %v391_v1  ;;  %v449_v5 = vunpack.c.l.b16 %v378_v3  ;;  %v384_v13 = vperm.slane %v383_v12, 0  ;;  %s1232_s21 = scalar_lea.vmem [#allocation2], %s897_s20  ;;  %s1092_s12 = smov 72  }
  0x1e   : > { %v1202_v4 = vpack.c.b16 %v422_v2, %v422_v2  ;;  %s922_s22 = sshll.u32 %s1075_s27, 5  ;;  %s1025_s27 = scalar_lea.hbm %s1345_s7, 64 }
  0x1f   : > { %v450_v6 = vpack.c.b16 %v449_v5, %v449_v5  ;;  %vm1213_vm2 = vcmp.eq.s32.totalorder %v384_v13, 1  ;;  %s746_s8 = scalar_lea.hbm %s1345_s7, %s922_s22 }
  0x20   : > { %453 = vrot.lane.b32.xlu0 %v1202_v4, %s1085_s23  ;;  %424 = vrot.lane.b32.xlu2 %v1202_v4, %s1086_s30 }
  0x24   : > { %902 = vmatmul.msk.bf16.vlgmr.msra.gmra.mxu0 %vm386_vm0, %v378_v3 }
  0x28   : > { %451 = vrot.lane.b32.xlu0 %v450_v6, %s1085_s23 }
  0x7a   : > { %v425_v30 = vpop.permute.xlu2 %424 }
  0x7b   : > { %v431_v31 = vsel %vm429_vm3, %v425_v30, 0 }
  0x7c   : > { %440 = vmatpush.bf16.msra.mxu1 %v431_v31  ;;  %v612_v31 = vld [vmem:[%s1342_s4 + $0x8] sm:$0xf] }
  0x80   : > { %526 = vmatpush.bf16.msrb.mxu1 %v517_v0 }
  0x92   : > { %v454_v7 = vpop.permute.xlu0 %453 }
  0x93   : > { %v459_v8 = vsel %vm386_vm0, %v454_v7, 0 }
  0x94   : > { %468 = vmatpush.bf16.xpose.msra.mxu2 %v459_v8 }
  0x9a   : > { %v452_v10 = vpop.permute.xlu0 %451 }
  0x9b   : > { %904 = vmatmul.msk.bf16.vlgmr.msra.gmra.mxu2 %vm386_vm0, %v452_v10 }
  0xa1   : > { %v402_v14 = vpop.f32.mrf.mxu0 }
  0xa2   : > { %v406_v16 = vmul.f32 0.35355338, %v402_v14 }
  0xa4   : > { %v407_v17 = vsel %vm1213_vm2, -1e+09, %v406_v16 }
  0xa5   : > { %v408_v18 = vsel %vm386_vm0, %v407_v17, -inf }
  0xa6   : > { %409 = vmax.xlane.f32.xlu1 %v408_v18 }
  0xa9   : > { %v404_v19 = vpop.f32.mrf.mxu0 }
 0x119   : > { %v410_v20 = vpop.xlane.xlu1 %409 }
 0x11a   : > { %v411_v21 = vsub.f32 %v407_v17, %v410_v20 }
 0x11c   : > { %v412_v22 = vmul.f32 1.442695, %v411_v21 }
 0x11e   : > { %989 = vpow2.f32 %v412_v22  ;;  %v470_v23 = vpop.f32.mrf.mxu2 }
 0x11f   : > { %v474_v24 = vmul.f32 0.35355338, %v470_v23 }
 0x121   : > { %v475_v25 = vsel %vm1213_vm2, -1e+09, %v474_v24 }
 0x122   : > { %v476_v26 = vsel %vm386_vm0, %v475_v25, -inf }
 0x123   : > { %477 = vmax.xlane.f32.xlu2 %v476_v26 }
 0x124   : > { %v990_v27 = vpop.eup %989 }
 0x125   : > { %v414_v28 = vsel %vm386_vm0, %v990_v27, 0.0 }
 0x126   : > { %v472_v29 = vpop.f32.mrf.mxu2  ;;  %415 = vadd.xlane.f32.xlu1 %v414_v28 }
 0x13b   : > { %633 = vrot.lane.b32.xlu2 %v450_v6, %s1088_s16 }
 0x13f   : > { %490 = vrot.lane.b32.xlu1 %v1202_v4, %s1089_s17 }
 0x147   : > { %635 = vrot.lane.b32.xlu1 %v1202_v4, %s1088_s16  ;;  %s731_s16 = scalar_lea.sflag [#allocation3], %s346_s19 }
 0x14f   : > { %553 = vrot.lane.b32.xlu1 %v1202_v4, %s1090_s18 }
 0x157   : > { %551 = vrot.lane.b32.xlu1 %v450_v6, %s1090_s18 }
 0x196   : > { %v478_v32 = vpop.xlane.xlu2 %477 }
 0x197   : > { %v479_v33 = vsub.f32 %v475_v25, %v478_v32  ;;  %v617_v32 = vsel %vm429_vm3, %v612_v31, 0 }
 0x199   : > { %v480_v34 = vmul.f32 1.442695, %v479_v33  ;;  %v416_v35 = vpop.xlane.xlu1 %415 }
 0x19a   : > { %991 = vrcp.f32 %v416_v35 }
 0x19b   : > { %993 = vpow2.f32 %v480_v34  ;;  %v694_v34 = vld [vmem:[%s1342_s4 + $0xc] sm:$0xf] }
 0x19c   : > { %v699_v35 = vsel %vm429_vm3, %v694_v34, 0 }
 0x19e   : > { %v634_v57 = vpop.permute.xlu2 %633 }
 0x1a0   : > { %v992_v36 = vpop.eup %991 }
 0x1a1   : > { %v994_v37 = vpop.eup %993  ;;  %v418_v38 = vmul.f32 %v992_v36, %v990_v27 }
 0x1a2   : > { %v482_v39 = vsel %vm386_vm0, %v994_v37, 0.0 }
 0x1a3   : > { %483 = vadd.xlane.f32.xlu0 %v482_v39  ;;  %419 = vst.msk [vmem:[%s1232_s21] sm:$0xff] %vm386_vm0, %v418_v38  ;;  %v420_v40 = vpack.c.bf16 %v418_v38, %v418_v38 }
 0x1a5   : > { %903 = vmatmul.msk.bf16.vlgmr.msra.gmra.mxu1 %vm386_vm0, %v420_v40 }
 0x1a6   : > { %626 = vmatpush.bf16.msra.mxu1 %v617_v32 }
 0x1b1   : > { %v491_v41 = vpop.permute.xlu1 %490 }
 0x1b2   : > { %v496_v42 = vsel %vm429_vm3, %v491_v41, 0 }
 0x1b3   : > { %505 = vmatpush.bf16.msra.mxu3 %v496_v42 }
 0x1b7   : > { %545 = vmatpush.bf16.msrb.mxu3 %v536_v48 }
 0x1b9   : > { %v636_v43 = vpop.permute.xlu1 %635 }
 0x1ba   : > { %v641_v52 = vsel %vm386_vm0, %v636_v43, 0 }
 0x1c1   : > { %v554_v44 = vpop.permute.xlu1 %553 }
 0x1c2   : > { %v559_v45 = vsel %vm386_vm0, %v554_v44, 0 }
 0x1c3   : > { %568 = vmatpush.bf16.xpose.msrb.mxu0 %v559_v45 }
 0x1c9   : > { %v552_v46 = vpop.permute.xlu1 %551 }
 0x1ca   : > { %909 = vmatmul.msk.bf16.vlgmr.msrb.gmra.mxu0 %vm386_vm0, %v552_v46 }
 0x216   : > { %v484_v49 = vpop.xlane.xlu0 %483 }
 0x217   : > { %995 = vrcp.f32 %v484_v49 }
 0x21d   : > { %v996_v50 = vpop.eup %995 }
 0x21e   : > { %v486_v51 = vmul.f32 %v996_v50, %v994_v37 }
 0x220   : > { %905 = vst.msk [vmem:[%s1232_s21 + $0x8] sm:$0xff] %vm386_vm0, %v486_v51  ;;  %v489_v53 = vpack.c.bf16 %v486_v51, %v486_v51 }
 0x222   : > { %v442_v54 = vpop.f32.mrf.mxu1  ;;  %906 = vmatmul.msk.bf16.vlgmr.msra.gmra.mxu3 %vm386_vm0, %v489_v53 }
 0x223   : > { %650 = vmatpush.bf16.xpose.msra.mxu3 %v641_v52  ;;  %v446_v56 = vpack.c.bf16 %v442_v54, %v442_v54 }
 0x22a   : > { %v444_v55 = vpop.f32.mrf.mxu1 }
 0x232   : > { %908 = vmatmul.msk.bf16.vlgmr.msrb.gmra.mxu3 %vm386_vm0, %v446_v56 }
 0x242   : > { %913 = vmatmul.msk.bf16.vlgmr.msra.gmra.mxu3 %vm386_vm0, %v634_v57 }
 0x247   : > { %v570_v58 = vpop.f32.mrf.mxu0 }
 0x248   : > { %v574_v59 = vmul.f32 0.35355338, %v570_v58 }
 0x24a   : > { %v575_v60 = vsel %vm1213_vm2, -1e+09, %v574_v59 }
 0x24b   : > { %v576_v61 = vsel %vm386_vm0, %v575_v60, -inf }
 0x24c   : > { %577 = vmax.xlane.f32.xlu0 %v576_v61 }
 0x24f   : > { %v572_v62 = vpop.f32.mrf.mxu0 }
 0x2a5   : > { %v507_v1 = vpop.f32.mrf.mxu3 }
 0x2a6   : > { %v511_v2 = vpack.c.bf16 %v507_v1, %v507_v1 }
 0x2a8   : > { %907 = vmatmul.msk.bf16.vlgmr.msrb.gmra.mxu1 %vm386_vm0, %v511_v2 }
 0x2ad   : > { %v509_v3 = vpop.f32.mrf.mxu3 }
 0x2b5   : > { %v1258_v5 = vpop.f32.mrf.mxu3 }
 0x2bd   : > { %v549_v6 = vpop.f32.mrf.mxu3 }
 0x2bf   : > { %v578_v7 = vpop.xlane.xlu0 %577 }
 0x2c0   : > { %v579_v8 = vsub.f32 %v575_v60, %v578_v7 }
 0x2c2   : > { %v580_v9 = vmul.f32 1.442695, %v579_v8 }
 0x2c4   : > { %997 = vpow2.f32 %v580_v9 }
 0x2c5   : > { %v652_v10 = vpop.f32.mrf.mxu3 }
 0x2c6   : > { %v656_v11 = vmul.f32 0.35355338, %v652_v10 }
 0x2c8   : > { %v657_v12 = vsel %vm1213_vm2, -1e+09, %v656_v11 }
 0x2c9   : > { %v658_v13 = vsel %vm386_vm0, %v657_v12, -inf }
 0x2ca   : > { %v998_v14 = vpop.eup %997  ;;  %659 = vmax.xlane.f32.xlu1 %v658_v13 }
 0x2cb   : > { %v582_v16 = vsel %vm386_vm0, %v998_v14, 0.0 }
 0x2cc   : > { %583 = vadd.xlane.f32.xlu0 %v582_v16 }
 0x2cd   : > { %v654_v17 = vpop.f32.mrf.mxu3 }
 0x2e0   : > { %590 = vrot.lane.b32.xlu0 %v1202_v4, %s1091_s10  ;;  %s747_s10 = sshll.u32 %s1232_s21, 4  ;;  %s748_s10 = int_to_ptr.vmem [resolvable:$true] %s747_s10 }
 0x2e8   : > { %672 = vrot.lane.b32.xlu0 %v1202_v4, %s1092_s12  ;;  %s749_s12 = sshll.u32 %s746_s8, 4  ;;  %s750_s12 = int_to_ptr.hbm [resolvable:$true] %s749_s12 }
 0x2e9   : > { %s1019_s17 = sshra.s32 %s750_s12, 4  ;;  %s1020_s17 = int_to_ptr.hbm [resolvable:$true] %s1019_s17 }
 0x2ea   : > { %s1021_s18 = scalar_lea.hbm %s1020_s17, 32  ;;  %p1026_p1 = scmp.lt.s32.totalorder %s1020_s17, %s1345_s7 }
 0x2eb   : > { %p1022_p12 = scmp.ne.s32.totalorder %s1020_s17, %s1021_s18  ;;  %p1027_p2 = scmp.lt.s32.totalorder %s1025_s27, %s1021_s18 }
 0x2ed   : > { %p1023_p13 = pnand %p1022_p12, %p1175_p4  ;;  %p1028_p3 = por %p1027_p2, %p1026_p1 }
 0x2ef   : > { %p1024_p0 = pneg %p1023_p13 }
 0x2f1   : > { %p1029_p5 = pnand %p1028_p3, %p1024_p0 }
 0x325   : > { %v1266_v18 = vpop.f32.mrf.mxu1 }
 0x32d   : > { %v530_v19 = vpop.f32.mrf.mxu1 }
 0x33d   : > { %v660_v15 = vpop.xlane.xlu1 %659 }
 0x33e   : > { %v661_v20 = vsub.f32 %v657_v12, %v660_v15 }
 0x33f   : > { %v584_v21 = vpop.xlane.xlu0 %583 }
 0x340   : > { %v662_v22 = vmul.f32 1.442695, %v661_v20  ;;  %999 = vrcp.f32 %v584_v21 }
 0x342   : > { %1001 = vpow2.f32 %v662_v22 }
 0x346   : > { %v1000_v23 = vpop.eup %999 }
 0x347   : > { %v586_v24 = vmul.f32 %v1000_v23, %v998_v14 }
 0x348   : > { %v1002_v25 = vpop.eup %1001 }
 0x349   : > { %910 = vst.msk [vmem:[%s1232_s21 + $0x10] sm:$0xff] %vm386_vm0, %v586_v24  ;;  %v664_v26 = vsel %vm386_vm0, %v1002_v25, 0.0  ;;  %v589_v28 = vpack.c.bf16 %v586_v24, %v586_v24 }
 0x34a   : > { %665 = vadd.xlane.f32.xlu2 %v664_v26 }
 0x352   : > { %v591_v27 = vpop.permute.xlu0 %590 }
 0x353   : > { %v596_v4 = vsel %vm429_vm3, %v591_v27, 0 }
 0x354   : > { %605 = vmatpush.bf16.msrb.mxu2 %v596_v4 }
 0x357   : > { %911 = vmatmul.msk.bf16.vlgmr.msrb.gmra.mxu2 %vm386_vm0, %v589_v28 }
 0x358   : > { %708 = vmatpush.bf16.msra.mxu2 %v699_v35 }
 0x35a   : > { %v673_v29 = vpop.permute.xlu0 %672 }
 0x35b   : > { %v678_v30 = vsel %vm429_vm3, %v673_v29, 0 }
 0x35c   : > { %687 = vmatpush.bf16.msra.mxu0 %v678_v30 }
 0x3bd   : > { %v666_v33 = vpop.xlane.xlu2 %665 }
 0x3be   : > { %1003 = vrcp.f32 %v666_v33 }
 0x3c4   : > { %v1004_v36 = vpop.eup %1003 }
 0x3c5   : > { %v668_v37 = vmul.f32 %v1004_v36, %v1002_v25 }
 0x3c7   : > { %914 = vst.msk [vmem:[%s1232_s21 + $0x18] sm:$0xff] %vm386_vm0, %v668_v37  ;;  %v671_v38 = vpack.c.bf16 %v668_v37, %v668_v37 }
 0x3c9   : > { %915 = vmatmul.msk.bf16.vlgmr.msra.gmra.mxu0 %vm386_vm0, %v671_v38 }
 0x3da   : > { %v607_v39 = vpop.f32.mrf.mxu2 }
 0x3db   : > { %v611_v40 = vpack.c.bf16 %v607_v39, %v607_v39 }
 0x3dd   : > { %912 = vmatmul.msk.bf16.vlgmr.msra.gmra.mxu1 %vm386_vm0, %v611_v40 }
 0x3e2   : > { %v609_v41 = vpop.f32.mrf.mxu2 }
 0x446   : > { %v689_v42 = vpop.f32.mrf.mxu0 }
 0x447   : > { %v693_v43 = vpack.c.bf16 %v689_v42, %v689_v42 }
 0x449   : > { %916 = vmatmul.msk.bf16.vlgmr.msra.gmra.mxu2 %vm386_vm0, %v693_v43 }
 0x44e   : > { %v691_v44 = vpop.f32.mrf.mxu0 }
 0x44f   : > { %1032 = shalt.err (!%p1029_p5)
}
 0x450   : > { %s1093_s19 = smov 128   ;;  %s1094_s21 = smov 8   ;;  %v548_v45 = vadd.f32 %v1258_v5, %v1266_v18  ;;  %v988_v49 = vld [vmem:[%s1343_s5] ss:$0 sm:$0xff]  ;;  %vm721_vm4 = vcmask 261120  }
 0x451   : > { %923 = dma.vmem_to_hbm [thread:$0]  (%p1175_p4), %s748_s10, 512, %s750_s12, %s731_s16, %s1093_s19, %s1093_s19, %s1094_s21  }
 0x452   : > { %s900_s0 = sshll.u32 %s1192_s15, 3 }
 0x453   : > { %s369_s30 = scalar_lea.vmem %s1341_s3, %s900_s0  ;;  %s376_s12 = scalar_lea.vmem %s1344_s6, %s900_s0 }
 0x454   : > { %v380_v52 = vld [vmem:[%s369_s30] sm:$0xff] }
 0x45a   : > { %v628_v46 = vpop.f32.mrf.mxu1 }
 0x45b   : > { %v632_v47 = vadd.f32 %v628_v46, %v548_v45 }
 0x462   : > { %v630_v48 = vpop.f32.mrf.mxu1 }
 0x4cc   : > { %v710_v50 = vpop.f32.mrf.mxu2 }
 0x4cd   : > { %v714_v51 = vadd.f32 %v710_v50, %v632_v47 }
 0x4cf   : > { %v719_v53 = vadd.f32 %v988_v49, %v714_v51 }
 0x4d1   : > { %v720_v54 = vadd.f32 %v719_v53, %v380_v52 }
 0x4d3   : > { %722 = vst.msk [vmem:[%s376_s12] sm:$0xff] %vm721_vm4, %v720_v54 }
 0x4d4   : > { %v712_v55 = vpop.f32.mrf.mxu2 }
 0x4d5 PF: > { %p929_p4 = scmp.ge.s32.totalorder %s1083_s29, 2  ;;  %s774_s15 = sand.u32 1, %s1063_s24  }
 0x4d6   : > { %s775_s16 = scalar_lea.sflag [#allocation3], %s774_s15 }
 0x4d7   : > { %p926_p6 = pnand %p929_p4, %p1182_p8 }
 0x4d9   : > { %p927_p7 = pneg %p926_p6 }
 0x4db   : > { %1058 = dma.done.wait (%p927_p7), %s775_s16, 512  }
 0x4dc   : > { %1060 = vsyncadd (%p927_p7), %s775_s16, 4294966784  ;;  %s21_s29 = sadd.s32 1, %s1083_s29   ;;  %s1354_s24 = smov %s1067_s25 }
 0x4dd   : > { %p18_p9 = scmp.ge.s32.totalorder %s21_s29, 4   ;;  %s1355_s25 = smov %s1071_s26 }
 0x4de   : > { %s1356_s26 = smov %s1188_s14  ;;  %s1357_s27 = smov %s1079_s28 }
 0x4df   : > { %s1358_s28 = smov %s1360_s9  ;;  %20 = sbr.rel (!%p18_p9) target bundleno = 7 (0x7), region = 103 }
 0x4e4   :  { %781 = vsyncpa [#allocation3], 1 }
 0x4e5   :  { %783 = vsyncpa [#allocation3 + $0x1], 1 }

// kernel: transformer_forward.31
= control target key start
LH: loop header
LB: loop body
LE: loop exit
PB: predicated region body
PF: predicated region fallthrough
CT: control target
= control target key end

     0   :  { %vm30_vm0 = vcmask 261120   ;;  %s281_s0 = inlined_call_operand.vmem [shape: f32[16,32], index: 0, kind: input, shape index: {}]   ;;  %s282_s1 = inlined_call_operand.vmem [shape: f32[1,32], index: 1, kind: input, shape index: {}]   ;;  %s283_s2 = inlined_call_operand.vmem [shape: f32[1,32], index: 2, kind: input, shape index: {}]   ;;  %s284_s3 = inlined_call_operand.vmem [shape: bf16[32,60], index: 3, kind: input, shape index: {}]   ;;  %s285_s4 = inlined_call_operand.vmem [shape: f32[1,60], index: 4, kind: input, shape index: {}]   ;;  %s286_s5 = inlined_call_operand.hbm [shape: f32[16,60], index: 5, kind: output, shape index: {}]  }
   0x1   :  { %v26_v0 = vld [vmem:[%s281_s0] sm:$0xff] }
   0x2   :  { %v31_v1 = vsel %vm30_vm0, %v26_v0, 0.0 }
   0x3   :  { %32 = vadd.xlane.f32.xlu0 %v31_v1 }
   0x4   :  { %10 = vsyncpa [#allocation4], 0  ;;  %v27_v2 = vld [vmem:[%s281_s0 + $0x8] sm:$0xff]  ;;  %v218_v4 = vmov 32.0   ;;  %v177_v27 = vld [vmem:[%s284_s3] sm:$0xff]  ;;  %vm94_vm6 = vcmask 257024  }
   0x5   :  { %v34_v3 = vsel %vm30_vm0, %v27_v2, 0.0  ;;  %186 = vrcp.f32 %v218_v4  ;;  %v178_v24 = vld [vmem:[%s284_s3 + $0x8] sm:$0xff]  ;;  %v183_v37 = vld [vmem:[%s282_s1] ss:$0 sm:$0xff]  ;;  %vm142_vm9 = vcmask 490496   ;;  %s219_s28 = smov [#allocation3]  }
   0x6   :  { %134 = vmatpush.bf16.msra.mxu0 %v178_v24  ;;  %v184_v40 = vld [vmem:[%s283_s2] ss:$0 sm:$0xff]  ;;  %s149_s29 = sshll.u32 %s219_s28, 4  ;;  %s151_s7 = sshll.u32 %s286_s5, 4  ;;  %s150_s29 = int_to_ptr.vmem [resolvable:$true] %s149_s29  ;;  %s152_s7 = int_to_ptr.hbm [resolvable:$true] %s151_s7 }
   0x7   :  { %v185_v54 = vld [vmem:[%s285_s4] ss:$0 sm:$0xff]  ;;  %s220_s8 = smov 128   ;;  %s221_s9 = smov 8  }
   0xa   :  { %135 = vmatpush.bf16.msra.mxu0 %v177_v27 }
   0xb   :  { %35 = vadd.xlane.f32.xlu0 %v34_v3  ;;  %v187_v5 = vpop.eup %186 }
   0xc   :  { %v38_v6 = vmul.f32 32.0, %v187_v5  ;;  %vm42_vm1 = vweird.f32 %v187_v5 }
   0xe   :  { %v39_v7 = vsub.f32 1.0, %v38_v6 }
  0x10   :  { %v40_v8 = vmul.f32 %v187_v5, %v39_v7 }
  0x12   :  { %v41_v9 = vadd.f32 %v187_v5, %v40_v8 }
  0x14   :  { %v43_v10 = vsel %vm42_vm1, %v187_v5, %v41_v9 }
  0x76   :  { %v33_v11 = vpop.xlane.xlu0 %32 }
  0x77   :  { %v44_v12 = vmul.f32 %v43_v10, %v33_v11 }
  0x79   :  { %v46_v13 = vsub.f32 %v26_v0, %v44_v12 }
  0x7b   :  { %v48_v14 = vmul.f32 %v46_v13, %v46_v13 }
  0x7d   :  { %v50_v15 = vsel %vm30_vm0, %v48_v14, 0.0 }
  0x7e   :  { %51 = vadd.xlane.f32.xlu1 %v50_v15  ;;  %v36_v16 = vpop.xlane.xlu0 %35 }
  0x7f   :  { %v45_v17 = vmul.f32 %v43_v10, %v36_v16 }
  0x81   :  { %v47_v18 = vsub.f32 %v27_v2, %v45_v17 }
  0x83   :  { %v49_v19 = vmul.f32 %v47_v18, %v47_v18 }
  0x85   :  { %v53_v20 = vsel %vm30_vm0, %v49_v19, 0.0 }
  0x86   :  { %54 = vadd.xlane.f32.xlu1 %v53_v20 }
  0xf1   :  { %v52_v21 = vpop.xlane.xlu1 %51 }
  0xf2   :  { %v56_v22 = vmul.f32 %v52_v21, %v43_v10 }
  0xf4   :  { %v58_v23 = vadd.f32 1e-06, %v56_v22 }
  0xf6   :  { %188 = vrsqrt.f32 %v58_v23  ;;  %vm66_vm3 = vweird.f32 %v58_v23 }
  0xf9   :  { %v55_v25 = vpop.xlane.xlu1 %54 }
  0xfa   :  { %v57_v26 = vmul.f32 %v55_v25, %v43_v10 }
  0xfc   :  { %v189_v28 = vpop.eup %188  ;;  %v59_v29 = vadd.f32 1e-06, %v57_v26 }
  0xfd   :  { %v61_v30 = vmul.f32 %v189_v28, %v58_v23  ;;  %vm67_vm2 = vweird.f32 %v189_v28 }
  0xfe   :  { %190 = vrsqrt.f32 %v59_v29  ;;  %vm68_vm4 = vmor %vm66_vm3, %vm67_vm2  ;;  %vm76_vm7 = vweird.f32 %v59_v29 }
  0xff   :  { %v62_v31 = vmul.f32 %v189_v28, %v61_v30 }
 0x101   :  { %v63_v32 = vmul.f32 0.5, %v62_v31 }
 0x103   :  { %v64_v33 = vsub.f32 1.5, %v63_v32 }
 0x104   :  { %v191_v34 = vpop.eup %190 }
 0x105   :  { %v65_v35 = vmul.f32 %v189_v28, %v64_v33  ;;  %v71_v36 = vmul.f32 %v191_v34, %v59_v29  ;;  %vm77_vm5 = vweird.f32 %v191_v34 }
 0x106   :  { %vm78_vm8 = vmor %vm76_vm7, %vm77_vm5 }
 0x107   :  { %v69_v38 = vsel %vm68_vm4, %v189_v28, %v65_v35  ;;  %v72_v39 = vmul.f32 %v191_v34, %v71_v36 }
 0x108   :  { %v80_v41 = vmul.f32 %v69_v38, %v46_v13 }
 0x109   :  { %v73_v42 = vmul.f32 0.5, %v72_v39 }
 0x10a   :  { %v85_v43 = vmul.f32 %v183_v37, %v80_v41 }
 0x10b   :  { %v74_v44 = vsub.f32 1.5, %v73_v42 }
 0x10c   :  { %v90_v45 = vadd.f32 %v184_v40, %v85_v43 }
 0x10d   :  { %v75_v46 = vmul.f32 %v191_v34, %v74_v44 }
 0x10e   :  { %v92_v47 = vpack.c.bf16 %v90_v45, %v90_v45 }
 0x10f   :  { %v79_v48 = vsel %vm78_vm8, %v191_v34, %v75_v46 }
 0x110   :  { %95 = vst.msk [vmem:[#allocation2] sm:$0xf] %vm94_vm6, %v92_v47  ;;  %v81_v49 = vmul.f32 %v79_v48, %v47_v18 }
 0x112   :  { %v86_v50 = vmul.f32 %v183_v37, %v81_v49 }
 0x114   :  { %v91_v51 = vadd.f32 %v184_v40, %v86_v50 }
 0x116   :  { %v93_v52 = vpack.c.bf16 %v91_v51, %v91_v51 }
 0x118   :  { %96 = vst.msk [vmem:[#allocation2 + $0x4] sm:$0xf] %vm94_vm6, %v93_v52 }
 0x11f   :  { %v176_v53 = vld [vmem:[#allocation2] sm:$0xff] }
 0x120   :  { %175 = vmatmul.msk.bf16.vlgmr.msra.gmra.mxu0 %vm30_vm0, %v176_v53 }
 0x19d   :  { %v137_v55 = vpop.f32.mrf.mxu0 }
 0x19e   :  { %v138_v56 = vadd.f32 %v185_v54, %v137_v55 }
 0x1a0   :  { %143 = vst.msk [vmem:[#allocation3] sm:$0xff] %vm142_vm9, %v138_v56 }
 0x1a5   :  { %v139_v57 = vpop.f32.mrf.mxu0 }
 0x1a6   :  { %v140_v58 = vadd.f32 %v185_v54, %v139_v57 }
 0x1a8   :  { %144 = vst.msk [vmem:[#allocation3 + $0x8] sm:$0xff] %vm142_vm9, %v140_v58 }
 0x1a9   :  { %157 = dma.vmem_to_hbm [thread:$0]  %s150_s29, 256, %s152_s7, [#allocation4], %s220_s8, %s220_s8, %s221_s9  }
 0x1aa   :  { %216 = dma.done.wait [#allocation4], 256  }
 0x1ab   :  { %217 = vsyncadd [#allocation4], 4294967040 }
 0x1ac   :  { %162 = vsyncpa [#allocation4], 1 }

</bundles_post_ra>
